<compile_context>
chip_gen: v7x
topology: tpu7x:2x2x1
jax: 0.10.0
libtpu: 0.0.40
codegen_flags: <defaults>
</compile_context>

<pallas_src>
import functools

import jax
import jax.numpy as jnp
from jax import lax
from jax.experimental import pallas as pl
from jax.experimental.pallas import tpu as pltpu

BOS = 2
PAD = 0
_NEG = -1e30  # bias for padded vocab columns -> never wins the greedy argmax


def _round_up(n, m):
    return ((n + m - 1) // m) * m


def _seq2seq_kernel(gi_x_ref, lens_ref,
                    enc_whh_ref, enc_bhh_ref,
                    dec_emb_fused_ref, dec_whh_ref, dec_bhh_ref,
                    out_w_ref, out_b_ref,
                    dec_out_ref):
    Tx, B, H3 = gi_x_ref.shape          # gi_x already includes enc_b_ih
    H = H3 // 3                         # gate order (r, z, n), each on a 128-lane slot
    Ty, _, Vp = dec_out_ref.shape

    lens = lens_ref[...]                # (B, 1) int32, loaded once

    # ---------------- Encoder (packed-sequence semantics via in-kernel length check) -------
    enc_whh = enc_whh_ref[...]
    enc_bhh = jnp.broadcast_to(enc_bhh_ref[...], (B, H3))   # hoisted: one broadcast, not Tx

    h = jnp.zeros((B, H), jnp.float32)
    for t in range(Tx):                 # fully unrolled (Tx static & small)
        gi = gi_x_ref[t]                                    # (B, 3H) f32, includes b_ih
        gh = jnp.dot(h.astype(enc_whh.dtype), enc_whh,
                     preferred_element_type=jnp.float32) + enc_bhh
        r = jax.nn.sigmoid(gi[:, 0 * H:1 * H] + gh[:, 0 * H:1 * H])
        z = jax.nn.sigmoid(gi[:, 1 * H:2 * H] + gh[:, 1 * H:2 * H])
        n = jnp.tanh(gi[:, 2 * H:3 * H] + r * gh[:, 2 * H:3 * H])
        h_new = (1.0 - z) * n + z * h
        h = jnp.where(lens > t, h_new, h)                   # freeze rows past their length

    # ---------------- Greedy decoder --------------------------------------------------------
    # TODO(synk): use_teacher_forcing path (feeding batch_Y[t]) not implemented; greedy only.
    # TODO(synk): for production H/V sizes, tile out_w over V and DMA-gather the decoder
    #             embedding row (memory_space=pl.ANY) instead of whole-array VMEM blocks.
    dec_emb_fused = dec_emb_fused_ref[...]  # (Vp, 3H): row v = dec_emb[v] @ W_ih + b_ih
    dec_whh = dec_whh_ref[...]
    dec_bhh = jnp.broadcast_to(dec_bhh_ref[...], (B, H3))   # hoisted
    out_w = out_w_ref[...]
    out_b = jnp.broadcast_to(out_b_ref[...], (B, Vp))       # padded cols carry -1e30 bias

    iota_v = lax.broadcasted_iota(jnp.int32, (B, Vp), 1)
    tok = jnp.full((B, 1), BOS, dtype=jnp.int32)
    for t in range(Ty):                 # fully unrolled (Ty static & small)
        onehot = (iota_v == tok).astype(dec_emb_fused.dtype)                 # (B, Vp)
        gi = jnp.dot(onehot, dec_emb_fused,
                     preferred_element_type=jnp.float32)                     # emb+proj+bias
        gh = jnp.dot(h.astype(dec_whh.dtype), dec_whh,
                     preferred_element_type=jnp.float32) + dec_bhh
        r = jax.nn.sigmoid(gi[:, 0 * H:1 * H] + gh[:, 0 * H:1 * H])
        z = jax.nn.sigmoid(gi[:, 1 * H:2 * H] + gh[:, 1 * H:2 * H])
        n = jnp.tanh(gi[:, 2 * H:3 * H] + r * gh[:, 2 * H:3 * H])
        h = (1.0 - z) * n + z * h
        logits = jnp.dot(h.astype(out_w.dtype), out_w,
                         preferred_element_type=jnp.float32) + out_b         # (B, Vp)
        dec_out_ref[t] = logits                                              # lane-dense store
        # greedy argmax (first index among ties); padded columns are -1e30 so never chosen
        maxv = jnp.max(logits, axis=-1, keepdims=True)
        tok = jnp.min(jnp.where(logits >= maxv, iota_v, Vp),
                      axis=-1, keepdims=True).astype(jnp.int32)


@functools.partial(jax.jit, static_argnames=("max_length", "weight_dtype"))
def encoder_decoder_forward(batch_X, lengths_X, max_length, params,
                            weight_dtype=jnp.bfloat16):
    """batch_X: (Tx, B) int32 token ids (PAD=0 after lengths); lengths_X: (B,) int32.

    Weights/embeddings are stored in `weight_dtype` (default bf16, MXU-native); biases and
    all accumulation stay f32. Use weight_dtype=jnp.float32 for strict f32 parity.
    """
    Tx, B = batch_X.shape
    H = params["enc_emb"].shape[1]
    V = params["dec_emb"].shape[0]

    Bp = _round_up(B, 8)
    Hp = _round_up(H, 128)                      # lane width
    Vp = _round_up(V, 128)

    # Batch tile: as many sublanes as possible (better MXU M utilization, fewer serial GRU
    # iterations), but keep >= 2 grid steps when the batch allows so the "parallel" axis can
    # span both v7x TensorCores. Capped at 32 to bound vreg pressure in the unrolled loops.
    B_TILE = Bp if Bp <= 8 else 8
    for cand in (32, 16):
        if Bp % cand == 0 and Bp // cand >= 2:
            B_TILE = cand
            break

    def fuse_w(w3):  # (3, H, H) -> (Hp, 3*Hp) f32; each gate on a lane-aligned 128-wide slot
        w = jnp.zeros((3, Hp, Hp), jnp.float32).at[:, :H, :H].set(w3)
        return jnp.concatenate([w[0], w[1], w[2]], axis=1)

    def fuse_b(b3):  # (3, 1, H) -> (1, 3*Hp) f32
        b = jnp.zeros((3, 1, Hp), jnp.float32).at[:, :, :H].set(b3)
        return jnp.concatenate([b[0], b[1], b[2]], axis=1)

    enc_wih = fuse_w(params["enc_w_ih"]); enc_whh = fuse_w(params["enc_w_hh"])
    enc_bih = fuse_b(params["enc_b_ih"]); enc_bhh = fuse_b(params["enc_b_hh"])
    dec_wih = fuse_w(params["dec_w_ih"]); dec_whh = fuse_w(params["dec_w_hh"])
    dec_bih = fuse_b(params["dec_b_ih"]); dec_bhh = fuse_b(params["dec_b_hh"])

    # --- hoisted encoder input projection: one big MXU-friendly matmul outside the kernel ---
    emb = params["enc_emb"][batch_X]                                         # (Tx, B, H)
    emb_p = jnp.zeros((Tx, Bp, Hp), jnp.float32).at[:, :B, :H].set(emb)
    gi_x = (jnp.dot(emb_p.reshape(Tx * Bp, Hp).astype(weight_dtype),
                    enc_wih.astype(weight_dtype),
                    preferred_element_type=jnp.float32)
            .reshape(Tx, Bp, 3 * Hp) + enc_bih)                              # f32, + b_ih

    # --- fused decoder input path: row v = dec_emb[v] @ W_ih + b_ih --------------------------
    dec_emb_p = jnp.zeros((Vp, Hp), jnp.float32).at[:V, :H].set(params["dec_emb"])
    dec_emb_fused = (jnp.dot(dec_emb_p.astype(weight_dtype), dec_wih.astype(weight_dtype),
                             preferred_element_type=jnp.float32) + dec_bih
                     ).astype(weight_dtype)                                  # (Vp, 3*Hp)

    out_w = (jnp.zeros((Hp, Vp), jnp.float32)
             .at[:H, :V].set(params["out_w"]).astype(weight_dtype))
    out_b = jnp.full((1, Vp), _NEG, jnp.float32).at[:, :V].set(params["out_b"])

    enc_whh_c = enc_whh.astype(weight_dtype)
    dec_whh_c = dec_whh.astype(weight_dtype)

    # lengths as a tiny int32 vector (loaded once) instead of a (Tx, Bp, 1) f32 mask stream
    lens = jnp.zeros((Bp, 1), jnp.int32).at[:B, 0].set(lengths_X.astype(jnp.int32))

    def const_spec(shape):  # whole-array block, same block for every grid step
        z = (0,) * len(shape)
        return pl.BlockSpec(shape, lambda b, _z=z: _z)

    in_specs = [
        pl.BlockSpec((Tx, B_TILE, 3 * Hp), lambda b: (0, b, 0)),   # gi_x  (batch-tiled)
        pl.BlockSpec((B_TILE, 1), lambda b: (b, 0)),               # lens  (batch-tiled)
        const_spec(enc_whh_c.shape), const_spec(enc_bhh.shape),
        const_spec(dec_emb_fused.shape),
        const_spec(dec_whh_c.shape), const_spec(dec_bhh.shape),
        const_spec(out_w.shape), const_spec(out_b.shape),
    ]

    out = pl.pallas_call(
        _seq2seq_kernel,
        out_shape=jax.ShapeDtypeStruct((max_length, Bp, Vp), jnp.float32),
        grid=(Bp // B_TILE,),
        in_specs=in_specs,
        out_specs=pl.BlockSpec((max_length, B_TILE, Vp), lambda b: (0, b, 0)),
        compiler_params=pltpu.CompilerParams(dimension_semantics=("parallel",)),
    )(gi_x, lens,
      enc_whh_c, enc_bhh,
      dec_emb_fused, dec_whh_c, dec_bhh,
      out_w, out_b)

    return out[:, :B, :V]


# ----------------------------- pure-JAX reference ------------------------------------
def _gru_cell_ref(x, h, w_ih, w_hh, b_ih, b_hh):
    r = jax.nn.sigmoid(x @ w_ih[0] + b_ih[0] + h @ w_hh[0] + b_hh[0])
    z = jax.nn.sigmoid(x @ w_ih[1] + b_ih[1] + h @ w_hh[1] + b_hh[1])
    n = jnp.tanh(x @ w_ih[2] + b_ih[2] + r * (h @ w_hh[2] + b_hh[2]))
    return (1.0 - z) * n + z * h


def reference_forward(batch_X, lengths_X, max_length, params):
    Tx, B = batch_X.shape
    emb_x = params["enc_emb"][batch_X]
    h = jnp.zeros((B, params["enc_emb"].shape[1]), jnp.float32)
    for t in range(Tx):
        m = (t < lengths_X).astype(jnp.float32)[:, None]
        hn = _gru_cell_ref(emb_x[t], h, params["enc_w_ih"], params["enc_w_hh"],
                           params["enc_b_ih"], params["enc_b_hh"])
        h = m * hn + (1.0 - m) * h
    tok = jnp.full((B,), BOS, dtype=jnp.int32)
    outs = []
    for _ in range(max_length):
        x = params["dec_emb"][tok]
        h = _gru_cell_ref(x, h, params["dec_w_ih"], params["dec_w_hh"],
                          params["dec_b_ih"], params["dec_b_hh"])
        logits = h @ params["out_w"] + params["out_b"]      # Decoder.out = Linear(h)
        outs.append(logits)
        tok = jnp.argmax(logits, axis=-1).astype(jnp.int32)
    return jnp.stack(outs, axis=0)


# ----------------------------- parameter init ----------------------------------------
def init_params(key, input_size, output_size, hidden_size):
    ks = jax.random.split(key, 12)
    s = 0.1
    H = hidden_size

    def u(k, shape):
        return jax.random.uniform(k, shape, jnp.float32, -s, s)

    enc_emb = u(ks[0], (input_size, H)).at[PAD].set(0.0)     # padding_idx=PAD
    dec_emb = u(ks[1], (output_size, H)).at[PAD].set(0.0)
    return dict(
        enc_emb=enc_emb,
        enc_w_ih=u(ks[2], (3, H, H)), enc_w_hh=u(ks[3], (3, H, H)),
        enc_b_ih=u(ks[4], (3, 1, H)), enc_b_hh=u(ks[5], (3, 1, H)),
        dec_emb=dec_emb,
        dec_w_ih=u(ks[6], (3, H, H)), dec_w_hh=u(ks[7], (3, H, H)),
        dec_b_ih=u(ks[8], (3, 1, H)), dec_b_hh=u(ks[9], (3, 1, H)),
        out_w=u(ks[10], (H, output_size)), out_b=u(ks[11], (1, output_size)),
    )


if __name__ == "__main__":
    input_size, output_size, hidden_size = 19, 17, 32
    Tx, B, max_length = 8, 4, 6

    key = jax.random.PRNGKey(0)
    kp, kx = jax.random.split(key)
    params = init_params(kp, input_size, output_size, hidden_size)

    # lengths must be sorted decreasing (pack_padded_sequence convention)
    lengths_X = jnp.array([8, 6, 5, 3], dtype=jnp.int32)
    toks = jax.random.randint(kx, (Tx, B), 3, input_size, dtype=jnp.int32)
    pad_mask = jnp.arange(Tx)[:, None] < lengths_X[None, :]
    batch_X = jnp.where(pad_mask, toks, PAD)

    # Strict parity check against the f32 reference (use f32 weights for exact comparison).
    out = encoder_decoder_forward(batch_X, lengths_X, max_length, params,
                                  weight_dtype=jnp.float32)
    out = jax.block_until_ready(out)
    ref = reference_forward(batch_X, lengths_X, max_length, params)
    assert out.shape == (max_length, B, output_size)
    assert jnp.allclose(out, ref, rtol=1e-4, atol=1e-5), (
        f"mismatch: max abs diff {jnp.max(jnp.abs(out - ref))}")

    # Default bf16-weight path smoke test (greedy decoding may legitimately diverge from the
    # f32 reference once an argmax tie-breaks differently, so only check shape/finiteness).
    out_bf16 = jax.block_until_ready(
        encoder_decoder_forward(batch_X, lengths_X, max_length, params))
    assert out_bf16.shape == (max_length, B, output_size)
    assert bool(jnp.all(jnp.isfinite(out_bf16)))

    print("KERNEL_OK")
</pallas_src>

<mosaic_0001>
module attributes {stable_mosaic.version = 11 : i64} {
  func.func @_seq2seq_kernel(%arg0: i32, %arg1: memref<8x8x384xf32, #tpu.memory_space<vmem>>, %arg2: memref<8x1xi32, #tpu.memory_space<vmem>>, %arg3: memref<128x384xf32, #tpu.memory_space<vmem>>, %arg4: memref<1x384xf32, #tpu.memory_space<vmem>>, %arg5: memref<128x384xf32, #tpu.memory_space<vmem>>, %arg6: memref<128x384xf32, #tpu.memory_space<vmem>>, %arg7: memref<1x384xf32, #tpu.memory_space<vmem>>, %arg8: memref<128x128xf32, #tpu.memory_space<vmem>>, %arg9: memref<1x128xf32, #tpu.memory_space<vmem>>, %arg10: memref<6x8x128xf32, #tpu.memory_space<vmem>>) attributes {dimension_semantics = [#tpu.dimension_semantics<parallel>], iteration_bounds = array<i64: 1>, scalar_prefetch = 0 : i64, scratch_operands = 0 : i64, tpu.core_type = #tpu.core_type<tc>, window_params = [{transform_indices = @transform_0, window_bounds = array<i64: 8, 8, 384>}, {transform_indices = @transform_1, window_bounds = array<i64: 8, 1>}, {pipeline_mode = #tpu.pipeline_mode<synchronous>, transform_indices = @transform_2, window_bounds = array<i64: 128, 384>}, {pipeline_mode = #tpu.pipeline_mode<synchronous>, transform_indices = @transform_3, window_bounds = array<i64: 1, 384>}, {pipeline_mode = #tpu.pipeline_mode<synchronous>, transform_indices = @transform_4, window_bounds = array<i64: 128, 384>}, {pipeline_mode = #tpu.pipeline_mode<synchronous>, transform_indices = @transform_5, window_bounds = array<i64: 128, 384>}, {pipeline_mode = #tpu.pipeline_mode<synchronous>, transform_indices = @transform_6, window_bounds = array<i64: 1, 384>}, {pipeline_mode = #tpu.pipeline_mode<synchronous>, transform_indices = @transform_7, window_bounds = array<i64: 128, 128>}, {pipeline_mode = #tpu.pipeline_mode<synchronous>, transform_indices = @transform_8, window_bounds = array<i64: 1, 128>}, {transform_indices = @transform_9, window_bounds = array<i64: 6, 8, 128>}]} {
    %c0 = arith.constant 0 : index
    %c0_0 = arith.constant 0 : index
    %0 = vector.load %arg2[%c0, %c0_0] : memref<8x1xi32, #tpu.memory_space<vmem>>, vector<8x1xi32>
    %c0_1 = arith.constant 0 : index
    %c0_2 = arith.constant 0 : index
    %1 = vector.load %arg3[%c0_1, %c0_2] : memref<128x384xf32, #tpu.memory_space<vmem>>, vector<128x384xf32>
    %c0_3 = arith.constant 0 : index
    %c0_4 = arith.constant 0 : index
    %2 = vector.load %arg4[%c0_3, %c0_4] : memref<1x384xf32, #tpu.memory_space<vmem>>, vector<1x384xf32>
    %3 = vector.shape_cast %2 : vector<1x384xf32> to vector<1x384xf32>
    %4 = vector.broadcast %3 : vector<1x384xf32> to vector<8x384xf32>
    %cst = arith.constant 0.000000e+00 : f32
    %5 = vector.broadcast %cst : f32 to vector<8x128xf32>
    %c0_5 = arith.constant 0 : index
    %c0_6 = arith.constant 0 : index
    %c0_7 = arith.constant 0 : index
    %6 = vector.load %arg1[%c0_5, %c0_6, %c0_7] : memref<8x8x384xf32, #tpu.memory_space<vmem>>, vector<1x8x384xf32>
    %7 = vector.shape_cast %6 : vector<1x8x384xf32> to vector<8x384xf32>
    %cst_8 = arith.constant dense<0.000000e+00> : vector<8x384xf32>
    %8 = tpu.matmul %5, %1, %cst_8 {dimension_numbers = #tpu.dot_dimension_numbers<[1], [0], [0], [1], [0, 0, 1, 1], [], []>} : vector<8x128xf32>, vector<128x384xf32>, vector<8x384xf32> -> vector<8x384xf32>
    %9 = arith.addf %8, %4 : vector<8x384xf32>
    %10 = vector.extract_strided_slice %7 {offsets = [0, 0], sizes = [8, 128], strides = [1, 1]} : vector<8x384xf32> to vector<8x128xf32>
    %11 = vector.extract_strided_slice %9 {offsets = [0, 0], sizes = [8, 128], strides = [1, 1]} : vector<8x384xf32> to vector<8x128xf32>
    %12 = arith.addf %10, %11 : vector<8x128xf32>
    %13 = arith.negf %12 : vector<8x128xf32>
    %14 = math.exp %13 : vector<8x128xf32>
    %cst_9 = arith.constant 1.000000e+00 : f32
    %15 = vector.broadcast %cst_9 : f32 to vector<8x128xf32>
    %16 = arith.addf %15, %14 : vector<8x128xf32>
    %17 = arith.divf %15, %16 : vector<8x128xf32>
    %18 = vector.extract_strided_slice %7 {offsets = [0, 128], sizes = [8, 128], strides = [1, 1]} : vector<8x384xf32> to vector<8x128xf32>
    %19 = vector.extract_strided_slice %9 {offsets = [0, 128], sizes = [8, 128], strides = [1, 1]} : vector<8x384xf32> to vector<8x128xf32>
    %20 = arith.addf %18, %19 : vector<8x128xf32>
    %21 = arith.negf %20 : vector<8x128xf32>
    %22 = math.exp %21 : vector<8x128xf32>
    %cst_10 = arith.constant 1.000000e+00 : f32
    %23 = vector.broadcast %cst_10 : f32 to vector<8x128xf32>
    %24 = arith.addf %23, %22 : vector<8x128xf32>
    %25 = arith.divf %23, %24 : vector<8x128xf32>
    %26 = vector.extract_strided_slice %7 {offsets = [0, 256], sizes = [8, 128], strides = [1, 1]} : vector<8x384xf32> to vector<8x128xf32>
    %27 = vector.extract_strided_slice %9 {offsets = [0, 256], sizes = [8, 128], strides = [1, 1]} : vector<8x384xf32> to vector<8x128xf32>
    %28 = arith.mulf %17, %27 : vector<8x128xf32>
    %29 = arith.addf %26, %28 : vector<8x128xf32>
    %30 = math.tanh %29 : vector<8x128xf32>
    %cst_11 = arith.constant 1.000000e+00 : f32
    %31 = vector.broadcast %cst_11 : f32 to vector<8x128xf32>
    %32 = arith.subf %31, %25 : vector<8x128xf32>
    %33 = arith.mulf %32, %30 : vector<8x128xf32>
    %34 = arith.mulf %25, %5 : vector<8x128xf32>
    %35 = arith.addf %33, %34 : vector<8x128xf32>
    %c0_i32 = arith.constant 0 : i32
    %36 = vector.broadcast %c0_i32 : i32 to vector<8x1xi32>
    %37 = arith.cmpi sgt, %0, %36 : vector<8x1xi32>
    %38 = vector.shape_cast %37 : vector<8x1xi1> to vector<8x1xi1>
    %39 = vector.broadcast %38 : vector<8x1xi1> to vector<8x128xi1>
    %40 = arith.select %39, %35, %5 : vector<8x128xi1>, vector<8x128xf32>
    %c1 = arith.constant 1 : index
    %c0_12 = arith.constant 0 : index
    %c0_13 = arith.constant 0 : index
    %41 = vector.load %arg1[%c1, %c0_12, %c0_13] : memref<8x8x384xf32, #tpu.memory_space<vmem>>, vector<1x8x384xf32>
    %42 = vector.shape_cast %41 : vector<1x8x384xf32> to vector<8x384xf32>
    %cst_14 = arith.constant dense<0.000000e+00> : vector<8x384xf32>
    %43 = tpu.matmul %40, %1, %cst_14 {dimension_numbers = #tpu.dot_dimension_numbers<[1], [0], [0], [1], [0, 0, 1, 1], [], []>} : vector<8x128xf32>, vector<128x384xf32>, vector<8x384xf32> -> vector<8x384xf32>
    %44 = arith.addf %43, %4 : vector<8x384xf32>
    %45 = vector.extract_strided_slice %42 {offsets = [0, 0], sizes = [8, 128], strides = [1, 1]} : vector<8x384xf32> to vector<8x128xf32>
    %46 = vector.extract_strided_slice %44 {offsets = [0, 0], sizes = [8, 128], strides = [1, 1]} : vector<8x384xf32> to vector<8x128xf32>
    %47 = arith.addf %45, %46 : vector<8x128xf32>
    %48 = arith.negf %47 : vector<8x128xf32>
    %49 = math.exp %48 : vector<8x128xf32>
    %cst_15 = arith.constant 1.000000e+00 : f32
    %50 = vector.broadcast %cst_15 : f32 to vector<8x128xf32>
    %51 = arith.addf %50, %49 : vector<8x128xf32>
    %52 = arith.divf %50, %51 : vector<8x128xf32>
    %53 = vector.extract_strided_slice %42 {offsets = [0, 128], sizes = [8, 128], strides = [1, 1]} : vector<8x384xf32> to vector<8x128xf32>
    %54 = vector.extract_strided_slice %44 {offsets = [0, 128], sizes = [8, 128], strides = [1, 1]} : vector<8x384xf32> to vector<8x128xf32>
    %55 = arith.addf %53, %54 : vector<8x128xf32>
    %56 = arith.negf %55 : vector<8x128xf32>
    %57 = math.exp %56 : vector<8x128xf32>
    %cst_16 = arith.constant 1.000000e+00 : f32
    %58 = vector.broadcast %cst_16 : f32 to vector<8x128xf32>
    %59 = arith.addf %58, %57 : vector<8x128xf32>
    %60 = arith.divf %58, %59 : vector<8x128xf32>
    %61 = vector.extract_strided_slice %42 {offsets = [0, 256], sizes = [8, 128], strides = [1, 1]} : vector<8x384xf32> to vector<8x128xf32>
    %62 = vector.extract_strided_slice %44 {offsets = [0, 256], sizes = [8, 128], strides = [1, 1]} : vector<8x384xf32> to vector<8x128xf32>
    %63 = arith.mulf %52, %62 : vector<8x128xf32>
    %64 = arith.addf %61, %63 : vector<8x128xf32>
    %65 = math.tanh %64 : vector<8x128xf32>
    %cst_17 = arith.constant 1.000000e+00 : f32
    %66 = vector.broadcast %cst_17 : f32 to vector<8x128xf32>
    %67 = arith.subf %66, %60 : vector<8x128xf32>
    %68 = arith.mulf %67, %65 : vector<8x128xf32>
    %69 = arith.mulf %60, %40 : vector<8x128xf32>
    %70 = arith.addf %68, %69 : vector<8x128xf32>
    %c1_i32 = arith.constant 1 : i32
    %71 = vector.broadcast %c1_i32 : i32 to vector<8x1xi32>
    %72 = arith.cmpi sgt, %0, %71 : vector<8x1xi32>
    %73 = vector.shape_cast %72 : vector<8x1xi1> to vector<8x1xi1>
    %74 = vector.broadcast %73 : vector<8x1xi1> to vector<8x128xi1>
    %75 = arith.select %74, %70, %40 : vector<8x128xi1>, vector<8x128xf32>
    %c2 = arith.constant 2 : index
    %c0_18 = arith.constant 0 : index
    %c0_19 = arith.constant 0 : index
    %76 = vector.load %arg1[%c2, %c0_18, %c0_19] : memref<8x8x384xf32, #tpu.memory_space<vmem>>, vector<1x8x384xf32>
    %77 = vector.shape_cast %76 : vector<1x8x384xf32> to vector<8x384xf32>
    %cst_20 = arith.constant dense<0.000000e+00> : vector<8x384xf32>
    %78 = tpu.matmul %75, %1, %cst_20 {dimension_numbers = #tpu.dot_dimension_numbers<[1], [0], [0], [1], [0, 0, 1, 1], [], []>} : vector<8x128xf32>, vector<128x384xf32>, vector<8x384xf32> -> vector<8x384xf32>
    %79 = arith.addf %78, %4 : vector<8x384xf32>
    %80 = vector.extract_strided_slice %77 {offsets = [0, 0], sizes = [8, 128], strides = [1, 1]} : vector<8x384xf32> to vector<8x128xf32>
    %81 = vector.extract_strided_slice %79 {offsets = [0, 0], sizes = [8, 128], strides = [1, 1]} : vector<8x384xf32> to vector<8x128xf32>
    %82 = arith.addf %80, %81 : vector<8x128xf32>
    %83 = arith.negf %82 : vector<8x128xf32>
    %84 = math.exp %83 : vector<8x128xf32>
    %cst_21 = arith.constant 1.000000e+00 : f32
    %85 = vector.broadcast %cst_21 : f32 to vector<8x128xf32>
    %86 = arith.addf %85, %84 : vector<8x128xf32>
    %87 = arith.divf %85, %86 : vector<8x128xf32>
    %88 = vector.extract_strided_slice %77 {offsets = [0, 128], sizes = [8, 128], strides = [1, 1]} : vector<8x384xf32> to vector<8x128xf32>
    %89 = vector.extract_strided_slice %79 {offsets = [0, 128], sizes = [8, 128], strides = [1, 1]} : vector<8x384xf32> to vector<8x128xf32>
    %90 = arith.addf %88, %89 : vector<8x128xf32>
    %91 = arith.negf %90 : vector<8x128xf32>
    %92 = math.exp %91 : vector<8x128xf32>
    %cst_22 = arith.constant 1.000000e+00 : f32
    %93 = vector.broadcast %cst_22 : f32 to vector<8x128xf32>
    %94 = arith.addf %93, %92 : vector<8x128xf32>
    %95 = arith.divf %93, %94 : vector<8x128xf32>
    %96 = vector.extract_strided_slice %77 {offsets = [0, 256], sizes = [8, 128], strides = [1, 1]} : vector<8x384xf32> to vector<8x128xf32>
    %97 = vector.extract_strided_slice %79 {offsets = [0, 256], sizes = [8, 128], strides = [1, 1]} : vector<8x384xf32> to vector<8x128xf32>
    %98 = arith.mulf %87, %97 : vector<8x128xf32>
    %99 = arith.addf %96, %98 : vector<8x128xf32>
    %100 = math.tanh %99 : vector<8x128xf32>
    %cst_23 = arith.constant 1.000000e+00 : f32
    %101 = vector.broadcast %cst_23 : f32 to vector<8x128xf32>
    %102 = arith.subf %101, %95 : vector<8x128xf32>
    %103 = arith.mulf %102, %100 : vector<8x128xf32>
    %104 = arith.mulf %95, %75 : vector<8x128xf32>
    %105 = arith.addf %103, %104 : vector<8x128xf32>
    %c2_i32 = arith.constant 2 : i32
    %106 = vector.broadcast %c2_i32 : i32 to vector<8x1xi32>
    %107 = arith.cmpi sgt, %0, %106 : vector<8x1xi32>
    %108 = vector.shape_cast %107 : vector<8x1xi1> to vector<8x1xi1>
    %109 = vector.broadcast %108 : vector<8x1xi1> to vector<8x128xi1>
    %110 = arith.select %109, %105, %75 : vector<8x128xi1>, vector<8x128xf32>
    %c3 = arith.constant 3 : index
    %c0_24 = arith.constant 0 : index
    %c0_25 = arith.constant 0 : index
    %111 = vector.load %arg1[%c3, %c0_24, %c0_25] : memref<8x8x384xf32, #tpu.memory_space<vmem>>, vector<1x8x384xf32>
    %112 = vector.shape_cast %111 : vector<1x8x384xf32> to vector<8x384xf32>
    %cst_26 = arith.constant dense<0.000000e+00> : vector<8x384xf32>
    %113 = tpu.matmul %110, %1, %cst_26 {dimension_numbers = #tpu.dot_dimension_numbers<[1], [0], [0], [1], [0, 0, 1, 1], [], []>} : vector<8x128xf32>, vector<128x384xf32>, vector<8x384xf32> -> vector<8x384xf32>
    %114 = arith.addf %113, %4 : vector<8x384xf32>
    %115 = vector.extract_strided_slice %112 {offsets = [0, 0], sizes = [8, 128], strides = [1, 1]} : vector<8x384xf32> to vector<8x128xf32>
    %116 = vector.extract_strided_slice %114 {offsets = [0, 0], sizes = [8, 128], strides = [1, 1]} : vector<8x384xf32> to vector<8x128xf32>
    %117 = arith.addf %115, %116 : vector<8x128xf32>
    %118 = arith.negf %117 : vector<8x128xf32>
    %119 = math.exp %118 : vector<8x128xf32>
    %cst_27 = arith.constant 1.000000e+00 : f32
    %120 = vector.broadcast %cst_27 : f32 to vector<8x128xf32>
    %121 = arith.addf %120, %119 : vector<8x128xf32>
    %122 = arith.divf %120, %121 : vector<8x128xf32>
    %123 = vector.extract_strided_slice %112 {offsets = [0, 128], sizes = [8, 128], strides = [1, 1]} : vector<8x384xf32> to vector<8x128xf32>
    %124 = vector.extract_strided_slice %114 {offsets = [0, 128], sizes = [8, 128], strides = [1, 1]} : vector<8x384xf32> to vector<8x128xf32>
    %125 = arith.addf %123, %124 : vector<8x128xf32>
    %126 = arith.negf %125 : vector<8x128xf32>
    %127 = math.exp %126 : vector<8x128xf32>
    %cst_28 = arith.constant 1.000000e+00 : f32
    %128 = vector.broadcast %cst_28 : f32 to vector<8x128xf32>
    %129 = arith.addf %128, %127 : vector<8x128xf32>
    %130 = arith.divf %128, %129 : vector<8x128xf32>
    %131 = vector.extract_strided_slice %112 {offsets = [0, 256], sizes = [8, 128], strides = [1, 1]} : vector<8x384xf32> to vector<8x128xf32>
    %132 = vector.extract_strided_slice %114 {offsets = [0, 256], sizes = [8, 128], strides = [1, 1]} : vector<8x384xf32> to vector<8x128xf32>
    %133 = arith.mulf %122, %132 : vector<8x128xf32>
    %134 = arith.addf %131, %133 : vector<8x128xf32>
    %135 = math.tanh %134 : vector<8x128xf32>
    %cst_29 = arith.constant 1.000000e+00 : f32
    %136 = vector.broadcast %cst_29 : f32 to vector<8x128xf32>
    %137 = arith.subf %136, %130 : vector<8x128xf32>
    %138 = arith.mulf %137, %135 : vector<8x128xf32>
    %139 = arith.mulf %130, %110 : vector<8x128xf32>
    %140 = arith.addf %138, %139 : vector<8x128xf32>
    %c3_i32 = arith.constant 3 : i32
    %141 = vector.broadcast %c3_i32 : i32 to vector<8x1xi32>
    %142 = arith.cmpi sgt, %0, %141 : vector<8x1xi32>
    %143 = vector.shape_cast %142 : vector<8x1xi1> to vector<8x1xi1>
    %144 = vector.broadcast %143 : vector<8x1xi1> to vector<8x128xi1>
    %145 = arith.select %144, %140, %110 : vector<8x128xi1>, vector<8x128xf32>
    %c4 = arith.constant 4 : index
    %c0_30 = arith.constant 0 : index
    %c0_31 = arith.constant 0 : index
    %146 = vector.load %arg1[%c4, %c0_30, %c0_31] : memref<8x8x384xf32, #tpu.memory_space<vmem>>, vector<1x8x384xf32>
    %147 = vector.shape_cast %146 : vector<1x8x384xf32> to vector<8x384xf32>
    %cst_32 = arith.constant dense<0.000000e+00> : vector<8x384xf32>
    %148 = tpu.matmul %145, %1, %cst_32 {dimension_numbers = #tpu.dot_dimension_numbers<[1], [0], [0], [1], [0, 0, 1, 1], [], []>} : vector<8x128xf32>, vector<128x384xf32>, vector<8x384xf32> -> vector<8x384xf32>
    %149 = arith.addf %148, %4 : vector<8x384xf32>
    %150 = vector.extract_strided_slice %147 {offsets = [0, 0], sizes = [8, 128], strides = [1, 1]} : vector<8x384xf32> to vector<8x128xf32>
    %151 = vector.extract_strided_slice %149 {offsets = [0, 0], sizes = [8, 128], strides = [1, 1]} : vector<8x384xf32> to vector<8x128xf32>
    %152 = arith.addf %150, %151 : vector<8x128xf32>
    %153 = arith.negf %152 : vector<8x128xf32>
    %154 = math.exp %153 : vector<8x128xf32>
    %cst_33 = arith.constant 1.000000e+00 : f32
    %155 = vector.broadcast %cst_33 : f32 to vector<8x128xf32>
    %156 = arith.addf %155, %154 : vector<8x128xf32>
    %157 = arith.divf %155, %156 : vector<8x128xf32>
    %158 = vector.extract_strided_slice %147 {offsets = [0, 128], sizes = [8, 128], strides = [1, 1]} : vector<8x384xf32> to vector<8x128xf32>
    %159 = vector.extract_strided_slice %149 {offsets = [0, 128], sizes = [8, 128], strides = [1, 1]} : vector<8x384xf32> to vector<8x128xf32>
    %160 = arith.addf %158, %159 : vector<8x128xf32>
    %161 = arith.negf %160 : vector<8x128xf32>
    %162 = math.exp %161 : vector<8x128xf32>
    %cst_34 = arith.constant 1.000000e+00 : f32
    %163 = vector.broadcast %cst_34 : f32 to vector<8x128xf32>
    %164 = arith.addf %163, %162 : vector<8x128xf32>
    %165 = arith.divf %163, %164 : vector<8x128xf32>
    %166 = vector.extract_strided_slice %147 {offsets = [0, 256], sizes = [8, 128], strides = [1, 1]} : vector<8x384xf32> to vector<8x128xf32>
    %167 = vector.extract_strided_slice %149 {offsets = [0, 256], sizes = [8, 128], strides = [1, 1]} : vector<8x384xf32> to vector<8x128xf32>
    %168 = arith.mulf %157, %167 : vector<8x128xf32>
    %169 = arith.addf %166, %168 : vector<8x128xf32>
    %170 = math.tanh %169 : vector<8x128xf32>
    %cst_35 = arith.constant 1.000000e+00 : f32
    %171 = vector.broadcast %cst_35 : f32 to vector<8x128xf32>
    %172 = arith.subf %171, %165 : vector<8x128xf32>
    %173 = arith.mulf %172, %170 : vector<8x128xf32>
    %174 = arith.mulf %165, %145 : vector<8x128xf32>
    %175 = arith.addf %173, %174 : vector<8x128xf32>
    %c4_i32 = arith.constant 4 : i32
    %176 = vector.broadcast %c4_i32 : i32 to vector<8x1xi32>
    %177 = arith.cmpi sgt, %0, %176 : vector<8x1xi32>
    %178 = vector.shape_cast %177 : vector<8x1xi1> to vector<8x1xi1>
    %179 = vector.broadcast %178 : vector<8x1xi1> to vector<8x128xi1>
    %180 = arith.select %179, %175, %145 : vector<8x128xi1>, vector<8x128xf32>
    %c5 = arith.constant 5 : index
    %c0_36 = arith.constant 0 : index
    %c0_37 = arith.constant 0 : index
    %181 = vector.load %arg1[%c5, %c0_36, %c0_37] : memref<8x8x384xf32, #tpu.memory_space<vmem>>, vector<1x8x384xf32>
    %182 = vector.shape_cast %181 : vector<1x8x384xf32> to vector<8x384xf32>
    %cst_38 = arith.constant dense<0.000000e+00> : vector<8x384xf32>
    %183 = tpu.matmul %180, %1, %cst_38 {dimension_numbers = #tpu.dot_dimension_numbers<[1], [0], [0], [1], [0, 0, 1, 1], [], []>} : vector<8x128xf32>, vector<128x384xf32>, vector<8x384xf32> -> vector<8x384xf32>
    %184 = arith.addf %183, %4 : vector<8x384xf32>
    %185 = vector.extract_strided_slice %182 {offsets = [0, 0], sizes = [8, 128], strides = [1, 1]} : vector<8x384xf32> to vector<8x128xf32>
    %186 = vector.extract_strided_slice %184 {offsets = [0, 0], sizes = [8, 128], strides = [1, 1]} : vector<8x384xf32> to vector<8x128xf32>
    %187 = arith.addf %185, %186 : vector<8x128xf32>
    %188 = arith.negf %187 : vector<8x128xf32>
    %189 = math.exp %188 : vector<8x128xf32>
    %cst_39 = arith.constant 1.000000e+00 : f32
    %190 = vector.broadcast %cst_39 : f32 to vector<8x128xf32>
    %191 = arith.addf %190, %189 : vector<8x128xf32>
    %192 = arith.divf %190, %191 : vector<8x128xf32>
    %193 = vector.extract_strided_slice %182 {offsets = [0, 128], sizes = [8, 128], strides = [1, 1]} : vector<8x384xf32> to vector<8x128xf32>
    %194 = vector.extract_strided_slice %184 {offsets = [0, 128], sizes = [8, 128], strides = [1, 1]} : vector<8x384xf32> to vector<8x128xf32>
    %195 = arith.addf %193, %194 : vector<8x128xf32>
    %196 = arith.negf %195 : vector<8x128xf32>
    %197 = math.exp %196 : vector<8x128xf32>
    %cst_40 = arith.constant 1.000000e+00 : f32
    %198 = vector.broadcast %cst_40 : f32 to vector<8x128xf32>
    %199 = arith.addf %198, %197 : vector<8x128xf32>
    %200 = arith.divf %198, %199 : vector<8x128xf32>
    %201 = vector.extract_strided_slice %182 {offsets = [0, 256], sizes = [8, 128], strides = [1, 1]} : vector<8x384xf32> to vector<8x128xf32>
    %202 = vector.extract_strided_slice %184 {offsets = [0, 256], sizes = [8, 128], strides = [1, 1]} : vector<8x384xf32> to vector<8x128xf32>
    %203 = arith.mulf %192, %202 : vector<8x128xf32>
    %204 = arith.addf %201, %203 : vector<8x128xf32>
    %205 = math.tanh %204 : vector<8x128xf32>
    %cst_41 = arith.constant 1.000000e+00 : f32
    %206 = vector.broadcast %cst_41 : f32 to vector<8x128xf32>
    %207 = arith.subf %206, %200 : vector<8x128xf32>
    %208 = arith.mulf %207, %205 : vector<8x128xf32>
    %209 = arith.mulf %200, %180 : vector<8x128xf32>
    %210 = arith.addf %208, %209 : vector<8x128xf32>
    %c5_i32 = arith.constant 5 : i32
    %211 = vector.broadcast %c5_i32 : i32 to vector<8x1xi32>
    %212 = arith.cmpi sgt, %0, %211 : vector<8x1xi32>
    %213 = vector.shape_cast %212 : vector<8x1xi1> to vector<8x1xi1>
    %214 = vector.broadcast %213 : vector<8x1xi1> to vector<8x128xi1>
    %215 = arith.select %214, %210, %180 : vector<8x128xi1>, vector<8x128xf32>
    %c6 = arith.constant 6 : index
    %c0_42 = arith.constant 0 : index
    %c0_43 = arith.constant 0 : index
    %216 = vector.load %arg1[%c6, %c0_42, %c0_43] : memref<8x8x384xf32, #tpu.memory_space<vmem>>, vector<1x8x384xf32>
    %217 = vector.shape_cast %216 : vector<1x8x384xf32> to vector<8x384xf32>
    %cst_44 = arith.constant dense<0.000000e+00> : vector<8x384xf32>
    %218 = tpu.matmul %215, %1, %cst_44 {dimension_numbers = #tpu.dot_dimension_numbers<[1], [0], [0], [1], [0, 0, 1, 1], [], []>} : vector<8x128xf32>, vector<128x384xf32>, vector<8x384xf32> -> vector<8x384xf32>
    %219 = arith.addf %218, %4 : vector<8x384xf32>
    %220 = vector.extract_strided_slice %217 {offsets = [0, 0], sizes = [8, 128], strides = [1, 1]} : vector<8x384xf32> to vector<8x128xf32>
    %221 = vector.extract_strided_slice %219 {offsets = [0, 0], sizes = [8, 128], strides = [1, 1]} : vector<8x384xf32> to vector<8x128xf32>
    %222 = arith.addf %220, %221 : vector<8x128xf32>
    %223 = arith.negf %222 : vector<8x128xf32>
    %224 = math.exp %223 : vector<8x128xf32>
    %cst_45 = arith.constant 1.000000e+00 : f32
    %225 = vector.broadcast %cst_45 : f32 to vector<8x128xf32>
    %226 = arith.addf %225, %224 : vector<8x128xf32>
    %227 = arith.divf %225, %226 : vector<8x128xf32>
    %228 = vector.extract_strided_slice %217 {offsets = [0, 128], sizes = [8, 128], strides = [1, 1]} : vector<8x384xf32> to vector<8x128xf32>
    %229 = vector.extract_strided_slice %219 {offsets = [0, 128], sizes = [8, 128], strides = [1, 1]} : vector<8x384xf32> to vector<8x128xf32>
    %230 = arith.addf %228, %229 : vector<8x128xf32>
    %231 = arith.negf %230 : vector<8x128xf32>
    %232 = math.exp %231 : vector<8x128xf32>
    %cst_46 = arith.constant 1.000000e+00 : f32
    %233 = vector.broadcast %cst_46 : f32 to vector<8x128xf32>
    %234 = arith.addf %233, %232 : vector<8x128xf32>
    %235 = arith.divf %233, %234 : vector<8x128xf32>
    %236 = vector.extract_strided_slice %217 {offsets = [0, 256], sizes = [8, 128], strides = [1, 1]} : vector<8x384xf32> to vector<8x128xf32>
    %237 = vector.extract_strided_slice %219 {offsets = [0, 256], sizes = [8, 128], strides = [1, 1]} : vector<8x384xf32> to vector<8x128xf32>
    %238 = arith.mulf %227, %237 : vector<8x128xf32>
    %239 = arith.addf %236, %238 : vector<8x128xf32>
    %240 = math.tanh %239 : vector<8x128xf32>
    %cst_47 = arith.constant 1.000000e+00 : f32
    %241 = vector.broadcast %cst_47 : f32 to vector<8x128xf32>
    %242 = arith.subf %241, %235 : vector<8x128xf32>
    %243 = arith.mulf %242, %240 : vector<8x128xf32>
    %244 = arith.mulf %235, %215 : vector<8x128xf32>
    %245 = arith.addf %243, %244 : vector<8x128xf32>
    %c6_i32 = arith.constant 6 : i32
    %246 = vector.broadcast %c6_i32 : i32 to vector<8x1xi32>
    %247 = arith.cmpi sgt, %0, %246 : vector<8x1xi32>
    %248 = vector.shape_cast %247 : vector<8x1xi1> to vector<8x1xi1>
    %249 = vector.broadcast %248 : vector<8x1xi1> to vector<8x128xi1>
    %250 = arith.select %249, %245, %215 : vector<8x128xi1>, vector<8x128xf32>
    %c7 = arith.constant 7 : index
    %c0_48 = arith.constant 0 : index
    %c0_49 = arith.constant 0 : index
    %251 = vector.load %arg1[%c7, %c0_48, %c0_49] : memref<8x8x384xf32, #tpu.memory_space<vmem>>, vector<1x8x384xf32>
    %252 = vector.shape_cast %251 : vector<1x8x384xf32> to vector<8x384xf32>
    %cst_50 = arith.constant dense<0.000000e+00> : vector<8x384xf32>
    %253 = tpu.matmul %250, %1, %cst_50 {dimension_numbers = #tpu.dot_dimension_numbers<[1], [0], [0], [1], [0, 0, 1, 1], [], []>} : vector<8x128xf32>, vector<128x384xf32>, vector<8x384xf32> -> vector<8x384xf32>
    %254 = arith.addf %253, %4 : vector<8x384xf32>
    %255 = vector.extract_strided_slice %252 {offsets = [0, 0], sizes = [8, 128], strides = [1, 1]} : vector<8x384xf32> to vector<8x128xf32>
    %256 = vector.extract_strided_slice %254 {offsets = [0, 0], sizes = [8, 128], strides = [1, 1]} : vector<8x384xf32> to vector<8x128xf32>
    %257 = arith.addf %255, %256 : vector<8x128xf32>
    %258 = arith.negf %257 : vector<8x128xf32>
    %259 = math.exp %258 : vector<8x128xf32>
    %cst_51 = arith.constant 1.000000e+00 : f32
    %260 = vector.broadcast %cst_51 : f32 to vector<8x128xf32>
    %261 = arith.addf %260, %259 : vector<8x128xf32>
    %262 = arith.divf %260, %261 : vector<8x128xf32>
    %263 = vector.extract_strided_slice %252 {offsets = [0, 128], sizes = [8, 128], strides = [1, 1]} : vector<8x384xf32> to vector<8x128xf32>
    %264 = vector.extract_strided_slice %254 {offsets = [0, 128], sizes = [8, 128], strides = [1, 1]} : vector<8x384xf32> to vector<8x128xf32>
    %265 = arith.addf %263, %264 : vector<8x128xf32>
    %266 = arith.negf %265 : vector<8x128xf32>
    %267 = math.exp %266 : vector<8x128xf32>
    %cst_52 = arith.constant 1.000000e+00 : f32
    %268 = vector.broadcast %cst_52 : f32 to vector<8x128xf32>
    %269 = arith.addf %268, %267 : vector<8x128xf32>
    %270 = arith.divf %268, %269 : vector<8x128xf32>
    %271 = vector.extract_strided_slice %252 {offsets = [0, 256], sizes = [8, 128], strides = [1, 1]} : vector<8x384xf32> to vector<8x128xf32>
    %272 = vector.extract_strided_slice %254 {offsets = [0, 256], sizes = [8, 128], strides = [1, 1]} : vector<8x384xf32> to vector<8x128xf32>
    %273 = arith.mulf %262, %272 : vector<8x128xf32>
    %274 = arith.addf %271, %273 : vector<8x128xf32>
    %275 = math.tanh %274 : vector<8x128xf32>
    %cst_53 = arith.constant 1.000000e+00 : f32
    %276 = vector.broadcast %cst_53 : f32 to vector<8x128xf32>
    %277 = arith.subf %276, %270 : vector<8x128xf32>
    %278 = arith.mulf %277, %275 : vector<8x128xf32>
    %279 = arith.mulf %270, %250 : vector<8x128xf32>
    %280 = arith.addf %278, %279 : vector<8x128xf32>
    %c7_i32 = arith.constant 7 : i32
    %281 = vector.broadcast %c7_i32 : i32 to vector<8x1xi32>
    %282 = arith.cmpi sgt, %0, %281 : vector<8x1xi32>
    %283 = vector.shape_cast %282 : vector<8x1xi1> to vector<8x1xi1>
    %284 = vector.broadcast %283 : vector<8x1xi1> to vector<8x128xi1>
    %285 = arith.select %284, %280, %250 : vector<8x128xi1>, vector<8x128xf32>
    %c0_54 = arith.constant 0 : index
    %c0_55 = arith.constant 0 : index
    %286 = vector.load %arg5[%c0_54, %c0_55] : memref<128x384xf32, #tpu.memory_space<vmem>>, vector<128x384xf32>
    %c0_56 = arith.constant 0 : index
    %c0_57 = arith.constant 0 : index
    %287 = vector.load %arg6[%c0_56, %c0_57] : memref<128x384xf32, #tpu.memory_space<vmem>>, vector<128x384xf32>
    %c0_58 = arith.constant 0 : index
    %c0_59 = arith.constant 0 : index
    %288 = vector.load %arg7[%c0_58, %c0_59] : memref<1x384xf32, #tpu.memory_space<vmem>>, vector<1x384xf32>
    %289 = vector.shape_cast %288 : vector<1x384xf32> to vector<1x384xf32>
    %290 = vector.broadcast %289 : vector<1x384xf32> to vector<8x384xf32>
    %c0_60 = arith.constant 0 : index
    %c0_61 = arith.constant 0 : index
    %291 = vector.load %arg8[%c0_60, %c0_61] : memref<128x128xf32, #tpu.memory_space<vmem>>, vector<128x128xf32>
    %c0_62 = arith.constant 0 : index
    %c0_63 = arith.constant 0 : index
    %292 = vector.load %arg9[%c0_62, %c0_63] : memref<1x128xf32, #tpu.memory_space<vmem>>, vector<1x128xf32>
    %293 = vector.shape_cast %292 : vector<1x128xf32> to vector<1x128xf32>
    %294 = vector.broadcast %293 : vector<1x128xf32> to vector<8x128xf32>
    %295 = tpu.iota {dimensions = array<i32: 1>} : vector<8x128xi32>
    %c2_i32_64 = arith.constant 2 : i32
    %296 = vector.broadcast %c2_i32_64 : i32 to vector<8x1xi32>
    %297 = vector.broadcast %296 : vector<8x1xi32> to vector<8x128xi32>
    %298 = arith.cmpi eq, %295, %297 : vector<8x128xi32>
    %299 = arith.extui %298 : vector<8x128xi1> to vector<8x128xi32>
    %300 = arith.sitofp %299 : vector<8x128xi32> to vector<8x128xf32>
    %cst_65 = arith.constant dense<0.000000e+00> : vector<8x384xf32>
    %301 = tpu.matmul %300, %286, %cst_65 {dimension_numbers = #tpu.dot_dimension_numbers<[1], [0], [0], [1], [0, 0, 1, 1], [], []>} : vector<8x128xf32>, vector<128x384xf32>, vector<8x384xf32> -> vector<8x384xf32>
    %cst_66 = arith.constant dense<0.000000e+00> : vector<8x384xf32>
    %302 = tpu.matmul %285, %287, %cst_66 {dimension_numbers = #tpu.dot_dimension_numbers<[1], [0], [0], [1], [0, 0, 1, 1], [], []>} : vector<8x128xf32>, vector<128x384xf32>, vector<8x384xf32> -> vector<8x384xf32>
    %303 = arith.addf %302, %290 : vector<8x384xf32>
    %304 = vector.extract_strided_slice %301 {offsets = [0, 0], sizes = [8, 128], strides = [1, 1]} : vector<8x384xf32> to vector<8x128xf32>
    %305 = vector.extract_strided_slice %303 {offsets = [0, 0], sizes = [8, 128], strides = [1, 1]} : vector<8x384xf32> to vector<8x128xf32>
    %306 = arith.addf %304, %305 : vector<8x128xf32>
    %307 = arith.negf %306 : vector<8x128xf32>
    %308 = math.exp %307 : vector<8x128xf32>
    %cst_67 = arith.constant 1.000000e+00 : f32
    %309 = vector.broadcast %cst_67 : f32 to vector<8x128xf32>
    %310 = arith.addf %309, %308 : vector<8x128xf32>
    %311 = arith.divf %309, %310 : vector<8x128xf32>
    %312 = vector.extract_strided_slice %301 {offsets = [0, 128], sizes = [8, 128], strides = [1, 1]} : vector<8x384xf32> to vector<8x128xf32>
    %313 = vector.extract_strided_slice %303 {offsets = [0, 128], sizes = [8, 128], strides = [1, 1]} : vector<8x384xf32> to vector<8x128xf32>
    %314 = arith.addf %312, %313 : vector<8x128xf32>
    %315 = arith.negf %314 : vector<8x128xf32>
    %316 = math.exp %315 : vector<8x128xf32>
    %cst_68 = arith.constant 1.000000e+00 : f32
    %317 = vector.broadcast %cst_68 : f32 to vector<8x128xf32>
    %318 = arith.addf %317, %316 : vector<8x128xf32>
    %319 = arith.divf %317, %318 : vector<8x128xf32>
    %320 = vector.extract_strided_slice %301 {offsets = [0, 256], sizes = [8, 128], strides = [1, 1]} : vector<8x384xf32> to vector<8x128xf32>
    %321 = vector.extract_strided_slice %303 {offsets = [0, 256], sizes = [8, 128], strides = [1, 1]} : vector<8x384xf32> to vector<8x128xf32>
    %322 = arith.mulf %311, %321 : vector<8x128xf32>
    %323 = arith.addf %320, %322 : vector<8x128xf32>
    %324 = math.tanh %323 : vector<8x128xf32>
    %cst_69 = arith.constant 1.000000e+00 : f32
    %325 = vector.broadcast %cst_69 : f32 to vector<8x128xf32>
    %326 = arith.subf %325, %319 : vector<8x128xf32>
    %327 = arith.mulf %326, %324 : vector<8x128xf32>
    %328 = arith.mulf %319, %285 : vector<8x128xf32>
    %329 = arith.addf %327, %328 : vector<8x128xf32>
    %cst_70 = arith.constant dense<0.000000e+00> : vector<8x128xf32>
    %330 = tpu.matmul %329, %291, %cst_70 {dimension_numbers = #tpu.dot_dimension_numbers<[1], [0], [0], [1], [0, 0, 1, 1], [], []>} : vector<8x128xf32>, vector<128x128xf32>, vector<8x128xf32> -> vector<8x128xf32>
    %331 = arith.addf %330, %294 : vector<8x128xf32>
    %c0_71 = arith.constant 0 : index
    %c0_72 = arith.constant 0 : index
    %c0_73 = arith.constant 0 : index
    %332 = vector.load %arg10[%c0_71, %c0_72, %c0_73] : memref<6x8x128xf32, #tpu.memory_space<vmem>>, vector<1x8x128xf32>
    %333 = vector.shape_cast %332 : vector<1x8x128xf32> to vector<8x128xf32>
    %334 = vector.shape_cast %331 : vector<8x128xf32> to vector<1x8x128xf32>
    tpu.vector_store %arg10[%c0_71, %c0_72, %c0_73], %334 {strides = array<i32>} : memref<6x8x128xf32, #tpu.memory_space<vmem>>, vector<1x8x128xf32>,
    %cst_74 = arith.constant dense<0xFF800000> : vector<8xf32>
    %335 = vector.multi_reduction <maximumf>, %331, %cst_74 [1] : vector<8x128xf32> to vector<8xf32>
    %336 = vector.shape_cast %335 : vector<8xf32> to vector<8x1xf32>
    %337 = vector.broadcast %336 : vector<8x1xf32> to vector<8x128xf32>
    %338 = arith.cmpf oge, %331, %337 : vector<8x128xf32>
    %c128_i32 = arith.constant 128 : i32
    %339 = vector.broadcast %c128_i32 : i32 to vector<8x128xi32>
    %340 = arith.select %338, %295, %339 : vector<8x128xi1>, vector<8x128xi32>
    %cst_75 = arith.constant dense<2147483647> : vector<8xi32>
    %341 = vector.multi_reduction <minsi>, %340, %cst_75 [1] : vector<8x128xi32> to vector<8xi32>
    %342 = vector.shape_cast %341 : vector<8xi32> to vector<8x1xi32>
    %343 = vector.broadcast %342 : vector<8x1xi32> to vector<8x128xi32>
    %344 = arith.cmpi eq, %295, %343 : vector<8x128xi32>
    %345 = arith.extui %344 : vector<8x128xi1> to vector<8x128xi32>
    %346 = arith.sitofp %345 : vector<8x128xi32> to vector<8x128xf32>
    %cst_76 = arith.constant dense<0.000000e+00> : vector<8x384xf32>
    %347 = tpu.matmul %346, %286, %cst_76 {dimension_numbers = #tpu.dot_dimension_numbers<[1], [0], [0], [1], [0, 0, 1, 1], [], []>} : vector<8x128xf32>, vector<128x384xf32>, vector<8x384xf32> -> vector<8x384xf32>
    %cst_77 = arith.constant dense<0.000000e+00> : vector<8x384xf32>
    %348 = tpu.matmul %329, %287, %cst_77 {dimension_numbers = #tpu.dot_dimension_numbers<[1], [0], [0], [1], [0, 0, 1, 1], [], []>} : vector<8x128xf32>, vector<128x384xf32>, vector<8x384xf32> -> vector<8x384xf32>
    %349 = arith.addf %348, %290 : vector<8x384xf32>
    %350 = vector.extract_strided_slice %347 {offsets = [0, 0], sizes = [8, 128], strides = [1, 1]} : vector<8x384xf32> to vector<8x128xf32>
    %351 = vector.extract_strided_slice %349 {offsets = [0, 0], sizes = [8, 128], strides = [1, 1]} : vector<8x384xf32> to vector<8x128xf32>
    %352 = arith.addf %350, %351 : vector<8x128xf32>
    %353 = arith.negf %352 : vector<8x128xf32>
    %354 = math.exp %353 : vector<8x128xf32>
    %cst_78 = arith.constant 1.000000e+00 : f32
    %355 = vector.broadcast %cst_78 : f32 to vector<8x128xf32>
    %356 = arith.addf %355, %354 : vector<8x128xf32>
    %357 = arith.divf %355, %356 : vector<8x128xf32>
    %358 = vector.extract_strided_slice %347 {offsets = [0, 128], sizes = [8, 128], strides = [1, 1]} : vector<8x384xf32> to vector<8x128xf32>
    %359 = vector.extract_strided_slice %349 {offsets = [0, 128], sizes = [8, 128], strides = [1, 1]} : vector<8x384xf32> to vector<8x128xf32>
    %360 = arith.addf %358, %359 : vector<8x128xf32>
    %361 = arith.negf %360 : vector<8x128xf32>
    %362 = math.exp %361 : vector<8x128xf32>
    %cst_79 = arith.constant 1.000000e+00 : f32
    %363 = vector.broadcast %cst_79 : f32 to vector<8x128xf32>
    %364 = arith.addf %363, %362 : vector<8x128xf32>
    %365 = arith.divf %363, %364 : vector<8x128xf32>
    %366 = vector.extract_strided_slice %347 {offsets = [0, 256], sizes = [8, 128], strides = [1, 1]} : vector<8x384xf32> to vector<8x128xf32>
    %367 = vector.extract_strided_slice %349 {offsets = [0, 256], sizes = [8, 128], strides = [1, 1]} : vector<8x384xf32> to vector<8x128xf32>
    %368 = arith.mulf %357, %367 : vector<8x128xf32>
    %369 = arith.addf %366, %368 : vector<8x128xf32>
    %370 = math.tanh %369 : vector<8x128xf32>
    %cst_80 = arith.constant 1.000000e+00 : f32
    %371 = vector.broadcast %cst_80 : f32 to vector<8x128xf32>
    %372 = arith.subf %371, %365 : vector<8x128xf32>
    %373 = arith.mulf %372, %370 : vector<8x128xf32>
    %374 = arith.mulf %365, %329 : vector<8x128xf32>
    %375 = arith.addf %373, %374 : vector<8x128xf32>
    %cst_81 = arith.constant dense<0.000000e+00> : vector<8x128xf32>
    %376 = tpu.matmul %375, %291, %cst_81 {dimension_numbers = #tpu.dot_dimension_numbers<[1], [0], [0], [1], [0, 0, 1, 1], [], []>} : vector<8x128xf32>, vector<128x128xf32>, vector<8x128xf32> -> vector<8x128xf32>
    %377 = arith.addf %376, %294 : vector<8x128xf32>
    %c1_82 = arith.constant 1 : index
    %c0_83 = arith.constant 0 : index
    %c0_84 = arith.constant 0 : index
    %378 = vector.load %arg10[%c1_82, %c0_83, %c0_84] : memref<6x8x128xf32, #tpu.memory_space<vmem>>, vector<1x8x128xf32>
    %379 = vector.shape_cast %378 : vector<1x8x128xf32> to vector<8x128xf32>
    %380 = vector.shape_cast %377 : vector<8x128xf32> to vector<1x8x128xf32>
    tpu.vector_store %arg10[%c1_82, %c0_83, %c0_84], %380 {strides = array<i32>} : memref<6x8x128xf32, #tpu.memory_space<vmem>>, vector<1x8x128xf32>,
    %cst_85 = arith.constant dense<0xFF800000> : vector<8xf32>
    %381 = vector.multi_reduction <maximumf>, %377, %cst_85 [1] : vector<8x128xf32> to vector<8xf32>
    %382 = vector.shape_cast %381 : vector<8xf32> to vector<8x1xf32>
    %383 = vector.broadcast %382 : vector<8x1xf32> to vector<8x128xf32>
    %384 = arith.cmpf oge, %377, %383 : vector<8x128xf32>
    %c128_i32_86 = arith.constant 128 : i32
    %385 = vector.broadcast %c128_i32_86 : i32 to vector<8x128xi32>
    %386 = arith.select %384, %295, %385 : vector<8x128xi1>, vector<8x128xi32>
    %cst_87 = arith.constant dense<2147483647> : vector<8xi32>
    %387 = vector.multi_reduction <minsi>, %386, %cst_87 [1] : vector<8x128xi32> to vector<8xi32>
    %388 = vector.shape_cast %387 : vector<8xi32> to vector<8x1xi32>
    %389 = vector.broadcast %388 : vector<8x1xi32> to vector<8x128xi32>
    %390 = arith.cmpi eq, %295, %389 : vector<8x128xi32>
    %391 = arith.extui %390 : vector<8x128xi1> to vector<8x128xi32>
    %392 = arith.sitofp %391 : vector<8x128xi32> to vector<8x128xf32>
    %cst_88 = arith.constant dense<0.000000e+00> : vector<8x384xf32>
    %393 = tpu.matmul %392, %286, %cst_88 {dimension_numbers = #tpu.dot_dimension_numbers<[1], [0], [0], [1], [0, 0, 1, 1], [], []>} : vector<8x128xf32>, vector<128x384xf32>, vector<8x384xf32> -> vector<8x384xf32>
    %cst_89 = arith.constant dense<0.000000e+00> : vector<8x384xf32>
    %394 = tpu.matmul %375, %287, %cst_89 {dimension_numbers = #tpu.dot_dimension_numbers<[1], [0], [0], [1], [0, 0, 1, 1], [], []>} : vector<8x128xf32>, vector<128x384xf32>, vector<8x384xf32> -> vector<8x384xf32>
    %395 = arith.addf %394, %290 : vector<8x384xf32>
    %396 = vector.extract_strided_slice %393 {offsets = [0, 0], sizes = [8, 128], strides = [1, 1]} : vector<8x384xf32> to vector<8x128xf32>
    %397 = vector.extract_strided_slice %395 {offsets = [0, 0], sizes = [8, 128], strides = [1, 1]} : vector<8x384xf32> to vector<8x128xf32>
    %398 = arith.addf %396, %397 : vector<8x128xf32>
    %399 = arith.negf %398 : vector<8x128xf32>
    %400 = math.exp %399 : vector<8x128xf32>
    %cst_90 = arith.constant 1.000000e+00 : f32
    %401 = vector.broadcast %cst_90 : f32 to vector<8x128xf32>
    %402 = arith.addf %401, %400 : vector<8x128xf32>
    %403 = arith.divf %401, %402 : vector<8x128xf32>
    %404 = vector.extract_strided_slice %393 {offsets = [0, 128], sizes = [8, 128], strides = [1, 1]} : vector<8x384xf32> to vector<8x128xf32>
    %405 = vector.extract_strided_slice %395 {offsets = [0, 128], sizes = [8, 128], strides = [1, 1]} : vector<8x384xf32> to vector<8x128xf32>
    %406 = arith.addf %404, %405 : vector<8x128xf32>
    %407 = arith.negf %406 : vector<8x128xf32>
    %408 = math.exp %407 : vector<8x128xf32>
    %cst_91 = arith.constant 1.000000e+00 : f32
    %409 = vector.broadcast %cst_91 : f32 to vector<8x128xf32>
    %410 = arith.addf %409, %408 : vector<8x128xf32>
    %411 = arith.divf %409, %410 : vector<8x128xf32>
    %412 = vector.extract_strided_slice %393 {offsets = [0, 256], sizes = [8, 128], strides = [1, 1]} : vector<8x384xf32> to vector<8x128xf32>
    %413 = vector.extract_strided_slice %395 {offsets = [0, 256], sizes = [8, 128], strides = [1, 1]} : vector<8x384xf32> to vector<8x128xf32>
    %414 = arith.mulf %403, %413 : vector<8x128xf32>
    %415 = arith.addf %412, %414 : vector<8x128xf32>
    %416 = math.tanh %415 : vector<8x128xf32>
    %cst_92 = arith.constant 1.000000e+00 : f32
    %417 = vector.broadcast %cst_92 : f32 to vector<8x128xf32>
    %418 = arith.subf %417, %411 : vector<8x128xf32>
    %419 = arith.mulf %418, %416 : vector<8x128xf32>
    %420 = arith.mulf %411, %375 : vector<8x128xf32>
    %421 = arith.addf %419, %420 : vector<8x128xf32>
    %cst_93 = arith.constant dense<0.000000e+00> : vector<8x128xf32>
    %422 = tpu.matmul %421, %291, %cst_93 {dimension_numbers = #tpu.dot_dimension_numbers<[1], [0], [0], [1], [0, 0, 1, 1], [], []>} : vector<8x128xf32>, vector<128x128xf32>, vector<8x128xf32> -> vector<8x128xf32>
    %423 = arith.addf %422, %294 : vector<8x128xf32>
    %c2_94 = arith.constant 2 : index
    %c0_95 = arith.constant 0 : index
    %c0_96 = arith.constant 0 : index
    %424 = vector.load %arg10[%c2_94, %c0_95, %c0_96] : memref<6x8x128xf32, #tpu.memory_space<vmem>>, vector<1x8x128xf32>
    %425 = vector.shape_cast %424 : vector<1x8x128xf32> to vector<8x128xf32>
    %426 = vector.shape_cast %423 : vector<8x128xf32> to vector<1x8x128xf32>
    tpu.vector_store %arg10[%c2_94, %c0_95, %c0_96], %426 {strides = array<i32>} : memref<6x8x128xf32, #tpu.memory_space<vmem>>, vector<1x8x128xf32>,
    %cst_97 = arith.constant dense<0xFF800000> : vector<8xf32>
    %427 = vector.multi_reduction <maximumf>, %423, %cst_97 [1] : vector<8x128xf32> to vector<8xf32>
    %428 = vector.shape_cast %427 : vector<8xf32> to vector<8x1xf32>
    %429 = vector.broadcast %428 : vector<8x1xf32> to vector<8x128xf32>
    %430 = arith.cmpf oge, %423, %429 : vector<8x128xf32>
    %c128_i32_98 = arith.constant 128 : i32
    %431 = vector.broadcast %c128_i32_98 : i32 to vector<8x128xi32>
    %432 = arith.select %430, %295, %431 : vector<8x128xi1>, vector<8x128xi32>
    %cst_99 = arith.constant dense<2147483647> : vector<8xi32>
    %433 = vector.multi_reduction <minsi>, %432, %cst_99 [1] : vector<8x128xi32> to vector<8xi32>
    %434 = vector.shape_cast %433 : vector<8xi32> to vector<8x1xi32>
    %435 = vector.broadcast %434 : vector<8x1xi32> to vector<8x128xi32>
    %436 = arith.cmpi eq, %295, %435 : vector<8x128xi32>
    %437 = arith.extui %436 : vector<8x128xi1> to vector<8x128xi32>
    %438 = arith.sitofp %437 : vector<8x128xi32> to vector<8x128xf32>
    %cst_100 = arith.constant dense<0.000000e+00> : vector<8x384xf32>
    %439 = tpu.matmul %438, %286, %cst_100 {dimension_numbers = #tpu.dot_dimension_numbers<[1], [0], [0], [1], [0, 0, 1, 1], [], []>} : vector<8x128xf32>, vector<128x384xf32>, vector<8x384xf32> -> vector<8x384xf32>
    %cst_101 = arith.constant dense<0.000000e+00> : vector<8x384xf32>
    %440 = tpu.matmul %421, %287, %cst_101 {dimension_numbers = #tpu.dot_dimension_numbers<[1], [0], [0], [1], [0, 0, 1, 1], [], []>} : vector<8x128xf32>, vector<128x384xf32>, vector<8x384xf32> -> vector<8x384xf32>
    %441 = arith.addf %440, %290 : vector<8x384xf32>
    %442 = vector.extract_strided_slice %439 {offsets = [0, 0], sizes = [8, 128], strides = [1, 1]} : vector<8x384xf32> to vector<8x128xf32>
    %443 = vector.extract_strided_slice %441 {offsets = [0, 0], sizes = [8, 128], strides = [1, 1]} : vector<8x384xf32> to vector<8x128xf32>
    %444 = arith.addf %442, %443 : vector<8x128xf32>
    %445 = arith.negf %444 : vector<8x128xf32>
    %446 = math.exp %445 : vector<8x128xf32>
    %cst_102 = arith.constant 1.000000e+00 : f32
    %447 = vector.broadcast %cst_102 : f32 to vector<8x128xf32>
    %448 = arith.addf %447, %446 : vector<8x128xf32>
    %449 = arith.divf %447, %448 : vector<8x128xf32>
    %450 = vector.extract_strided_slice %439 {offsets = [0, 128], sizes = [8, 128], strides = [1, 1]} : vector<8x384xf32> to vector<8x128xf32>
    %451 = vector.extract_strided_slice %441 {offsets = [0, 128], sizes = [8, 128], strides = [1, 1]} : vector<8x384xf32> to vector<8x128xf32>
    %452 = arith.addf %450, %451 : vector<8x128xf32>
    %453 = arith.negf %452 : vector<8x128xf32>
    %454 = math.exp %453 : vector<8x128xf32>
    %cst_103 = arith.constant 1.000000e+00 : f32
    %455 = vector.broadcast %cst_103 : f32 to vector<8x128xf32>
    %456 = arith.addf %455, %454 : vector<8x128xf32>
    %457 = arith.divf %455, %456 : vector<8x128xf32>
    %458 = vector.extract_strided_slice %439 {offsets = [0, 256], sizes = [8, 128], strides = [1, 1]} : vector<8x384xf32> to vector<8x128xf32>
    %459 = vector.extract_strided_slice %441 {offsets = [0, 256], sizes = [8, 128], strides = [1, 1]} : vector<8x384xf32> to vector<8x128xf32>
    %460 = arith.mulf %449, %459 : vector<8x128xf32>
    %461 = arith.addf %458, %460 : vector<8x128xf32>
    %462 = math.tanh %461 : vector<8x128xf32>
    %cst_104 = arith.constant 1.000000e+00 : f32
    %463 = vector.broadcast %cst_104 : f32 to vector<8x128xf32>
    %464 = arith.subf %463, %457 : vector<8x128xf32>
    %465 = arith.mulf %464, %462 : vector<8x128xf32>
    %466 = arith.mulf %457, %421 : vector<8x128xf32>
    %467 = arith.addf %465, %466 : vector<8x128xf32>
    %cst_105 = arith.constant dense<0.000000e+00> : vector<8x128xf32>
    %468 = tpu.matmul %467, %291, %cst_105 {dimension_numbers = #tpu.dot_dimension_numbers<[1], [0], [0], [1], [0, 0, 1, 1], [], []>} : vector<8x128xf32>, vector<128x128xf32>, vector<8x128xf32> -> vector<8x128xf32>
    %469 = arith.addf %468, %294 : vector<8x128xf32>
    %c3_106 = arith.constant 3 : index
    %c0_107 = arith.constant 0 : index
    %c0_108 = arith.constant 0 : index
    %470 = vector.load %arg10[%c3_106, %c0_107, %c0_108] : memref<6x8x128xf32, #tpu.memory_space<vmem>>, vector<1x8x128xf32>
    %471 = vector.shape_cast %470 : vector<1x8x128xf32> to vector<8x128xf32>
    %472 = vector.shape_cast %469 : vector<8x128xf32> to vector<1x8x128xf32>
    tpu.vector_store %arg10[%c3_106, %c0_107, %c0_108], %472 {strides = array<i32>} : memref<6x8x128xf32, #tpu.memory_space<vmem>>, vector<1x8x128xf32>,
    %cst_109 = arith.constant dense<0xFF800000> : vector<8xf32>
    %473 = vector.multi_reduction <maximumf>, %469, %cst_109 [1] : vector<8x128xf32> to vector<8xf32>
    %474 = vector.shape_cast %473 : vector<8xf32> to vector<8x1xf32>
    %475 = vector.broadcast %474 : vector<8x1xf32> to vector<8x128xf32>
    %476 = arith.cmpf oge, %469, %475 : vector<8x128xf32>
    %c128_i32_110 = arith.constant 128 : i32
    %477 = vector.broadcast %c128_i32_110 : i32 to vector<8x128xi32>
    %478 = arith.select %476, %295, %477 : vector<8x128xi1>, vector<8x128xi32>
    %cst_111 = arith.constant dense<2147483647> : vector<8xi32>
    %479 = vector.multi_reduction <minsi>, %478, %cst_111 [1] : vector<8x128xi32> to vector<8xi32>
    %480 = vector.shape_cast %479 : vector<8xi32> to vector<8x1xi32>
    %481 = vector.broadcast %480 : vector<8x1xi32> to vector<8x128xi32>
    %482 = arith.cmpi eq, %295, %481 : vector<8x128xi32>
    %483 = arith.extui %482 : vector<8x128xi1> to vector<8x128xi32>
    %484 = arith.sitofp %483 : vector<8x128xi32> to vector<8x128xf32>
    %cst_112 = arith.constant dense<0.000000e+00> : vector<8x384xf32>
    %485 = tpu.matmul %484, %286, %cst_112 {dimension_numbers = #tpu.dot_dimension_numbers<[1], [0], [0], [1], [0, 0, 1, 1], [], []>} : vector<8x128xf32>, vector<128x384xf32>, vector<8x384xf32> -> vector<8x384xf32>
    %cst_113 = arith.constant dense<0.000000e+00> : vector<8x384xf32>
    %486 = tpu.matmul %467, %287, %cst_113 {dimension_numbers = #tpu.dot_dimension_numbers<[1], [0], [0], [1], [0, 0, 1, 1], [], []>} : vector<8x128xf32>, vector<128x384xf32>, vector<8x384xf32> -> vector<8x384xf32>
    %487 = arith.addf %486, %290 : vector<8x384xf32>
    %488 = vector.extract_strided_slice %485 {offsets = [0, 0], sizes = [8, 128], strides = [1, 1]} : vector<8x384xf32> to vector<8x128xf32>
    %489 = vector.extract_strided_slice %487 {offsets = [0, 0], sizes = [8, 128], strides = [1, 1]} : vector<8x384xf32> to vector<8x128xf32>
    %490 = arith.addf %488, %489 : vector<8x128xf32>
    %491 = arith.negf %490 : vector<8x128xf32>
    %492 = math.exp %491 : vector<8x128xf32>
    %cst_114 = arith.constant 1.000000e+00 : f32
    %493 = vector.broadcast %cst_114 : f32 to vector<8x128xf32>
    %494 = arith.addf %493, %492 : vector<8x128xf32>
    %495 = arith.divf %493, %494 : vector<8x128xf32>
    %496 = vector.extract_strided_slice %485 {offsets = [0, 128], sizes = [8, 128], strides = [1, 1]} : vector<8x384xf32> to vector<8x128xf32>
    %497 = vector.extract_strided_slice %487 {offsets = [0, 128], sizes = [8, 128], strides = [1, 1]} : vector<8x384xf32> to vector<8x128xf32>
    %498 = arith.addf %496, %497 : vector<8x128xf32>
    %499 = arith.negf %498 : vector<8x128xf32>
    %500 = math.exp %499 : vector<8x128xf32>
    %cst_115 = arith.constant 1.000000e+00 : f32
    %501 = vector.broadcast %cst_115 : f32 to vector<8x128xf32>
    %502 = arith.addf %501, %500 : vector<8x128xf32>
    %503 = arith.divf %501, %502 : vector<8x128xf32>
    %504 = vector.extract_strided_slice %485 {offsets = [0, 256], sizes = [8, 128], strides = [1, 1]} : vector<8x384xf32> to vector<8x128xf32>
    %505 = vector.extract_strided_slice %487 {offsets = [0, 256], sizes = [8, 128], strides = [1, 1]} : vector<8x384xf32> to vector<8x128xf32>
    %506 = arith.mulf %495, %505 : vector<8x128xf32>
    %507 = arith.addf %504, %506 : vector<8x128xf32>
    %508 = math.tanh %507 : vector<8x128xf32>
    %cst_116 = arith.constant 1.000000e+00 : f32
    %509 = vector.broadcast %cst_116 : f32 to vector<8x128xf32>
    %510 = arith.subf %509, %503 : vector<8x128xf32>
    %511 = arith.mulf %510, %508 : vector<8x128xf32>
    %512 = arith.mulf %503, %467 : vector<8x128xf32>
    %513 = arith.addf %511, %512 : vector<8x128xf32>
    %cst_117 = arith.constant dense<0.000000e+00> : vector<8x128xf32>
    %514 = tpu.matmul %513, %291, %cst_117 {dimension_numbers = #tpu.dot_dimension_numbers<[1], [0], [0], [1], [0, 0, 1, 1], [], []>} : vector<8x128xf32>, vector<128x128xf32>, vector<8x128xf32> -> vector<8x128xf32>
    %515 = arith.addf %514, %294 : vector<8x128xf32>
    %c4_118 = arith.constant 4 : index
    %c0_119 = arith.constant 0 : index
    %c0_120 = arith.constant 0 : index
    %516 = vector.load %arg10[%c4_118, %c0_119, %c0_120] : memref<6x8x128xf32, #tpu.memory_space<vmem>>, vector<1x8x128xf32>
    %517 = vector.shape_cast %516 : vector<1x8x128xf32> to vector<8x128xf32>
    %518 = vector.shape_cast %515 : vector<8x128xf32> to vector<1x8x128xf32>
    tpu.vector_store %arg10[%c4_118, %c0_119, %c0_120], %518 {strides = array<i32>} : memref<6x8x128xf32, #tpu.memory_space<vmem>>, vector<1x8x128xf32>,
    %cst_121 = arith.constant dense<0xFF800000> : vector<8xf32>
    %519 = vector.multi_reduction <maximumf>, %515, %cst_121 [1] : vector<8x128xf32> to vector<8xf32>
    %520 = vector.shape_cast %519 : vector<8xf32> to vector<8x1xf32>
    %521 = vector.broadcast %520 : vector<8x1xf32> to vector<8x128xf32>
    %522 = arith.cmpf oge, %515, %521 : vector<8x128xf32>
    %c128_i32_122 = arith.constant 128 : i32
    %523 = vector.broadcast %c128_i32_122 : i32 to vector<8x128xi32>
    %524 = arith.select %522, %295, %523 : vector<8x128xi1>, vector<8x128xi32>
    %cst_123 = arith.constant dense<2147483647> : vector<8xi32>
    %525 = vector.multi_reduction <minsi>, %524, %cst_123 [1] : vector<8x128xi32> to vector<8xi32>
    %526 = vector.shape_cast %525 : vector<8xi32> to vector<8x1xi32>
    %527 = vector.broadcast %526 : vector<8x1xi32> to vector<8x128xi32>
    %528 = arith.cmpi eq, %295, %527 : vector<8x128xi32>
    %529 = arith.extui %528 : vector<8x128xi1> to vector<8x128xi32>
    %530 = arith.sitofp %529 : vector<8x128xi32> to vector<8x128xf32>
    %cst_124 = arith.constant dense<0.000000e+00> : vector<8x384xf32>
    %531 = tpu.matmul %530, %286, %cst_124 {dimension_numbers = #tpu.dot_dimension_numbers<[1], [0], [0], [1], [0, 0, 1, 1], [], []>} : vector<8x128xf32>, vector<128x384xf32>, vector<8x384xf32> -> vector<8x384xf32>
    %cst_125 = arith.constant dense<0.000000e+00> : vector<8x384xf32>
    %532 = tpu.matmul %513, %287, %cst_125 {dimension_numbers = #tpu.dot_dimension_numbers<[1], [0], [0], [1], [0, 0, 1, 1], [], []>} : vector<8x128xf32>, vector<128x384xf32>, vector<8x384xf32> -> vector<8x384xf32>
    %533 = arith.addf %532, %290 : vector<8x384xf32>
    %534 = vector.extract_strided_slice %531 {offsets = [0, 0], sizes = [8, 128], strides = [1, 1]} : vector<8x384xf32> to vector<8x128xf32>
    %535 = vector.extract_strided_slice %533 {offsets = [0, 0], sizes = [8, 128], strides = [1, 1]} : vector<8x384xf32> to vector<8x128xf32>
    %536 = arith.addf %534, %535 : vector<8x128xf32>
    %537 = arith.negf %536 : vector<8x128xf32>
    %538 = math.exp %537 : vector<8x128xf32>
    %cst_126 = arith.constant 1.000000e+00 : f32
    %539 = vector.broadcast %cst_126 : f32 to vector<8x128xf32>
    %540 = arith.addf %539, %538 : vector<8x128xf32>
    %541 = arith.divf %539, %540 : vector<8x128xf32>
    %542 = vector.extract_strided_slice %531 {offsets = [0, 128], sizes = [8, 128], strides = [1, 1]} : vector<8x384xf32> to vector<8x128xf32>
    %543 = vector.extract_strided_slice %533 {offsets = [0, 128], sizes = [8, 128], strides = [1, 1]} : vector<8x384xf32> to vector<8x128xf32>
    %544 = arith.addf %542, %543 : vector<8x128xf32>
    %545 = arith.negf %544 : vector<8x128xf32>
    %546 = math.exp %545 : vector<8x128xf32>
    %cst_127 = arith.constant 1.000000e+00 : f32
    %547 = vector.broadcast %cst_127 : f32 to vector<8x128xf32>
    %548 = arith.addf %547, %546 : vector<8x128xf32>
    %549 = arith.divf %547, %548 : vector<8x128xf32>
    %550 = vector.extract_strided_slice %531 {offsets = [0, 256], sizes = [8, 128], strides = [1, 1]} : vector<8x384xf32> to vector<8x128xf32>
    %551 = vector.extract_strided_slice %533 {offsets = [0, 256], sizes = [8, 128], strides = [1, 1]} : vector<8x384xf32> to vector<8x128xf32>
    %552 = arith.mulf %541, %551 : vector<8x128xf32>
    %553 = arith.addf %550, %552 : vector<8x128xf32>
    %554 = math.tanh %553 : vector<8x128xf32>
    %cst_128 = arith.constant 1.000000e+00 : f32
    %555 = vector.broadcast %cst_128 : f32 to vector<8x128xf32>
    %556 = arith.subf %555, %549 : vector<8x128xf32>
    %557 = arith.mulf %556, %554 : vector<8x128xf32>
    %558 = arith.mulf %549, %513 : vector<8x128xf32>
    %559 = arith.addf %557, %558 : vector<8x128xf32>
    %cst_129 = arith.constant dense<0.000000e+00> : vector<8x128xf32>
    %560 = tpu.matmul %559, %291, %cst_129 {dimension_numbers = #tpu.dot_dimension_numbers<[1], [0], [0], [1], [0, 0, 1, 1], [], []>} : vector<8x128xf32>, vector<128x128xf32>, vector<8x128xf32> -> vector<8x128xf32>
    %561 = arith.addf %560, %294 : vector<8x128xf32>
    %c5_130 = arith.constant 5 : index
    %c0_131 = arith.constant 0 : index
    %c0_132 = arith.constant 0 : index
    %562 = vector.load %arg10[%c5_130, %c0_131, %c0_132] : memref<6x8x128xf32, #tpu.memory_space<vmem>>, vector<1x8x128xf32>
    %563 = vector.shape_cast %562 : vector<1x8x128xf32> to vector<8x128xf32>
    %564 = vector.shape_cast %561 : vector<8x128xf32> to vector<1x8x128xf32>
    tpu.vector_store %arg10[%c5_130, %c0_131, %c0_132], %564 {strides = array<i32>} : memref<6x8x128xf32, #tpu.memory_space<vmem>>, vector<1x8x128xf32>,
    return
  }
  func.func @transform_0(%arg0: i32) -> (i32, i32, i32) {
    %c0_i32 = arith.constant 0 : i32
    %c0_i32_0 = arith.constant 0 : i32
    %c0_i32_1 = arith.constant 0 : i32
    return %c0_i32, %arg0, %c0_i32_0 : i32, i32, i32
  }
  func.func @transform_1(%arg0: i32) -> (i32, i32) {
    %c0_i32 = arith.constant 0 : i32
    %c0_i32_0 = arith.constant 0 : i32
    return %arg0, %c0_i32 : i32, i32
  }
  func.func @transform_2(%arg0: i32) -> (i32, i32) {
    %c0_i32 = arith.constant 0 : i32
    %c0_i32_0 = arith.constant 0 : i32
    %c0_i32_1 = arith.constant 0 : i32
    return %c0_i32, %c0_i32_0 : i32, i32
  }
  func.func @transform_3(%arg0: i32) -> (i32, i32) {
    %c0_i32 = arith.constant 0 : i32
    %c0_i32_0 = arith.constant 0 : i32
    %c0_i32_1 = arith.constant 0 : i32
    return %c0_i32, %c0_i32_0 : i32, i32
  }
  func.func @transform_4(%arg0: i32) -> (i32, i32) {
    %c0_i32 = arith.constant 0 : i32
    %c0_i32_0 = arith.constant 0 : i32
    %c0_i32_1 = arith.constant 0 : i32
    return %c0_i32, %c0_i32_0 : i32, i32
  }
  func.func @transform_5(%arg0: i32) -> (i32, i32) {
    %c0_i32 = arith.constant 0 : i32
    %c0_i32_0 = arith.constant 0 : i32
    %c0_i32_1 = arith.constant 0 : i32
    return %c0_i32, %c0_i32_0 : i32, i32
  }
  func.func @transform_6(%arg0: i32) -> (i32, i32) {
    %c0_i32 = arith.constant 0 : i32
    %c0_i32_0 = arith.constant 0 : i32
    %c0_i32_1 = arith.constant 0 : i32
    return %c0_i32, %c0_i32_0 : i32, i32
  }
  func.func @transform_7(%arg0: i32) -> (i32, i32) {
    %c0_i32 = arith.constant 0 : i32
    %c0_i32_0 = arith.constant 0 : i32
    %c0_i32_1 = arith.constant 0 : i32
    return %c0_i32, %c0_i32_0 : i32, i32
  }
  func.func @transform_8(%arg0: i32) -> (i32, i32) {
    %c0_i32 = arith.constant 0 : i32
    %c0_i32_0 = arith.constant 0 : i32
    %c0_i32_1 = arith.constant 0 : i32
    return %c0_i32, %c0_i32_0 : i32, i32
  }
  func.func @transform_9(%arg0: i32) -> (i32, i32, i32) {
    %c0_i32 = arith.constant 0 : i32
    %c0_i32_0 = arith.constant 0 : i32
    %c0_i32_1 = arith.constant 0 : i32
    return %c0_i32, %arg0, %c0_i32_0 : i32, i32, i32
  }
}

</mosaic_0001>

<bundles_post_ra>
// kernel: encoder_decoder_forward.1
= control target key start
LH: loop header
LB: loop body
LE: loop exit
PB: predicated region body
PF: predicated region fallthrough
CT: control target
= control target key end

     0   :  { %v8676_v3 = vmov 0.0|0.0   ;;  %v8674_v4 = vmov 0.0   ;;  %vm6845_vm0 = vmmov 0   ;;  %v6846_v9 = vmov 0   ;;  %s8659_s2 = inlined_call_operand.vmem [shape: f32[128,384], index: 2, kind: input, shape index: {}]   ;;  %s8660_s1 = inlined_call_operand.vmem [shape: s32[8,1], index: 1, kind: input, shape index: {}]   ;;  %s8661_s3 = inlined_call_operand.vmem [shape: f32[1,384], index: 3, kind: input, shape index: {}]   ;;  %s8662_s0 = inlined_call_operand.vmem [shape: f32[8,8,384], index: 0, kind: input, shape index: {}]   ;;  %s8663_s4 = inlined_call_operand.vmem [shape: f32[128,384], index: 4, kind: input, shape index: {}]   ;;  %s8664_s5 = inlined_call_operand.vmem [shape: f32[128,384], index: 5, kind: input, shape index: {}]   ;;  %s8665_s7 = inlined_call_operand.vmem [shape: f32[128,128], index: 7, kind: input, shape index: {}]   ;;  %s8666_s6 = inlined_call_operand.vmem [shape: f32[1,384], index: 6, kind: input, shape index: {}]   ;;  %s8667_s8 = inlined_call_operand.vmem [shape: f32[1,128], index: 8, kind: input, shape index: {}]   ;;  %s8668_s9 = inlined_call_operand.vmem [shape: f32[6,8,128], index: 9, kind: output, shape index: {}]  }
   0x1   :  { %v34_v0 = vld [vmem:[%s8659_s2 + $0x8] sm:$0xff]  ;;  %v37_v1 = vld [vmem:[%s8659_s2 + $0x20] sm:$0xff]  ;;  %5439 = vmatprep.subr.bf16.mxu1 %v8676_v3  ;;  %165 = vmatprep.mubr.f32.mxu0 %v8674_v4  ;;  %v36_v6 = vld [vmem:[%s8659_s2 + $0x18] sm:$0xff] }
   0x2   :  { %v33_v2 = vld [vmem:[%s8659_s2] sm:$0xff]  ;;  %v6909_v5 = vpack.c.bf16 %v37_v1, %v34_v0  ;;  %v40_v7 = vld [vmem:[%s8659_s2 + $0x38] sm:$0xff]  ;;  %v43_v8 = vld [vmem:[%s8659_s2 + $0x50] sm:$0xff]  ;;  %4529 = vmatprep.mubr.msk.f32.mxu1 %vm6845_vm0, %v8674_v4  ;;  %6700 = vset.pattern.permute.xlu0 %v6846_v9 }
   0x3   :  { %v6923_v10 = vpack.c.bf16 %v36_v6, %v33_v2  ;;  %v6925_v11 = vpack.c.bf16 %v43_v8, %v40_v7  ;;  %v39_v12 = vld [vmem:[%s8659_s2 + $0x30] sm:$0xff]  ;;  %v42_v13 = vld [vmem:[%s8659_s2 + $0x48] sm:$0xff]  ;;  %6701 = vset.pattern.permute.xlu1 %v6846_v9  ;;  %v49_v15 = vld [vmem:[%s8659_s2 + $0x80] sm:$0xff] }
   0x4   :  { %v46_v14 = vld [vmem:[%s8659_s2 + $0x68] sm:$0xff]  ;;  %5408 = vmatprep.subr.bf16.mxu0 %v6909_v5  ;;  %v6942_v16 = vpack.c.bf16 %v42_v13, %v39_v12  ;;  %v45_v18 = vld [vmem:[%s8659_s2 + $0x60] sm:$0xff]  ;;  %v48_v19 = vld [vmem:[%s8659_s2 + $0x78] sm:$0xff] }
   0x5   :  { %5410 = vmatpush1.bf16.msra.mxu0 %v6923_v10  ;;  %v6945_v17 = vpack.c.bf16 %v49_v15, %v46_v14  ;;  %v52_v20 = vld [vmem:[%s8659_s2 + $0x98] sm:$0xff]  ;;  %v55_v21 = vld [vmem:[%s8659_s2 + $0xb0] sm:$0xff]  ;;  %v6960_v22 = vpack.c.bf16 %v48_v19, %v45_v18  ;;  %v54_v25 = vld [vmem:[%s8659_s2 + $0xa8] sm:$0xff] }
   0x6   :  { %5412 = vmatprep.subr.bf16.mxu0 %v6925_v11  ;;  %v6963_v23 = vpack.c.bf16 %v55_v21, %v52_v20  ;;  %v51_v24 = vld [vmem:[%s8659_s2 + $0x90] sm:$0xff]  ;;  %v58_v26 = vld [vmem:[%s8659_s2 + $0xc8] sm:$0xff]  ;;  %v61_v27 = vld [vmem:[%s8659_s2 + $0xe0] sm:$0xff] }
   0x7   :  { %v35_v28 = vld [vmem:[%s8659_s2 + $0x10] sm:$0xff]  ;;  %v38_v29 = vld [vmem:[%s8659_s2 + $0x28] sm:$0xff]  ;;  %v41_v31 = vld [vmem:[%s8659_s2 + $0x40] sm:$0xff]  ;;  %v6992_v33 = vpack.c.bf16 %v54_v25, %v51_v24  ;;  %v6995_v34 = vpack.c.bf16 %v61_v27, %v58_v26  ;;  %v83_v26 = vlaneseq }
   0x8   :  { %v6983_v30 = vpack.c.bf16 %v38_v29, %v35_v28  ;;  %v44_v32 = vld [vmem:[%s8659_s2 + $0x58] sm:$0xff]  ;;  %v57_v35 = vld [vmem:[%s8659_s2 + $0xc0] sm:$0xff]  ;;  %v67_v39 = vld [vmem:[%s8659_s2 + $0x110] sm:$0xff] }
   0x9   :  { %5414 = vmatpush1.bf16.msra.mxu0 %v6942_v16  ;;  %v60_v36 = vld [vmem:[%s8659_s2 + $0xd8] sm:$0xff]  ;;  %v7007_v38 = vpack.c.bf16 %v44_v32, %v41_v31  ;;  %v47_v40 = vld [vmem:[%s8659_s2 + $0x70] sm:$0xff]  ;;  %v50_v41 = vld [vmem:[%s8659_s2 + $0x88] sm:$0xff]  ;;  %v7180_v27 = vshrl.u32 %v83_v26, 7 }
   0xa   :  { %5416 = vmatprep.subr.bf16.mxu0 %v6945_v17  ;;  %v64_v37 = vld [vmem:[%s8659_s2 + $0xf8] sm:$0xff]  ;;  %5441 = vmatpush3.bf16.msra.mxu1 %v6983_v30  ;;  %v7020_v42 = vpack.c.bf16 %v60_v36, %v57_v35  ;;  %v7025_v43 = vld [vmem:[%s8660_s1] sm:$0xff]  ;;  %v63_v45 = vld [vmem:[%s8659_s2 + $0xf0] sm:$0xff]  ;;  %v7040_v48 = vpack.c.bf16 %v50_v41, %v47_v40 }
   0xb   :  { %5442 = vmatprep.subr.bf16.mxu1 %v8676_v3  ;;  %v7028_v44 = vpack.c.bf16 %v67_v39, %v64_v37  ;;  %v66_v46 = vld [vmem:[%s8659_s2 + $0x108] sm:$0xff]  ;;  %vm263_vm1 = vcmp.gt.s32.totalorder %v7025_v43, 0  ;;  %vm436_vm2 = vcmp.gt.s32.totalorder %v7025_v43, 1  ;;  %v73_v49 = vld [vmem:[%s8659_s2 + $0x140] sm:$0xff]  ;;  %v56_v51 = vld [vmem:[%s8659_s2 + $0xb8] sm:$0xff]  ;;  %vm955_vm3 = vcmp.gt.s32.totalorder %v7025_v43, 4 }
   0xc   :  { %v70_v47 = vld [vmem:[%s8659_s2 + $0x128] sm:$0xff]  ;;  %v53_v50 = vld [vmem:[%s8659_s2 + $0xa0] sm:$0xff]  ;;  %v264_v52 = vsel %vm263_vm1, 1, %v6846_v9  ;;  %v7056_v53 = vpack.c.bf16 %v66_v46, %v63_v45  ;;  %v437_v54 = vsel %vm436_vm2, 1, %v6846_v9  ;;  %v72_v57 = vld [vmem:[%s8659_s2 + $0x138] sm:$0xff]  ;;  %v956_v0 = vsel %vm955_vm3, 1, %v6846_v9 }
   0xd   :  { %5418 = vmatpush1.bf16.msra.mxu0 %v6960_v22  ;;  %266 = vperm.xlu0 %6700, %v264_v52   ;;  %v7060_v55 = vpack.c.bf16 %v73_v49, %v70_v47  ;;  %v69_v56 = vld [vmem:[%s8659_s2 + $0x120] sm:$0xff]  ;;  %v76_v58 = vld [vmem:[%s8659_s2 + $0x158] sm:$0xff]  ;;  %v7072_v59 = vpack.c.bf16 %v56_v51, %v53_v50  ;;  %v79_v60 = vld [vmem:[%s8659_s2 + $0x170] sm:$0xff]  ;;  %vm1301_vm4 = vcmp.gt.s32.totalorder %v7025_v43, 6  ;;  %v8673_v28 = vsub.s32 0, %v7180_v27 }
   0xe   :  { %5420 = vmatprep.subr.bf16.mxu0 %v6963_v23  ;;  %5444 = vmatpush3.bf16.msra.mxu1 %v7007_v38  ;;  %v59_v61 = vld [vmem:[%s8659_s2 + $0xd0] sm:$0xff]  ;;  %v62_v62 = vld [vmem:[%s8659_s2 + $0xe8] sm:$0xff]  ;;  %v7086_v63 = vpack.c.bf16 %v72_v57, %v69_v56  ;;  %v7090_v1 = vpack.c.bf16 %v79_v60, %v76_v58  ;;  %v65_v8 = vld [vmem:[%s8659_s2 + $0x100] sm:$0xff]  ;;  %v1302_v14 = vsel %vm1301_vm4, 1, %v6846_v9  ;;  %v8672_v31 = vsub.s32 1, %v7180_v27 }
   0xf   :  { %5445 = vmatprep.subr.bf16.mxu1 %v8676_v3  ;;  %v75_v2 = vld [vmem:[%s8659_s2 + $0x150] sm:$0xff]  ;;  %v78_v6 = vld [vmem:[%s8659_s2 + $0x168] sm:$0xff]  ;;  %v7099_v7 = vpack.c.bf16 %v62_v62, %v59_v61  ;;  %v68_v12 = vld [vmem:[%s8659_s2 + $0x118] sm:$0xff]  ;;  %v8671_v57 = vsub.s32 2, %v7180_v27  ;;  %vm609_vm6 = vcmp.gt.s32.totalorder %v7025_v43, 2  ;;  %vm782_vm7 = vcmp.gt.s32.totalorder %v7025_v43, 3 }
  0x10   :  { %v7110_v13 = vpack.c.bf16 %v78_v6, %v75_v2  ;;  %v7115_v15 = vpack.c.bf16 %v68_v12, %v65_v8  ;;  %v71_v18 = vld [vmem:[%s8659_s2 + $0x130] sm:$0xff]  ;;  %v74_v19 = vld [vmem:[%s8659_s2 + $0x148] sm:$0xff]  ;;  %v77_v21 = vld [vmem:[%s8659_s2 + $0x160] sm:$0xff]  ;;  %vm1128_vm8 = vcmp.gt.s32.totalorder %v7025_v43, 5  ;;  %vm1474_vm9 = vcmp.gt.s32.totalorder %v7025_v43, 7 }
  0x11   :  { %5422 = vmatpush1.bf16.msra.mxu0 %v6992_v33  ;;  %439 = vperm.xlu0 %6700, %v437_v54   ;;  %v7126_v20 = vpack.c.bf16 %v74_v19, %v71_v18  ;;  %v80_v24 = vld [vmem:[%s8659_s2 + $0x178] sm:$0xff]  ;;  %v81_v29 = vld [vmem:[%s8661_s3] sm:$0x7]  ;;  %v99_v46 = vld [vmem:[%s8662_s0 + $0x8] sm:$0xff] }
  0x12   :  { %5424 = vmatprep.subr.bf16.mxu0 %v6995_v34  ;;  %5447 = vmatpush3.bf16.msra.mxu1 %v7040_v48  ;;  %v7140_v25 = vpack.c.bf16 %v80_v24, %v77_v21  ;;  %v7189_v32 = vrot.slane %v81_v29, %v8673_v28  ;;  %v7193_v35 = vrot.slane %v81_v29, %v8672_v31  ;;  %v98_v36 = vld [vmem:[%s8662_s0] sm:$0xff]  ;;  %v100_v2 = vld [vmem:[%s8662_s0 + $0x10] sm:$0xff] }
  0x13   :  { %5448 = vmatprep.subr.bf16.mxu1 %v8676_v3  ;;  %v7206_v58 = vrot.slane %v81_v29, %v8671_v57  ;;  %v1574_v57 = vld [vmem:[%s8664_s5 + $0x168] sm:$0xff] }
  0x15   :  { %5426 = vmatpush1.bf16.msra.mxu0 %v7020_v42  ;;  %958 = vperm.xlu0 %6700, %v956_v0  }
  0x16   :  { %5428 = vmatprep.subr.bf16.mxu0 %v7028_v44  ;;  %5450 = vmatpush3.bf16.msra.mxu1 %v7072_v59 }
  0x17   :  { %5451 = vmatprep.subr.bf16.mxu1 %v8676_v3 }
  0x19   :  { %5430 = vmatpush1.bf16.msra.mxu0 %v7056_v53  ;;  %1304 = vperm.xlu0 %6700, %v1302_v14  }
  0x1a   :  { %5432 = vmatprep.subr.bf16.mxu0 %v7060_v55  ;;  %5453 = vmatpush3.bf16.msra.mxu1 %v7099_v7 }
  0x1b   :  { %5454 = vmatprep.subr.bf16.mxu1 %v8676_v3 }
  0x1d   :  { %5434 = vmatpush1.bf16.msra.mxu0 %v7086_v63 }
  0x1e   :  { %5436 = vmatprep.subr.bf16.mxu0 %v7090_v1  ;;  %5456 = vmatpush3.bf16.msra.mxu1 %v7115_v15 }
  0x1f   :  { %5457 = vmatprep.subr.bf16.mxu1 %v8676_v3 }
  0x21   :  { %5438 = vmatpush1.bf16.msra.mxu0 %v7110_v13 }
  0x22   :  { %5464 = vmatprep.subr.bf16.mxu0 %v6909_v5  ;;  %5459 = vmatpush3.bf16.msra.mxu1 %v7126_v20 }
  0x23   :  { %5460 = vmatprep.subr.bf16.mxu1 %v8676_v3 }
  0x24   :  { %166 = vmatmul.mubr.f32.vlgmr.msra.gmra.mrb[0].mxu0 %v8674_v4 }
  0x25   :  { %5466 = vmatpush1.bf16.msra.mxu0 %v6923_v10  ;;  %338 = vmatprep.mubr.f32.mxu0 %v8674_v4 }
  0x26   :  { %5468 = vmatprep.subr.bf16.mxu0 %v6925_v11  ;;  %5462 = vmatpush3.bf16.msra.mxu1 %v7140_v25 }
  0x27   :  { %5495 = vmatprep.subr.bf16.mxu1 %v8676_v3 }
  0x29   :  { %5470 = vmatpush1.bf16.msra.mxu0 %v6942_v16  ;;  %4530 = vmatmul.mubr.f32.vlgmr.msra.gmra.mrb[0].mxu1 %v8674_v4 }
  0x2a   :  { %5472 = vmatprep.subr.bf16.mxu0 %v6945_v17  ;;  %5497 = vmatpush3.bf16.msra.mxu1 %v6983_v30 }
  0x2b   :  { %5498 = vmatprep.subr.bf16.mxu1 %v8676_v3  ;;  %4564 = vmatprep.mubr.msk.f32.mxu1 %vm6845_vm0, %v8674_v4 }
  0x2d   :  { %5474 = vmatpush1.bf16.msra.mxu0 %v6960_v22 }
  0x2e   :  { %5476 = vmatprep.subr.bf16.mxu0 %v6963_v23  ;;  %5500 = vmatpush3.bf16.msra.mxu1 %v7007_v38 }
  0x2f   :  { %5501 = vmatprep.subr.bf16.mxu1 %v8676_v3 }
  0x31   :  { %5478 = vmatpush1.bf16.msra.mxu0 %v6992_v33 }
  0x32   :  { %5480 = vmatprep.subr.bf16.mxu0 %v6995_v34  ;;  %5503 = vmatpush3.bf16.msra.mxu1 %v7040_v48 }
  0x33   :  { %5504 = vmatprep.subr.bf16.mxu1 %v8676_v3 }
  0x35   :  { %5482 = vmatpush1.bf16.msra.mxu0 %v7020_v42 }
  0x36   :  { %5484 = vmatprep.subr.bf16.mxu0 %v7028_v44  ;;  %5506 = vmatpush3.bf16.msra.mxu1 %v7072_v59 }
  0x37   :  { %5507 = vmatprep.subr.bf16.mxu1 %v8676_v3 }
  0x39   :  { %5486 = vmatpush1.bf16.msra.mxu0 %v7056_v53 }
  0x3a   :  { %5488 = vmatprep.subr.bf16.mxu0 %v7060_v55  ;;  %5509 = vmatpush3.bf16.msra.mxu1 %v7099_v7 }
  0x3b   :  { %5510 = vmatprep.subr.bf16.mxu1 %v8676_v3 }
  0x3d   :  { %5490 = vmatpush1.bf16.msra.mxu0 %v7086_v63 }
  0x3e   :  { %5492 = vmatprep.subr.bf16.mxu0 %v7090_v1  ;;  %5512 = vmatpush3.bf16.msra.mxu1 %v7115_v15 }
  0x3f   :  { %5513 = vmatprep.subr.bf16.mxu1 %v8676_v3 }
  0x41   :  { %5494 = vmatpush1.bf16.msra.mxu0 %v7110_v13 }
  0x42   :  { %5520 = vmatprep.subr.bf16.mxu0 %v6909_v5  ;;  %5515 = vmatpush3.bf16.msra.mxu1 %v7126_v20 }
  0x43   :  { %5516 = vmatprep.subr.bf16.mxu1 %v8676_v3 }
  0x46   :  { %5518 = vmatpush3.bf16.msra.mxu1 %v7140_v25 }
  0x47   :  { %5551 = vmatprep.subr.bf16.mxu1 %v8676_v3 }
  0x8c   :  { %v267_v19 = vpop.permute.xlu0 %266 }
  0x8d   :  { %vm268_vm5 = vcmp.eq.s32.totalorder %v267_v19, 1 }
  0xf7   :  { %v167_v37 = vpop.f32.mrb[0].mxu0 }
  0xf8   :  { %v168_v39 = vadd.f32 %v167_v37, %v7189_v32  ;;  %v169_v40 = vpop.f32.mrb[1].mxu0  ;;  %v610_v37 = vsel %vm609_vm6, 1, %v6846_v9 }
  0xf9   :  { %v170_v41 = vadd.f32 %v169_v40, %v7193_v35  ;;  %612 = vperm.xlu1 %6701, %v610_v37   ;;  %v1129_v40 = vsel %vm1128_vm8, 1, %v6846_v9 }
  0xfa   :  { %v242_v45 = vadd.f32 %v168_v39, %v98_v36  ;;  %v783_v39 = vsel %vm782_vm7, 1, %v6846_v9 }
  0xfb   :  { %v249_v49 = vadd.f32 %v170_v41, %v99_v46  ;;  %v1475_v41 = vsel %vm1474_vm9, 1, %v6846_v9 }
  0xfc   :  { %v3980_v47 = vmul.f32 -1.442695, %v242_v45  ;;  %v238_v50 = vpop.f32.mrb[0].mxu1  ;;  %v3982_v45 = vld [vmem:[%s8662_s0 + $0x18] sm:$0xff] }
  0xfd   :  { %v3981_v51 = vmul.f32 -1.442695, %v249_v49  ;;  %v4531_v52 = vpop.f32.mrb[1].mxu1  ;;  %v239_v62 = vadd.f32 %v238_v50, %v7206_v58  ;;  %785 = vperm.xlu1 %6701, %v783_v39   ;;  %v3983_v50 = vld [vmem:[%s8662_s0 + $0x20] sm:$0xff]  ;;  %v440_v39 = vpop.permute.xlu0 %439 }
  0xfe   :  { %6702 = vpow2.f32 %v3980_v47  ;;  %vm441_vm10 = vcmp.eq.s32.totalorder %v440_v39, 1 }
  0xff   :  { %6704 = vpow2.f32 %v3981_v51 }
 0x101   :  { %1131 = vperm.xlu1 %6701, %v1129_v40  }
 0x105   :  { %1477 = vperm.xlu1 %6701, %v1475_v41  }
 0x108   :  { %v6703_v54 = vpop.eup %6702 }
 0x109   :  { %v246_v56 = vadd.f32 1.0, %v6703_v54  ;;  %v6705_v60 = vpop.eup %6704 }
 0x10a   :  { %v253_v61 = vadd.f32 1.0, %v6705_v60 }
 0x10b   :  { %6706 = vrcp.f32 %v246_v56 }
 0x10c   :  { %6708 = vrcp.f32 %v253_v61 }
 0x115   :  { %v6707_v0 = vpop.eup %6706 }
 0x116   :  { %v256_v6 = vmul.f32 %v6707_v0, %v239_v62  ;;  %v6709_v12 = vpop.eup %6708 }
 0x117   :  { %v259_v14 = vsub.f32 1.0, %v6709_v12  ;;  %v261_v24 = vmul.f32 0.0, %v6709_v12  ;;  %v3984_v12 = vld [vmem:[%s8662_s0 + $0x28] sm:$0xff] }
 0x118   :  { %v257_v8 = vadd.f32 %v256_v6, %v100_v2 }
 0x11a   :  { %6710 = vtanh.f32 %v257_v8 }
 0x124   :  { %v6711_v18 = vpop.eup %6710 }
 0x125   :  { %v260_v21 = vmul.f32 %v6711_v18, %v259_v14 }
 0x127   :  { %v262_v29 = vadd.f32 %v261_v24, %v260_v21 }
 0x129   :  { %v7212_v36 = vsel %vm268_vm5, %v262_v29, 0.0  ;;  %3985 = vmatmul.mubr.msk.f32.vlgmr.msra.gmra.mrb[2].mxu0 %vm268_vm5, %v262_v29  ;;  %4565 = vmatmul.mubr.msk.f32.vlgmr.msra.gmra.mrb[2].mxu1 %vm268_vm5, %v262_v29 }
 0x12a   :  { %5522 = vmatpush1.bf16.msra.mxu0 %v6923_v10  ;;  %5553 = vmatpush3.bf16.msra.mxu1 %v6983_v30 }
 0x12b   :  { %5524 = vmatprep.subr.bf16.mxu0 %v6925_v11  ;;  %5554 = vmatprep.subr.bf16.mxu1 %v8676_v3 }
 0x12c   :  { %511 = vmatprep.mubr.f32.mxu0 %v8674_v4  ;;  %4599 = vmatprep.mubr.msk.f32.mxu1 %vm6845_vm0, %v8674_v4 }
 0x12e   :  { %5526 = vmatpush1.bf16.msra.mxu0 %v6942_v16  ;;  %5556 = vmatpush3.bf16.msra.mxu1 %v7007_v38 }
 0x12f   :  { %5528 = vmatprep.subr.bf16.mxu0 %v6945_v17  ;;  %5557 = vmatprep.subr.bf16.mxu1 %v8676_v3 }
 0x132   :  { %5530 = vmatpush1.bf16.msra.mxu0 %v6960_v22  ;;  %5559 = vmatpush3.bf16.msra.mxu1 %v7040_v48 }
 0x133   :  { %5532 = vmatprep.subr.bf16.mxu0 %v6963_v23  ;;  %5560 = vmatprep.subr.bf16.mxu1 %v8676_v3 }
 0x136   :  { %5534 = vmatpush1.bf16.msra.mxu0 %v6992_v33  ;;  %5562 = vmatpush3.bf16.msra.mxu1 %v7072_v59 }
 0x137   :  { %5536 = vmatprep.subr.bf16.mxu0 %v6995_v34  ;;  %5563 = vmatprep.subr.bf16.mxu1 %v8676_v3 }
 0x13a   :  { %5538 = vmatpush1.bf16.msra.mxu0 %v7020_v42  ;;  %5565 = vmatpush3.bf16.msra.mxu1 %v7099_v7 }
 0x13b   :  { %5540 = vmatprep.subr.bf16.mxu0 %v7028_v44  ;;  %5566 = vmatprep.subr.bf16.mxu1 %v8676_v3 }
 0x13e   :  { %5542 = vmatpush1.bf16.msra.mxu0 %v7056_v53  ;;  %5568 = vmatpush3.bf16.msra.mxu1 %v7115_v15 }
 0x13f   :  { %5544 = vmatprep.subr.bf16.mxu0 %v7060_v55  ;;  %5569 = vmatprep.subr.bf16.mxu1 %v8676_v3 }
 0x142   :  { %5546 = vmatpush1.bf16.msra.mxu0 %v7086_v63  ;;  %5571 = vmatpush3.bf16.msra.mxu1 %v7126_v20 }
 0x143   :  { %5548 = vmatprep.subr.bf16.mxu0 %v7090_v1  ;;  %5572 = vmatprep.subr.bf16.mxu1 %v8676_v3 }
 0x146   :  { %5550 = vmatpush1.bf16.msra.mxu0 %v7110_v13  ;;  %5574 = vmatpush3.bf16.msra.mxu1 %v7140_v25 }
 0x147   :  { %5576 = vmatprep.subr.bf16.mxu0 %v6909_v5  ;;  %5607 = vmatprep.subr.bf16.mxu1 %v8676_v3 }
 0x1fc   :  { %v340_v46 = vpop.f32.mrb[2].mxu0  ;;  %v411_v47 = vpop.f32.mrb[2].mxu1 }
 0x1fd   :  { %v341_v49 = vadd.f32 %v340_v46, %v7189_v32  ;;  %v342_v51 = vpop.f32.mrb[3].mxu0  ;;  %v4566_v52 = vpop.f32.mrb[3].mxu1  ;;  %v412_v6 = vadd.f32 %v411_v47, %v7206_v58 }
 0x1fe   :  { %v343_v43 = vadd.f32 %v342_v51, %v7193_v35 }
 0x1ff   :  { %v415_v54 = vadd.f32 %v3982_v45, %v341_v49 }
 0x200   :  { %v422_v56 = vadd.f32 %v3983_v50, %v343_v43  ;;  %v3990_v43 = vld [vmem:[%s8662_s0 + $0x38] sm:$0xff] }
 0x201   :  { %v3987_v9 = vmul.f32 -1.442695, %v415_v54 }
 0x202   :  { %v3988_v60 = vmul.f32 -1.442695, %v422_v56 }
 0x203   :  { %6712 = vpow2.f32 %v3987_v9 }
 0x204   :  { %6714 = vpow2.f32 %v3988_v60 }
 0x20d   :  { %v6713_v61 = vpop.eup %6712 }
 0x20e   :  { %v6715_v62 = vpop.eup %6714  ;;  %v419_v0 = vadd.f32 1.0, %v6713_v61 }
 0x20f   :  { %v426_v2 = vadd.f32 1.0, %v6715_v62 }
 0x210   :  { %6716 = vrcp.f32 %v419_v0 }
 0x211   :  { %6718 = vrcp.f32 %v426_v2 }
 0x21a   :  { %v6717_v8 = vpop.eup %6716 }
 0x21b   :  { %v6719_v14 = vpop.eup %6718  ;;  %v429_v18 = vmul.f32 %v6717_v8, %v412_v6  ;;  %v3991_v8 = vld [vmem:[%s8662_s0 + $0x40] sm:$0xff] }
 0x21c   :  { %v434_v19 = vmul.f32 %v6719_v14, %v7212_v36  ;;  %v432_v24 = vsub.f32 1.0, %v6719_v14 }
 0x21d   :  { %v430_v21 = vadd.f32 %v3984_v12, %v429_v18 }
 0x21f   :  { %6720 = vtanh.f32 %v430_v21 }
 0x229   :  { %v6721_v29 = vpop.eup %6720 }
 0x22a   :  { %v433_v37 = vmul.f32 %v6721_v29, %v432_v24  ;;  %v613_v24 = vpop.permute.xlu1 %612 }
 0x22b   :  { %vm614_vm11 = vcmp.eq.s32.totalorder %v613_v24, 1 }
 0x22c   :  { %v435_v40 = vadd.f32 %v434_v19, %v433_v37 }
 0x22e   :  { %v7271_v41 = vsel %vm441_vm10, %v435_v40, %v7212_v36  ;;  %v3989_v36 = vld [vmem:[%s8662_s0 + $0x30] sm:$0xff] }
 0x22f   :  { %512 = vmatmul.mubr.f32.vlgmr.msra.gmra.mrb[4].mxu0 %v7271_v41  ;;  %4600 = vmatmul.mubr.f32.vlgmr.msra.gmra.mrb[4].mxu1 %v7271_v41 }
 0x230   :  { %5578 = vmatpush1.bf16.msra.mxu0 %v6923_v10  ;;  %5609 = vmatpush3.bf16.msra.mxu1 %v6983_v30 }
 0x231   :  { %5580 = vmatprep.subr.bf16.mxu0 %v6925_v11  ;;  %5610 = vmatprep.subr.bf16.mxu1 %v8676_v3 }
 0x232   :  { %684 = vmatprep.mubr.f32.mxu0 %v8674_v4  ;;  %4634 = vmatprep.mubr.msk.f32.mxu1 %vm6845_vm0, %v8674_v4 }
 0x234   :  { %5582 = vmatpush1.bf16.msra.mxu0 %v6942_v16  ;;  %5612 = vmatpush3.bf16.msra.mxu1 %v7007_v38 }
 0x235   :  { %5584 = vmatprep.subr.bf16.mxu0 %v6945_v17  ;;  %5613 = vmatprep.subr.bf16.mxu1 %v8676_v3 }
 0x238   :  { %5586 = vmatpush1.bf16.msra.mxu0 %v6960_v22  ;;  %5615 = vmatpush3.bf16.msra.mxu1 %v7040_v48 }
 0x239   :  { %5588 = vmatprep.subr.bf16.mxu0 %v6963_v23  ;;  %5616 = vmatprep.subr.bf16.mxu1 %v8676_v3 }
 0x23c   :  { %5590 = vmatpush1.bf16.msra.mxu0 %v6992_v33  ;;  %5618 = vmatpush3.bf16.msra.mxu1 %v7072_v59 }
 0x23d   :  { %5592 = vmatprep.subr.bf16.mxu0 %v6995_v34  ;;  %5619 = vmatprep.subr.bf16.mxu1 %v8676_v3 }
 0x240   :  { %5594 = vmatpush1.bf16.msra.mxu0 %v7020_v42  ;;  %5621 = vmatpush3.bf16.msra.mxu1 %v7099_v7 }
 0x241   :  { %5596 = vmatprep.subr.bf16.mxu0 %v7028_v44  ;;  %5622 = vmatprep.subr.bf16.mxu1 %v8676_v3 }
 0x244   :  { %5598 = vmatpush1.bf16.msra.mxu0 %v7056_v53  ;;  %5624 = vmatpush3.bf16.msra.mxu1 %v7115_v15 }
 0x245   :  { %5600 = vmatprep.subr.bf16.mxu0 %v7060_v55  ;;  %5625 = vmatprep.subr.bf16.mxu1 %v8676_v3 }
 0x248   :  { %5602 = vmatpush1.bf16.msra.mxu0 %v7086_v63  ;;  %5627 = vmatpush3.bf16.msra.mxu1 %v7126_v20 }
 0x249   :  { %5604 = vmatprep.subr.bf16.mxu0 %v7090_v1  ;;  %5628 = vmatprep.subr.bf16.mxu1 %v8676_v3 }
 0x24c   :  { %5606 = vmatpush1.bf16.msra.mxu0 %v7110_v13  ;;  %5630 = vmatpush3.bf16.msra.mxu1 %v7140_v25 }
 0x24d   :  { %5632 = vmatprep.subr.bf16.mxu0 %v6909_v5  ;;  %5663 = vmatprep.subr.bf16.mxu1 %v8676_v3 }
 0x302   :  { %v513_v45 = vpop.f32.mrb[4].mxu0  ;;  %v584_v46 = vpop.f32.mrb[4].mxu1 }
 0x303   :  { %v514_v47 = vadd.f32 %v513_v45, %v7189_v32  ;;  %v515_v49 = vpop.f32.mrb[5].mxu0  ;;  %v4601_v50 = vpop.f32.mrb[5].mxu1  ;;  %v585_v2 = vadd.f32 %v584_v46, %v7206_v58 }
 0x304   :  { %v516_v51 = vadd.f32 %v515_v49, %v7193_v35 }
 0x305   :  { %v588_v52 = vadd.f32 %v3989_v36, %v514_v47 }
 0x306   :  { %v595_v56 = vadd.f32 %v3990_v43, %v516_v51 }
 0x307   :  { %v3992_v54 = vmul.f32 -1.442695, %v588_v52  ;;  %v3995_v52 = vld [vmem:[%s8662_s0 + $0x50] sm:$0xff] }
 0x308   :  { %v3993_v9 = vmul.f32 -1.442695, %v595_v56 }
 0x309   :  { %6722 = vpow2.f32 %v3992_v54 }
 0x30a   :  { %6724 = vpow2.f32 %v3993_v9 }
 0x313   :  { %v6723_v60 = vpop.eup %6722 }
 0x314   :  { %v592_v61 = vadd.f32 1.0, %v6723_v60  ;;  %v6725_v62 = vpop.eup %6724 }
 0x315   :  { %v599_v0 = vadd.f32 1.0, %v6725_v62 }
 0x316   :  { %6726 = vrcp.f32 %v592_v61 }
 0x317   :  { %6728 = vrcp.f32 %v599_v0 }
 0x320   :  { %v6727_v6 = vpop.eup %6726 }
 0x321   :  { %v602_v12 = vmul.f32 %v6727_v6, %v585_v2  ;;  %v6729_v18 = vpop.eup %6728  ;;  %v3996_v6 = vld [vmem:[%s8662_s0 + $0x58] sm:$0xff] }
 0x322   :  { %v605_v19 = vsub.f32 1.0, %v6729_v18  ;;  %v607_v37 = vmul.f32 %v6729_v18, %v7271_v41 }
 0x323   :  { %v603_v14 = vadd.f32 %v3991_v8, %v602_v12 }
 0x325   :  { %6730 = vtanh.f32 %v603_v14 }
 0x32f   :  { %v6731_v21 = vpop.eup %6730 }
 0x330   :  { %v606_v29 = vmul.f32 %v6731_v21, %v605_v19 }
 0x332   :  { %v608_v39 = vadd.f32 %v607_v37, %v606_v29  ;;  %v786_v29 = vpop.permute.xlu1 %785 }
 0x333   :  { %vm787_vm12 = vcmp.eq.s32.totalorder %v786_v29, 1 }
 0x334   :  { %v7324_v40 = vsel %vm614_vm11, %v608_v39, %v7271_v41  ;;  %v3994_v41 = vld [vmem:[%s8662_s0 + $0x48] sm:$0xff] }
 0x335   :  { %685 = vmatmul.mubr.f32.vlgmr.msra.gmra.mrb[6].mxu0 %v7324_v40  ;;  %4635 = vmatmul.mubr.f32.vlgmr.msra.gmra.mrb[6].mxu1 %v7324_v40 }
 0x336   :  { %5634 = vmatpush1.bf16.msra.mxu0 %v6923_v10  ;;  %5665 = vmatpush3.bf16.msra.mxu1 %v6983_v30 }
 0x337   :  { %5636 = vmatprep.subr.bf16.mxu0 %v6925_v11  ;;  %5666 = vmatprep.subr.bf16.mxu1 %v8676_v3 }
 0x338   :  { %857 = vmatprep.mubr.f32.mxu0 %v8674_v4  ;;  %4669 = vmatprep.mubr.msk.f32.mxu1 %vm6845_vm0, %v8674_v4 }
 0x33a   :  { %5638 = vmatpush1.bf16.msra.mxu0 %v6942_v16  ;;  %5668 = vmatpush3.bf16.msra.mxu1 %v7007_v38 }
 0x33b   :  { %5640 = vmatprep.subr.bf16.mxu0 %v6945_v17  ;;  %5669 = vmatprep.subr.bf16.mxu1 %v8676_v3 }
 0x33e   :  { %5642 = vmatpush1.bf16.msra.mxu0 %v6960_v22  ;;  %5671 = vmatpush3.bf16.msra.mxu1 %v7040_v48 }
 0x33f   :  { %5644 = vmatprep.subr.bf16.mxu0 %v6963_v23  ;;  %5672 = vmatprep.subr.bf16.mxu1 %v8676_v3 }
 0x342   :  { %5646 = vmatpush1.bf16.msra.mxu0 %v6992_v33  ;;  %5674 = vmatpush3.bf16.msra.mxu1 %v7072_v59 }
 0x343   :  { %5648 = vmatprep.subr.bf16.mxu0 %v6995_v34  ;;  %5675 = vmatprep.subr.bf16.mxu1 %v8676_v3 }
 0x346   :  { %5650 = vmatpush1.bf16.msra.mxu0 %v7020_v42  ;;  %5677 = vmatpush3.bf16.msra.mxu1 %v7099_v7 }
 0x347   :  { %5652 = vmatprep.subr.bf16.mxu0 %v7028_v44  ;;  %5678 = vmatprep.subr.bf16.mxu1 %v8676_v3 }
 0x34a   :  { %5654 = vmatpush1.bf16.msra.mxu0 %v7056_v53  ;;  %5680 = vmatpush3.bf16.msra.mxu1 %v7115_v15 }
 0x34b   :  { %5656 = vmatprep.subr.bf16.mxu0 %v7060_v55  ;;  %5681 = vmatprep.subr.bf16.mxu1 %v8676_v3 }
 0x34e   :  { %5658 = vmatpush1.bf16.msra.mxu0 %v7086_v63  ;;  %5683 = vmatpush3.bf16.msra.mxu1 %v7126_v20 }
 0x34f   :  { %5660 = vmatprep.subr.bf16.mxu0 %v7090_v1  ;;  %5684 = vmatprep.subr.bf16.mxu1 %v8676_v3 }
 0x352   :  { %5662 = vmatpush1.bf16.msra.mxu0 %v7110_v13  ;;  %5686 = vmatpush3.bf16.msra.mxu1 %v7140_v25 }
 0x353   :  { %5688 = vmatprep.subr.bf16.mxu0 %v6909_v5  ;;  %5719 = vmatprep.subr.bf16.mxu1 %v8676_v3 }
 0x408   :  { %v686_v36 = vpop.f32.mrb[6].mxu0  ;;  %v757_v45 = vpop.f32.mrb[6].mxu1 }
 0x409   :  { %v687_v46 = vadd.f32 %v686_v36, %v7189_v32  ;;  %v688_v47 = vpop.f32.mrb[7].mxu0  ;;  %v4636_v49 = vpop.f32.mrb[7].mxu1  ;;  %v758_v0 = vadd.f32 %v757_v45, %v7206_v58 }
 0x40a   :  { %v689_v50 = vadd.f32 %v688_v47, %v7193_v35 }
 0x40b   :  { %v761_v51 = vadd.f32 %v3994_v41, %v687_v46 }
 0x40c   :  { %v768_v54 = vadd.f32 %v3995_v52, %v689_v50 }
 0x40d   :  { %v3997_v43 = vmul.f32 -1.442695, %v761_v51  ;;  %v4000_v51 = vld [vmem:[%s8662_s0 + $0x68] sm:$0xff] }
 0x40e   :  { %v3998_v56 = vmul.f32 -1.442695, %v768_v54 }
 0x40f   :  { %6732 = vpow2.f32 %v3997_v43 }
 0x410   :  { %6734 = vpow2.f32 %v3998_v56 }
 0x419   :  { %v6733_v9 = vpop.eup %6732 }
 0x41a   :  { %v765_v60 = vadd.f32 1.0, %v6733_v9  ;;  %v6735_v61 = vpop.eup %6734 }
 0x41b   :  { %v772_v62 = vadd.f32 1.0, %v6735_v61 }
 0x41c   :  { %6736 = vrcp.f32 %v765_v60 }
 0x41d   :  { %6738 = vrcp.f32 %v772_v62 }
 0x426   :  { %v6737_v2 = vpop.eup %6736 }
 0x427   :  { %v775_v8 = vmul.f32 %v6737_v2, %v758_v0  ;;  %v6739_v14 = vpop.eup %6738  ;;  %v4001_v2 = vld [vmem:[%s8662_s0 + $0x70] sm:$0xff] }
 0x428   :  { %v778_v18 = vsub.f32 1.0, %v6739_v14  ;;  %v780_v24 = vmul.f32 %v6739_v14, %v7324_v40 }
 0x429   :  { %v776_v12 = vadd.f32 %v3996_v6, %v775_v8 }
 0x42b   :  { %6740 = vtanh.f32 %v776_v12 }
 0x435   :  { %v6741_v19 = vpop.eup %6740 }
 0x436   :  { %v779_v21 = vmul.f32 %v6741_v19, %v778_v18 }
 0x438   :  { %v781_v37 = vadd.f32 %v780_v24, %v779_v21  ;;  %v959_v24 = vpop.permute.xlu0 %958 }
 0x439   :  { %vm960_vm13 = vcmp.eq.s32.totalorder %v959_v24, 1 }
 0x43a   :  { %v7377_v39 = vsel %vm787_vm12, %v781_v37, %v7324_v40  ;;  %v3999_v40 = vld [vmem:[%s8662_s0 + $0x60] sm:$0xff] }
 0x43b   :  { %858 = vmatmul.mubr.f32.vlgmr.msra.gmra.mrb[8].mxu0 %v7377_v39  ;;  %4670 = vmatmul.mubr.f32.vlgmr.msra.gmra.mrb[8].mxu1 %v7377_v39 }
 0x43c   :  { %5690 = vmatpush1.bf16.msra.mxu0 %v6923_v10  ;;  %5721 = vmatpush3.bf16.msra.mxu1 %v6983_v30 }
 0x43d   :  { %5692 = vmatprep.subr.bf16.mxu0 %v6925_v11  ;;  %5722 = vmatprep.subr.bf16.mxu1 %v8676_v3 }
 0x43e   :  { %1030 = vmatprep.mubr.f32.mxu0 %v8674_v4  ;;  %4704 = vmatprep.mubr.msk.f32.mxu1 %vm6845_vm0, %v8674_v4 }
 0x440   :  { %5694 = vmatpush1.bf16.msra.mxu0 %v6942_v16  ;;  %5724 = vmatpush3.bf16.msra.mxu1 %v7007_v38 }
 0x441   :  { %5696 = vmatprep.subr.bf16.mxu0 %v6945_v17  ;;  %5725 = vmatprep.subr.bf16.mxu1 %v8676_v3 }
 0x444   :  { %5698 = vmatpush1.bf16.msra.mxu0 %v6960_v22  ;;  %5727 = vmatpush3.bf16.msra.mxu1 %v7040_v48 }
 0x445   :  { %5700 = vmatprep.subr.bf16.mxu0 %v6963_v23  ;;  %5728 = vmatprep.subr.bf16.mxu1 %v8676_v3 }
 0x448   :  { %5702 = vmatpush1.bf16.msra.mxu0 %v6992_v33  ;;  %5730 = vmatpush3.bf16.msra.mxu1 %v7072_v59 }
 0x449   :  { %5704 = vmatprep.subr.bf16.mxu0 %v6995_v34  ;;  %5731 = vmatprep.subr.bf16.mxu1 %v8676_v3 }
 0x44c   :  { %5706 = vmatpush1.bf16.msra.mxu0 %v7020_v42  ;;  %5733 = vmatpush3.bf16.msra.mxu1 %v7099_v7 }
 0x44d   :  { %5708 = vmatprep.subr.bf16.mxu0 %v7028_v44  ;;  %5734 = vmatprep.subr.bf16.mxu1 %v8676_v3 }
 0x450   :  { %5710 = vmatpush1.bf16.msra.mxu0 %v7056_v53  ;;  %5736 = vmatpush3.bf16.msra.mxu1 %v7115_v15 }
 0x451   :  { %5712 = vmatprep.subr.bf16.mxu0 %v7060_v55  ;;  %5737 = vmatprep.subr.bf16.mxu1 %v8676_v3 }
 0x454   :  { %5714 = vmatpush1.bf16.msra.mxu0 %v7086_v63  ;;  %5739 = vmatpush3.bf16.msra.mxu1 %v7126_v20 }
 0x455   :  { %5716 = vmatprep.subr.bf16.mxu0 %v7090_v1  ;;  %5740 = vmatprep.subr.bf16.mxu1 %v8676_v3 }
 0x458   :  { %5718 = vmatpush1.bf16.msra.mxu0 %v7110_v13  ;;  %5742 = vmatpush3.bf16.msra.mxu1 %v7140_v25 }
 0x459   :  { %5744 = vmatprep.subr.bf16.mxu0 %v6909_v5  ;;  %5775 = vmatprep.subr.bf16.mxu1 %v8676_v3 }
 0x50e   :  { %v859_v41 = vpop.f32.mrb[8].mxu0  ;;  %v930_v36 = vpop.f32.mrb[8].mxu1 }
 0x50f   :  { %v860_v45 = vadd.f32 %v859_v41, %v7189_v32  ;;  %v861_v46 = vpop.f32.mrb[9].mxu0  ;;  %v4671_v47 = vpop.f32.mrb[9].mxu1  ;;  %v931_v62 = vadd.f32 %v930_v36, %v7206_v58 }
 0x510   :  { %v862_v49 = vadd.f32 %v861_v46, %v7193_v35 }
 0x511   :  { %v934_v50 = vadd.f32 %v3999_v40, %v860_v45 }
 0x512   :  { %v941_v43 = vadd.f32 %v4000_v51, %v862_v49 }
 0x513   :  { %v4002_v52 = vmul.f32 -1.442695, %v934_v50  ;;  %v4005_v50 = vld [vmem:[%s8662_s0 + $0x80] sm:$0xff] }
 0x514   :  { %v4003_v54 = vmul.f32 -1.442695, %v941_v43 }
 0x515   :  { %6742 = vpow2.f32 %v4002_v52 }
 0x516   :  { %6744 = vpow2.f32 %v4003_v54 }
 0x51f   :  { %v6743_v56 = vpop.eup %6742 }
 0x520   :  { %v938_v9 = vadd.f32 1.0, %v6743_v56  ;;  %v6745_v60 = vpop.eup %6744 }
 0x521   :  { %v945_v61 = vadd.f32 1.0, %v6745_v60 }
 0x522   :  { %6746 = vrcp.f32 %v938_v9 }
 0x523   :  { %6748 = vrcp.f32 %v945_v61 }
 0x52c   :  { %v6747_v0 = vpop.eup %6746 }
 0x52d   :  { %v948_v6 = vmul.f32 %v6747_v0, %v931_v62  ;;  %v6749_v12 = vpop.eup %6748  ;;  %v4006_v62 = vld [vmem:[%s8662_s0 + $0x88] sm:$0xff] }
 0x52e   :  { %v951_v14 = vsub.f32 1.0, %v6749_v12  ;;  %v953_v21 = vmul.f32 %v6749_v12, %v7377_v39 }
 0x52f   :  { %v949_v8 = vadd.f32 %v4001_v2, %v948_v6 }
 0x531   :  { %6750 = vtanh.f32 %v949_v8 }
 0x53b   :  { %v6751_v18 = vpop.eup %6750 }
 0x53c   :  { %v952_v19 = vmul.f32 %v6751_v18, %v951_v14 }
 0x53e   :  { %v954_v29 = vadd.f32 %v953_v21, %v952_v19  ;;  %v1132_v19 = vpop.permute.xlu1 %1131 }
 0x53f   :  { %vm1133_vm14 = vcmp.eq.s32.totalorder %v1132_v19, 1  ;;  %v1496_v19 = vld [vmem:[%s8663_s4 + $0x78] sm:$0xff] }
 0x540   :  { %v7430_v37 = vsel %vm960_vm13, %v954_v29, %v7377_v39  ;;  %v4004_v39 = vld [vmem:[%s8662_s0 + $0x78] sm:$0xff] }
 0x541   :  { %1031 = vmatmul.mubr.f32.vlgmr.msra.gmra.mrb[10].mxu0 %v7430_v37  ;;  %4705 = vmatmul.mubr.f32.vlgmr.msra.gmra.mrb[10].mxu1 %v7430_v37 }
 0x542   :  { %5746 = vmatpush1.bf16.msra.mxu0 %v6923_v10  ;;  %5777 = vmatpush3.bf16.msra.mxu1 %v6983_v30 }
 0x543   :  { %5748 = vmatprep.subr.bf16.mxu0 %v6925_v11  ;;  %5778 = vmatprep.subr.bf16.mxu1 %v8676_v3 }
 0x544   :  { %1203 = vmatprep.mubr.f32.mxu0 %v8674_v4  ;;  %4739 = vmatprep.mubr.msk.f32.mxu1 %vm6845_vm0, %v8674_v4 }
 0x546   :  { %5750 = vmatpush1.bf16.msra.mxu0 %v6942_v16  ;;  %5780 = vmatpush3.bf16.msra.mxu1 %v7007_v38 }
 0x547   :  { %5752 = vmatprep.subr.bf16.mxu0 %v6945_v17  ;;  %5781 = vmatprep.subr.bf16.mxu1 %v8676_v3 }
 0x54a   :  { %5754 = vmatpush1.bf16.msra.mxu0 %v6960_v22  ;;  %5783 = vmatpush3.bf16.msra.mxu1 %v7040_v48 }
 0x54b   :  { %5756 = vmatprep.subr.bf16.mxu0 %v6963_v23  ;;  %5784 = vmatprep.subr.bf16.mxu1 %v8676_v3 }
 0x54e   :  { %5758 = vmatpush1.bf16.msra.mxu0 %v6992_v33  ;;  %5786 = vmatpush3.bf16.msra.mxu1 %v7072_v59 }
 0x54f   :  { %5760 = vmatprep.subr.bf16.mxu0 %v6995_v34  ;;  %5787 = vmatprep.subr.bf16.mxu1 %v8676_v3 }
 0x552   :  { %5762 = vmatpush1.bf16.msra.mxu0 %v7020_v42  ;;  %5789 = vmatpush3.bf16.msra.mxu1 %v7099_v7 }
 0x553   :  { %5764 = vmatprep.subr.bf16.mxu0 %v7028_v44  ;;  %5790 = vmatprep.subr.bf16.mxu1 %v8676_v3 }
 0x556   :  { %5766 = vmatpush1.bf16.msra.mxu0 %v7056_v53  ;;  %5792 = vmatpush3.bf16.msra.mxu1 %v7115_v15 }
 0x557   :  { %5768 = vmatprep.subr.bf16.mxu0 %v7060_v55  ;;  %5793 = vmatprep.subr.bf16.mxu1 %v8676_v3 }
 0x55a   :  { %5770 = vmatpush1.bf16.msra.mxu0 %v7086_v63  ;;  %5795 = vmatpush3.bf16.msra.mxu1 %v7126_v20 }
 0x55b   :  { %5772 = vmatprep.subr.bf16.mxu0 %v7090_v1  ;;  %5796 = vmatprep.subr.bf16.mxu1 %v8676_v3 }
 0x55e   :  { %5774 = vmatpush1.bf16.msra.mxu0 %v7110_v13  ;;  %5798 = vmatpush3.bf16.msra.mxu1 %v7140_v25 }
 0x55f   :  { %5800 = vmatprep.subr.bf16.mxu0 %v6909_v5  ;;  %5831 = vmatprep.subr.bf16.mxu1 %v8676_v3 }
 0x614   :  { %v1032_v40 = vpop.f32.mrb[10].mxu0  ;;  %v1103_v41 = vpop.f32.mrb[10].mxu1 }
 0x615   :  { %v1033_v36 = vadd.f32 %v1032_v40, %v7189_v32  ;;  %v1034_v45 = vpop.f32.mrb[11].mxu0  ;;  %v4706_v46 = vpop.f32.mrb[11].mxu1  ;;  %v1104_v60 = vadd.f32 %v1103_v41, %v7206_v58  ;;  %v1481_v40 = vld [vmem:[%s8663_s4] sm:$0xff] }
 0x616   :  { %v1035_v47 = vadd.f32 %v1034_v45, %v7193_v35  ;;  %v1483_v45 = vld [vmem:[%s8663_s4 + $0x10] sm:$0xff]  ;;  %v1486_v46 = vld [vmem:[%s8663_s4 + $0x28] sm:$0xff] }
 0x617   :  { %v1107_v49 = vadd.f32 %v4004_v39, %v1033_v36  ;;  %v1484_v36 = vld [vmem:[%s8663_s4 + $0x18] sm:$0xff] }
 0x618   :  { %v1114_v51 = vadd.f32 %v4005_v50, %v1035_v47  ;;  %v1305_v47 = vpop.permute.xlu0 %1304 }
 0x619   :  { %v4007_v5 = vmul.f32 -1.442695, %v1107_v49  ;;  %vm1306_vm15 = vcmp.eq.s32.totalorder %v1305_v47, 1  ;;  %v1521_v47 = vld [vmem:[%s8663_s4 + $0x140] sm:$0xff] }
 0x61a   :  { %v4008_v52 = vmul.f32 -1.442695, %v1114_v51  ;;  %v1491_v51 = vld [vmem:[%s8663_s4 + $0x50] sm:$0xff] }
 0x61b   :  { %6752 = vpow2.f32 %v4007_v5  ;;  %v1488_v5 = vld [vmem:[%s8663_s4 + $0x38] sm:$0xff] }
 0x61c   :  { %6754 = vpow2.f32 %v4008_v52 }
 0x625   :  { %v6753_v43 = vpop.eup %6752 }
 0x626   :  { %v1111_v54 = vadd.f32 1.0, %v6753_v43  ;;  %v6755_v56 = vpop.eup %6754  ;;  %v7561_v43 = vpack.c.bf16 %v1484_v36, %v1481_v40  ;;  %v1513_v40 = vld [vmem:[%s8663_s4 + $0x100] sm:$0xff]  ;;  %v1516_v36 = vld [vmem:[%s8663_s4 + $0x118] sm:$0xff] }
 0x627   :  { %v1118_v9 = vadd.f32 1.0, %v6755_v56  ;;  %v1487_v56 = vld [vmem:[%s8663_s4 + $0x30] sm:$0xff] }
 0x628   :  { %6756 = vrcp.f32 %v1111_v54  ;;  %v7563_v54 = vpack.c.bf16 %v1486_v46, %v1483_v45  ;;  %v7705_v45 = vpack.c.bf16 %v1516_v36, %v1513_v40  ;;  %v1518_v46 = vld [vmem:[%s8663_s4 + $0x128] sm:$0xff]  ;;  %v1537_v40 = vld [vmem:[%s8664_s5 + $0x40] sm:$0xff] }
 0x629   :  { %6758 = vrcp.f32 %v1118_v9  ;;  %v7568_v9 = vpack.c.bf16 %v1491_v51, %v1488_v5  ;;  %v1520_v5 = vld [vmem:[%s8663_s4 + $0x138] sm:$0xff]  ;;  %v1519_v51 = vld [vmem:[%s8663_s4 + $0x130] sm:$0xff] }
 0x632   :  { %v6757_v61 = vpop.eup %6756 }
 0x633   :  { %v1121_v0 = vmul.f32 %v6757_v61, %v1104_v60  ;;  %v6759_v6 = vpop.eup %6758  ;;  %v1490_v60 = vld [vmem:[%s8663_s4 + $0x48] sm:$0xff]  ;;  %v1489_v61 = vld [vmem:[%s8663_s4 + $0x40] sm:$0xff] }
 0x634   :  { %v1124_v8 = vsub.f32 1.0, %v6759_v6  ;;  %v1126_v18 = vmul.f32 %v6759_v6, %v7430_v37  ;;  %v1497_v6 = vld [vmem:[%s8663_s4 + $0x80] sm:$0xff] }
 0x635   :  { %v1122_v2 = vadd.f32 %v4006_v62, %v1121_v0  ;;  %v1492_v62 = vld [vmem:[%s8663_s4 + $0x58] sm:$0xff] }
 0x637   :  { %6760 = vtanh.f32 %v1122_v2  ;;  %v1494_v2 = vld [vmem:[%s8663_s4 + $0x68] sm:$0xff] }
 0x641   :  { %v6761_v12 = vpop.eup %6760 }
 0x642   :  { %v1125_v14 = vmul.f32 %v6761_v12, %v1124_v8  ;;  %v7592_v8 = vpack.c.bf16 %v1490_v60, %v1487_v56  ;;  %v7594_v12 = vpack.c.bf16 %v1492_v62, %v1489_v61  ;;  %v1522_v56 = vld [vmem:[%s8663_s4 + $0x148] sm:$0xff]  ;;  %v1524_v61 = vld [vmem:[%s8663_s4 + $0x158] sm:$0xff]  ;;  %v1527_v62 = vld [vmem:[%s8663_s4 + $0x170] sm:$0xff] }
 0x643   :  { %v7733_v60 = vpack.c.bf16 %v1522_v56, %v1519_v51  ;;  %v1541_v56 = vld [vmem:[%s8664_s5 + $0x60] sm:$0xff] }
 0x644   :  { %v1127_v21 = vadd.f32 %v1126_v18, %v1125_v14  ;;  %v1493_v14 = vld [vmem:[%s8663_s4 + $0x60] sm:$0xff]  ;;  %v7601_v18 = vpack.c.bf16 %v1497_v6, %v1494_v2  ;;  %v7743_v2 = vpack.c.bf16 %v1527_v62, %v1524_v61  ;;  %v1523_v6 = vld [vmem:[%s8663_s4 + $0x150] sm:$0xff]  ;;  %v1544_v61 = vld [vmem:[%s8664_s5 + $0x78] sm:$0xff] }
 0x645   :  { %v1543_v62 = vld [vmem:[%s8664_s5 + $0x70] sm:$0xff] }
 0x646   :  { %v7483_v24 = vsel %vm1133_vm14, %v1127_v21, %v7430_v37  ;;  %v1495_v21 = vld [vmem:[%s8663_s4 + $0x70] sm:$0xff]  ;;  %8738 = vst [vmem:[#allocation12_spill] sm:$0xff] %v7743_v2 }
 0x647   :  { %1204 = vmatmul.mubr.f32.vlgmr.msra.gmra.mrb[12].mxu0 %v7483_v24  ;;  %4740 = vmatmul.mubr.f32.vlgmr.msra.gmra.mrb[12].mxu1 %v7483_v24 }
 0x648   :  { %5802 = vmatpush1.bf16.msra.mxu0 %v6923_v10  ;;  %5833 = vmatpush3.bf16.msra.mxu1 %v6983_v30  ;;  %v1482_v10 = vld [vmem:[%s8663_s4 + $0x8] sm:$0xff] }
 0x649   :  { %5804 = vmatprep.subr.bf16.mxu0 %v6925_v11  ;;  %5834 = vmatprep.subr.bf16.mxu1 %v8676_v3  ;;  %v1485_v11 = vld [vmem:[%s8663_s4 + $0x20] sm:$0xff] }
 0x64a   :  { %1376 = vmatprep.mubr.f32.mxu0 %v8674_v4  ;;  %4774 = vmatprep.mubr.msk.f32.mxu1 %vm6845_vm0, %v8674_v4 }
 0x64c   :  { %5806 = vmatpush1.bf16.msra.mxu0 %v6942_v16  ;;  %5836 = vmatpush3.bf16.msra.mxu1 %v7007_v38  ;;  %v7527_v16 = vpack.c.bf16 %v1485_v11, %v1482_v10  ;;  %v1500_v10 = vld [vmem:[%s8663_s4 + $0x98] sm:$0xff]  ;;  %v1503_v11 = vld [vmem:[%s8663_s4 + $0xb0] sm:$0xff] }
 0x64d   :  { %5808 = vmatprep.subr.bf16.mxu0 %v6945_v17  ;;  %5837 = vmatprep.subr.bf16.mxu1 %v8676_v3  ;;  %v4009_v17 = vld [vmem:[%s8662_s0 + $0x90] sm:$0xff] }
 0x64e   :  { %8728 = vst [vmem:[#allocation2_spill] sm:$0xff] %v7527_v16 }
 0x650   :  { %5810 = vmatpush1.bf16.msra.mxu0 %v6960_v22  ;;  %5839 = vmatpush3.bf16.msra.mxu1 %v7040_v48 }
 0x651   :  { %5812 = vmatprep.subr.bf16.mxu0 %v6963_v23  ;;  %5840 = vmatprep.subr.bf16.mxu1 %v8676_v3 }
 0x654   :  { %5814 = vmatpush1.bf16.msra.mxu0 %v6992_v33  ;;  %5842 = vmatpush3.bf16.msra.mxu1 %v7072_v59 }
 0x655   :  { %5816 = vmatprep.subr.bf16.mxu0 %v6995_v34  ;;  %5843 = vmatprep.subr.bf16.mxu1 %v8676_v3 }
 0x658   :  { %5818 = vmatpush1.bf16.msra.mxu0 %v7020_v42  ;;  %5845 = vmatpush3.bf16.msra.mxu1 %v7099_v7 }
 0x659   :  { %5820 = vmatprep.subr.bf16.mxu0 %v7028_v44  ;;  %5846 = vmatprep.subr.bf16.mxu1 %v8676_v3  ;;  %v4010_v44 = vld [vmem:[%s8662_s0 + $0x98] sm:$0xff] }
 0x65c   :  { %5822 = vmatpush1.bf16.msra.mxu0 %v7056_v53  ;;  %5848 = vmatpush3.bf16.msra.mxu1 %v7115_v15 }
 0x65d   :  { %5824 = vmatprep.subr.bf16.mxu0 %v7060_v55  ;;  %5849 = vmatprep.subr.bf16.mxu1 %v8676_v3 }
 0x660   :  { %5826 = vmatpush1.bf16.msra.mxu0 %v7086_v63  ;;  %5851 = vmatpush3.bf16.msra.mxu1 %v7126_v20  ;;  %v4011_v20 = vld [vmem:[%s8662_s0 + $0xa0] sm:$0xff] }
 0x661   :  { %5828 = vmatprep.subr.bf16.mxu0 %v7090_v1  ;;  %5852 = vmatprep.subr.bf16.mxu1 %v8676_v3 }
 0x664   :  { %5830 = vmatpush1.bf16.msra.mxu0 %v7110_v13  ;;  %5854 = vmatpush3.bf16.msra.mxu1 %v7140_v25 }
 0x665   :  { %5887 = vmatprep.subr.bf16.mxu1 %v8676_v3  ;;  %5856 = vmatprep.subr.bf16.mxu0 %v7527_v16 }
 0x71a   :  { %v1205_v22 = vpop.f32.mrb[12].mxu0  ;;  %v1276_v23 = vpop.f32.mrb[12].mxu1 }
 0x71b   :  { %v1206_v30 = vadd.f32 %v1205_v22, %v7189_v32  ;;  %v1207_v33 = vpop.f32.mrb[13].mxu0  ;;  %v4741_v34 = vpop.f32.mrb[13].mxu1  ;;  %v1277_v13 = vadd.f32 %v1276_v23, %v7206_v58  ;;  %v7629_v23 = vpack.c.bf16 %v1503_v11, %v1500_v10  ;;  %v7761_v10 = vand.u32 127, %v83_v26  ;;  %v1529_v26 = vld [vmem:[%s8664_s5] sm:$0xff] }
 0x71c   :  { %v1208_v38 = vadd.f32 %v1207_v33, %v7193_v35  ;;  %v1502_v33 = vld [vmem:[%s8663_s4 + $0xa8] sm:$0xff]  ;;  %v1501_v34 = vld [vmem:[%s8663_s4 + $0xa0] sm:$0xff] }
 0x71d   :  { %v1280_v42 = vadd.f32 %v4009_v17, %v1206_v30  ;;  %v7623_v17 = vpack.c.bf16 %v1496_v19, %v1493_v14  ;;  %8730 = vst [vmem:[#allocation4_spill] sm:$0xff] %v7629_v23  ;;  %v1499_v30 = vld [vmem:[%s8663_s4 + $0x90] sm:$0xff]  ;;  %v1526_v14 = vld [vmem:[%s8663_s4 + $0x168] sm:$0xff]  ;;  %v1525_v19 = vld [vmem:[%s8663_s4 + $0x160] sm:$0xff]  ;;  %vm1619_vm1 = vcmp.eq.s32.totalorder %v7761_v10, 2 }
 0x71e   :  { %v1287_v53 = vadd.f32 %v4010_v44, %v1208_v38  ;;  %v7644_v38 = vpack.c.bf16 %v1502_v33, %v1499_v30  ;;  %v1530_v30 = vld [vmem:[%s8664_s5 + $0x8] sm:$0xff]  ;;  %v1533_v33 = vld [vmem:[%s8664_s5 + $0x20] sm:$0xff] }
 0x71f   :  { %v4012_v48 = vmul.f32 -1.442695, %v1280_v42  ;;  %8729 = vst [vmem:[#allocation3_spill] sm:$0xff] %v7623_v17  ;;  %v1504_v42 = vld [vmem:[%s8663_s4 + $0xb8] sm:$0xff] }
 0x720   :  { %v4013_v55 = vmul.f32 -1.442695, %v1287_v53  ;;  %8731 = vst [vmem:[#allocation5_spill] sm:$0xff] %v7644_v38  ;;  %v7649_v44 = vpack.c.bf16 %v1504_v42, %v1501_v34  ;;  %v1509_v53 = vld [vmem:[%s8663_s4 + $0xe0] sm:$0xff]  ;;  %v7774_v34 = vpack.c.bf16 %v1533_v33, %v1530_v30  ;;  %v1532_v42 = vld [vmem:[%s8664_s5 + $0x18] sm:$0xff]  ;;  %v1551_v30 = vld [vmem:[%s8664_s5 + $0xb0] sm:$0xff] }
 0x721   :  { %6762 = vpow2.f32 %v4012_v48  ;;  %v1506_v48 = vld [vmem:[%s8663_s4 + $0xc8] sm:$0xff] }
 0x722   :  { %6764 = vpow2.f32 %v4013_v55  ;;  %v7659_v55 = vpack.c.bf16 %v1509_v53, %v1506_v48  ;;  %8740 = vst [vmem:[#allocation14_spill] sm:$0xff] %v7774_v34  ;;  %v1531_v48 = vld [vmem:[%s8664_s5 + $0x10] sm:$0xff]  ;;  %v7786_v53 = vpack.c.bf16 %v1532_v42, %v1529_v26  ;;  %v1550_v42 = vld [vmem:[%s8664_s5 + $0xa8] sm:$0xff] }
 0x723   :  { %v1547_v26 = vld [vmem:[%s8664_s5 + $0x90] sm:$0xff] }
 0x724   :  { %8732 = vst [vmem:[#allocation6_spill] sm:$0xff] %v7659_v55 }
 0x72b   :  { %v6763_v59 = vpop.eup %6762 }
 0x72c   :  { %v1284_v63 = vadd.f32 1.0, %v6763_v59  ;;  %v6765_v1 = vpop.eup %6764  ;;  %v1505_v59 = vld [vmem:[%s8663_s4 + $0xc0] sm:$0xff] }
 0x72d   :  { %v1291_v7 = vadd.f32 1.0, %v6765_v1  ;;  %v1507_v1 = vld [vmem:[%s8663_s4 + $0xd0] sm:$0xff] }
 0x72e   :  { %6766 = vrcp.f32 %v1284_v63  ;;  %v1508_v63 = vld [vmem:[%s8663_s4 + $0xd8] sm:$0xff] }
 0x72f   :  { %6768 = vrcp.f32 %v1291_v7  ;;  %v7671_v7 = vpack.c.bf16 %v1508_v63, %v1505_v59  ;;  %v1534_v59 = vld [vmem:[%s8664_s5 + $0x28] sm:$0xff] }
 0x730   :  { %v7793_v63 = vpack.c.bf16 %v1534_v59, %v1531_v48  ;;  %v1549_v48 = vld [vmem:[%s8664_s5 + $0xa0] sm:$0xff]  ;;  %v7876_v59 = vpack.c.bf16 %v1550_v42, %v1547_v26  ;;  %v1562_v42 = vld [vmem:[%s8664_s5 + $0x108] sm:$0xff] }
 0x731   :  { %8733 = vst [vmem:[#allocation7_spill] sm:$0xff] %v7671_v7 }
 0x738   :  { %v6767_v15 = vpop.eup %6766 }
 0x739   :  { %v1294_v25 = vmul.f32 %v6767_v15, %v1277_v13  ;;  %v6769_v37 = vpop.eup %6768  ;;  %v1510_v13 = vld [vmem:[%s8663_s4 + $0xe8] sm:$0xff] }
 0x73a   :  { %v1297_v39 = vsub.f32 1.0, %v6769_v37  ;;  %v1299_v50 = vmul.f32 %v6769_v37, %v7483_v24  ;;  %v7677_v15 = vpack.c.bf16 %v1510_v13, %v1507_v1  ;;  %v1511_v37 = vld [vmem:[%s8663_s4 + $0xf0] sm:$0xff]  ;;  %v8669_v1 = vmov 1.0   ;;  %v1536_v13 = vld [vmem:[%s8664_s5 + $0x38] sm:$0xff] }
 0x73b   :  { %v1295_v29 = vadd.f32 %v4011_v20, %v1294_v25  ;;  %v1512_v20 = vld [vmem:[%s8663_s4 + $0xf8] sm:$0xff]  ;;  %v1515_v25 = vld [vmem:[%s8663_s4 + $0x110] sm:$0xff] }
 0x73d   :  { %6770 = vtanh.f32 %v1295_v29  ;;  %v7687_v29 = vpack.c.bf16 %v1515_v25, %v1512_v20  ;;  %v1539_v20 = vld [vmem:[%s8664_s5 + $0x50] sm:$0xff] }
 0x73e   :  { %v7805_v25 = vpack.c.bf16 %v1539_v20, %v1536_v13  ;;  %v1552_v13 = vld [vmem:[%s8664_s5 + $0xb8] sm:$0xff] }
 0x73f   :  { %8734 = vst [vmem:[#allocation8_spill] sm:$0xff] %v7687_v29  ;;  %v7882_v20 = vpack.c.bf16 %v1552_v13, %v1549_v48  ;;  %v1561_v48 = vld [vmem:[%s8664_s5 + $0x100] sm:$0xff]  ;;  %v1564_v13 = vld [vmem:[%s8664_s5 + $0x118] sm:$0xff] }
 0x747   :  { %v6771_v41 = vpop.eup %6770 }
 0x748   :  { %v1298_v49 = vmul.f32 %v6771_v41, %v1297_v39  ;;  %v1514_v39 = vld [vmem:[%s8663_s4 + $0x108] sm:$0xff] }
 0x749   :  { %v7699_v41 = vpack.c.bf16 %v1514_v39, %v1511_v37  ;;  %v1535_v37 = vld [vmem:[%s8664_s5 + $0x30] sm:$0xff]  ;;  %v1538_v39 = vld [vmem:[%s8664_s5 + $0x48] sm:$0xff] }
 0x74a   :  { %v1300_v52 = vadd.f32 %v1299_v50, %v1298_v49  ;;  %v7715_v49 = vpack.c.bf16 %v1521_v47, %v1518_v46  ;;  %v1517_v50 = vld [vmem:[%s8663_s4 + $0x120] sm:$0xff]  ;;  %v7817_v36 = vpack.c.bf16 %v1538_v39, %v1535_v37  ;;  %v1540_v46 = vld [vmem:[%s8664_s5 + $0x58] sm:$0xff]  ;;  %v1554_v37 = vld [vmem:[%s8664_s5 + $0xc8] sm:$0xff] }
 0x74b   :  { %8735 = vst [vmem:[#allocation9_spill] sm:$0xff] %v7699_v41  ;;  %v7824_v47 = vpack.c.bf16 %v1540_v46, %v1537_v40  ;;  %v1557_v39 = vld [vmem:[%s8664_s5 + $0xe0] sm:$0xff] }
 0x74c   :  { %v7580_v0 = vsel %vm1306_vm15, %v1300_v52, %v7483_v24  ;;  %v1498_v24 = vld [vmem:[%s8663_s4 + $0x88] sm:$0xff]  ;;  %8736 = vst [vmem:[#allocation10_spill] sm:$0xff] %v7715_v49  ;;  %v7727_v52 = vpack.c.bf16 %v1520_v5, %v1517_v50  ;;  %v1545_v5 = vld [vmem:[%s8664_s5 + $0x80] sm:$0xff]  ;;  %v7892_v40 = vpack.c.bf16 %v1557_v39, %v1554_v37  ;;  %v7936_v39 = vpack.c.bf16 %v1564_v13, %v1561_v48  ;;  %v1575_v48 = vld [vmem:[%s8664_s5 + $0x170] sm:$0xff] }
 0x74d   :  { %1377 = vmatmul.mubr.f32.vlgmr.msra.gmra.mrb[14].mxu0 %v7580_v0  ;;  %4775 = vmatmul.mubr.f32.vlgmr.msra.gmra.mrb[14].mxu1 %v7580_v0  ;;  %v7625_v22 = vpack.c.bf16 %v1498_v24, %v1495_v21  ;;  %v7755_v21 = vpack.c.bf16 %v1526_v14, %v1523_v6  ;;  %v1528_v24 = vld [vmem:[%s8663_s4 + $0x178] sm:$0xff]  ;;  %v1542_v50 = vld [vmem:[%s8664_s5 + $0x68] sm:$0xff]  ;;  %v7848_v6 = vpack.c.bf16 %v1544_v61, %v1541_v56  ;;  %v1553_v46 = vld [vmem:[%s8664_s5 + $0xc0] sm:$0xff] }
 0x74e   :  { %5858 = vmatpush1.bf16.msra.mxu0 %v7561_v43  ;;  %5889 = vmatpush3.bf16.msra.mxu1 %v7563_v54  ;;  %8737 = vst [vmem:[#allocation11_spill] sm:$0xff] %v7727_v52  ;;  %v7764_v11 = vpack.c.bf16 %v1528_v24, %v1525_v19  ;;  %v7836_v51 = vpack.c.bf16 %v1545_v5, %v1542_v50  ;;  %v1546_v14 = vld [vmem:[%s8664_s5 + $0x88] sm:$0xff]  ;;  %v1548_v24 = vld [vmem:[%s8664_s5 + $0x98] sm:$0xff]  ;;  %v1555_v5 = vld [vmem:[%s8664_s5 + $0xd0] sm:$0xff] }
 0x74f   :  { %5860 = vmatprep.subr.bf16.mxu0 %v7568_v9  ;;  %5890 = vmatprep.subr.bf16.mxu1 %v8676_v3  ;;  %8739 = vst [vmem:[#allocation13_spill] sm:$0xff] %v7755_v21  ;;  %v7854_v19 = vpack.c.bf16 %v1546_v14, %v1543_v62  ;;  %v7864_v33 = vpack.c.bf16 %v1551_v30, %v1548_v24  ;;  %v1556_v50 = vld [vmem:[%s8664_s5 + $0xd8] sm:$0xff]  ;;  %v1558_v61 = vld [vmem:[%s8664_s5 + $0xe8] sm:$0xff]  ;;  %v1563_v24 = vld [vmem:[%s8664_s5 + $0x110] sm:$0xff] }
 0x750   :  { %1686 = vmatprep.mubr.f32.mxu0 %v8674_v4  ;;  %4809 = vmatprep.mubr.msk.f32.mxu1 %vm6845_vm0, %v8674_v4  ;;  %v7904_v56 = vpack.c.bf16 %v1556_v50, %v1553_v46  ;;  %v7910_v62 = vpack.c.bf16 %v1558_v61, %v1555_v5  ;;  %v1560_v14 = vld [vmem:[%s8664_s5 + $0xf8] sm:$0xff]  ;;  %v1559_v30 = vld [vmem:[%s8664_s5 + $0xf0] sm:$0xff]  ;;  %v1566_v46 = vld [vmem:[%s8664_s5 + $0x128] sm:$0xff] }
 0x751   :  { %v7921_v26 = vpack.c.bf16 %v1563_v24, %v1560_v14  ;;  %v7934_v37 = vpack.c.bf16 %v1562_v42, %v1559_v30  ;;  %v1569_v50 = vld [vmem:[%s8664_s5 + $0x140] sm:$0xff]  ;;  %v1568_v14 = vld [vmem:[%s8664_s5 + $0x138] sm:$0xff]  ;;  %v1567_v24 = vld [vmem:[%s8664_s5 + $0x130] sm:$0xff] }
 0x752   :  { %5862 = vmatpush1.bf16.msra.mxu0 %v7592_v8  ;;  %5892 = vmatpush3.bf16.msra.mxu1 %v7594_v12  ;;  %v1565_v5 = vld [vmem:[%s8664_s5 + $0x120] sm:$0xff]  ;;  %v7949_v61 = vpack.c.bf16 %v1569_v50, %v1566_v46  ;;  %v1570_v30 = vld [vmem:[%s8664_s5 + $0x148] sm:$0xff]  ;;  %v1572_v42 = vld [vmem:[%s8664_s5 + $0x158] sm:$0xff] }
 0x753   :  { %5864 = vmatprep.subr.bf16.mxu0 %v7601_v18  ;;  %5893 = vmatprep.subr.bf16.mxu1 %v8676_v3  ;;  %v7968_v13 = vpack.c.bf16 %v1568_v14, %v1565_v5  ;;  %v7970_v46 = vpack.c.bf16 %v1570_v30, %v1567_v24  ;;  %v1571_v50 = vld [vmem:[%s8664_s5 + $0x150] sm:$0xff]  ;;  %v1573_v5 = vld [vmem:[%s8664_s5 + $0x160] sm:$0xff]  ;;  %v1576_v14 = vld [vmem:[%s8664_s5 + $0x178] sm:$0xff] }
 0x754   :  { %v7990_v24 = vpack.c.bf16 %v1574_v57, %v1571_v50  ;;  %v7992_v30 = vpack.c.bf16 %v1576_v14, %v1573_v5 }
 0x755   :  { %8741 = vst [vmem:[#allocation15_spill] sm:$0xff] %v7968_v13  ;;  %8742 = vst [vmem:[#allocation16_spill] sm:$0xff] %v7970_v46 }
 0x756   :  { %5866 = vmatpush1.bf16.msra.mxu0 %v7623_v17  ;;  %5895 = vmatpush3.bf16.msra.mxu1 %v7625_v22  ;;  %8744 = vst [vmem:[#allocation18_spill] sm:$0xff] %v7990_v24  ;;  %8745 = vst [vmem:[#allocation19_spill] sm:$0xff] %v7992_v30 }
 0x757   :  { %5868 = vmatprep.subr.bf16.mxu0 %v7629_v23  ;;  %5896 = vmatprep.subr.bf16.mxu1 %v8676_v3 }
 0x75a   :  { %5870 = vmatpush1.bf16.msra.mxu0 %v7644_v38  ;;  %5898 = vmatpush3.bf16.msra.mxu1 %v7649_v44 }
 0x75b   :  { %5899 = vmatprep.subr.bf16.mxu1 %v8676_v3  ;;  %5872 = vmatprep.subr.bf16.mxu0 %v7659_v55 }
 0x75e   :  { %5874 = vmatpush1.bf16.msra.mxu0 %v7671_v7  ;;  %5901 = vmatpush3.bf16.msra.mxu1 %v7677_v15 }
 0x75f   :  { %5902 = vmatprep.subr.bf16.mxu1 %v8676_v3  ;;  %5876 = vmatprep.subr.bf16.mxu0 %v7687_v29 }
 0x762   :  { %5878 = vmatpush1.bf16.msra.mxu0 %v7699_v41  ;;  %5904 = vmatpush3.bf16.msra.mxu1 %v7705_v45 }
 0x763   :  { %5905 = vmatprep.subr.bf16.mxu1 %v8676_v3  ;;  %5880 = vmatprep.subr.bf16.mxu0 %v7715_v49 }
 0x766   :  { %5882 = vmatpush1.bf16.msra.mxu0 %v7727_v52  ;;  %5907 = vmatpush3.bf16.msra.mxu1 %v7733_v60 }
 0x767   :  { %5908 = vmatprep.subr.bf16.mxu1 %v8676_v3  ;;  %5884 = vmatprep.subr.bf16.mxu0 %v7743_v2 }
 0x76a   :  { %5886 = vmatpush1.bf16.msra.mxu0 %v7755_v21  ;;  %5910 = vmatpush3.bf16.msra.mxu1 %v7764_v11 }
 0x76b   :  { %5943 = vmatprep.subr.bf16.mxu1 %v8676_v3  ;;  %5912 = vmatprep.subr.bf16.mxu0 %v7774_v34 }
 0x76d   :  { %4021 = vmatmul.mubr.msk.f32.vlgmr.msra.gmra.mrb[16].mxu0 %vm1619_vm1, %v8669_v1  ;;  %4810 = vmatmul.mubr.msk.f32.vlgmr.msra.gmra.mrb[16].mxu1 %vm1619_vm1, %v8669_v1  ;;  %v7977_v1 = vpack.c.bf16 %v1575_v48, %v1572_v42  ;;  %v4014_v42 = vld [vmem:[%s8662_s0 + $0xa8] sm:$0xff] }
 0x76e   :  { %5914 = vmatpush1.bf16.msra.mxu0 %v7786_v53  ;;  %5945 = vmatpush3.bf16.msra.mxu1 %v7793_v63 }
 0x76f   :  { %5946 = vmatprep.subr.bf16.mxu1 %v8676_v3  ;;  %1827 = vmatprep.mubr.f32.mxu0 %v8674_v4  ;;  %8743 = vst [vmem:[#allocation17_spill] sm:$0xff] %v7977_v1 }
 0x770   :  { %5916 = vmatprep.subr.bf16.mxu0 %v7805_v25  ;;  %4844 = vmatprep.mubr.msk.f32.mxu1 %vm6845_vm0, %v8674_v4  ;;  %v4015_v4 = vld [vmem:[%s8662_s0 + $0xb0] sm:$0xff] }
 0x772   :  { %5918 = vmatpush1.bf16.msra.mxu0 %v7817_v36  ;;  %5948 = vmatpush3.bf16.msra.mxu1 %v7824_v47 }
 0x773   :  { %5949 = vmatprep.subr.bf16.mxu1 %v8676_v3  ;;  %5920 = vmatprep.subr.bf16.mxu0 %v7836_v51 }
 0x776   :  { %5922 = vmatpush1.bf16.msra.mxu0 %v7848_v6  ;;  %5951 = vmatpush3.bf16.msra.mxu1 %v7854_v19 }
 0x777   :  { %5952 = vmatprep.subr.bf16.mxu1 %v8676_v3  ;;  %5924 = vmatprep.subr.bf16.mxu0 %v7864_v33 }
 0x77a   :  { %5926 = vmatpush1.bf16.msra.mxu0 %v7876_v59  ;;  %5954 = vmatpush3.bf16.msra.mxu1 %v7882_v20 }
 0x77b   :  { %5955 = vmatprep.subr.bf16.mxu1 %v8676_v3  ;;  %5928 = vmatprep.subr.bf16.mxu0 %v7892_v40 }
 0x77e   :  { %5930 = vmatpush1.bf16.msra.mxu0 %v7904_v56  ;;  %5957 = vmatpush3.bf16.msra.mxu1 %v7910_v62 }
 0x77f   :  { %5932 = vmatprep.subr.bf16.mxu0 %v7921_v26  ;;  %5958 = vmatprep.subr.bf16.mxu1 %v8676_v3 }
 0x782   :  { %5934 = vmatpush1.bf16.msra.mxu0 %v7934_v37  ;;  %5960 = vmatpush3.bf16.msra.mxu1 %v7936_v39 }
 0x783   :  { %5936 = vmatprep.subr.bf16.mxu0 %v7949_v61  ;;  %5961 = vmatprep.subr.bf16.mxu1 %v8676_v3 }
 0x786   :  { %5938 = vmatpush1.bf16.msra.mxu0 %v7968_v13  ;;  %5963 = vmatpush3.bf16.msra.mxu1 %v7970_v46 }
 0x787   :  { %5940 = vmatprep.subr.bf16.mxu0 %v7977_v1  ;;  %5964 = vmatprep.subr.bf16.mxu1 %v8676_v3 }
 0x78a   :  { %5942 = vmatpush1.bf16.msra.mxu0 %v7990_v24  ;;  %5966 = vmatpush3.bf16.msra.mxu1 %v7992_v30 }
 0x78b   :  { %5967 = vmatprep.subr.bf16.mxu0 %v8676_v3  ;;  %5992 = vmatprep.subr.bf16.mxu1 %v7527_v16 }
 0x820   :  { %v1378_v57 = vpop.f32.mrb[14].mxu0  ;;  %v1449_v48 = vpop.f32.mrb[14].mxu1 }
 0x821   :  { %v1379_v50 = vadd.f32 %v1378_v57, %v7189_v32  ;;  %v1380_v5 = vpop.f32.mrb[15].mxu0  ;;  %v4776_v14 = vpop.f32.mrb[15].mxu1  ;;  %v1450_v32 = vadd.f32 %v1449_v48, %v7206_v58  ;;  %v1595_v48 = vld [vmem:[%s8665_s7 + $0x8] sm:$0xff] }
 0x822   :  { %v1381_v31 = vadd.f32 %v1380_v5, %v7193_v35  ;;  %v4016_v35 = vld [vmem:[%s8662_s0 + $0xb8] sm:$0xff]  ;;  %v8747_v14 = vmov 0.0|0.0  }
 0x823   :  { %v1453_v28 = vadd.f32 %v4014_v42, %v1379_v50 }
 0x824   :  { %v1460_v30 = vadd.f32 %v4015_v4, %v1381_v31  ;;  %v1478_v31 = vpop.permute.xlu1 %1477 }
 0x825   :  { %v4017_v3 = vmul.f32 -1.442695, %v1453_v28  ;;  %vm1479_vm2 = vcmp.eq.s32.totalorder %v1478_v31, 1 }
 0x826   :  { %v4018_v16 = vmul.f32 -1.442695, %v1460_v30  ;;  %v1594_v30 = vld [vmem:[%s8665_s7] sm:$0xff] }
 0x827   :  { %6772 = vpow2.f32 %v4017_v3  ;;  %v8045_v5 = vpack.c.bf16 %v1595_v48, %v1594_v30  ;;  %v1605_v30 = vld [vmem:[%s8665_s7 + $0x58] sm:$0xff] }
 0x828   :  { %6774 = vpow2.f32 %v4018_v16 }
 0x831   :  { %v6773_v24 = vpop.eup %6772 }
 0x832   :  { %v1457_v1 = vadd.f32 1.0, %v6773_v24  ;;  %v6775_v46 = vpop.eup %6774 }
 0x833   :  { %v1464_v13 = vadd.f32 1.0, %v6775_v46  ;;  %v8746_v46 = vmov 0.0  }
 0x834   :  { %6776 = vrcp.f32 %v1457_v1 }
 0x835   :  { %6778 = vrcp.f32 %v1464_v13 }
 0x83e   :  { %v6777_v57 = vpop.eup %6776 }
 0x83f   :  { %v1467_v42 = vmul.f32 %v6777_v57, %v1450_v32  ;;  %v6779_v4 = vpop.eup %6778  ;;  %v1596_v32 = vld [vmem:[%s8665_s7 + $0x10] sm:$0xff]  ;;  %v1597_v57 = vld [vmem:[%s8665_s7 + $0x18] sm:$0xff] }
 0x840   :  { %v1470_v3 = vsub.f32 1.0, %v6779_v4  ;;  %v1472_v1 = vmul.f32 %v6779_v4, %v7580_v0 }
 0x841   :  { %v1468_v50 = vadd.f32 %v4016_v35, %v1467_v42  ;;  %v8055_v35 = vpack.c.bf16 %v1597_v57, %v1596_v32  ;;  %v1598_v42 = vld [vmem:[%s8665_s7 + $0x20] sm:$0xff]  ;;  %v1607_v57 = vld [vmem:[%s8665_s7 + $0x68] sm:$0xff] }
 0x842   :  { %v1606_v32 = vld [vmem:[%s8665_s7 + $0x60] sm:$0xff] }
 0x843   :  { %6780 = vtanh.f32 %v1468_v50  ;;  %v1599_v50 = vld [vmem:[%s8665_s7 + $0x28] sm:$0xff] }
 0x844   :  { %v8065_v4 = vpack.c.bf16 %v1599_v50, %v1598_v42  ;;  %v8104_v42 = vpack.c.bf16 %v1607_v57, %v1606_v32  ;;  %v1608_v50 = vld [vmem:[%s8665_s7 + $0x70] sm:$0xff]  ;;  %v8756_v57 = vsub.s32 1, %v7180_v27 }
 0x846   :  { %8748 = vst [vmem:[#allocation20_spill] sm:$0xff] %v8065_v4  ;;  %8752 = vst [vmem:[#allocation24_spill] sm:$0xff] %v8104_v42 }
 0x84d   :  { %v6781_v28 = vpop.eup %6780 }
 0x84e   :  { %v1471_v16 = vmul.f32 %v6781_v28, %v1470_v3  ;;  %v1600_v3 = vld [vmem:[%s8665_s7 + $0x30] sm:$0xff]  ;;  %v1601_v28 = vld [vmem:[%s8665_s7 + $0x38] sm:$0xff] }
 0x84f   :  { %v8075_v31 = vpack.c.bf16 %v1601_v28, %v1600_v3  ;;  %v1609_v3 = vld [vmem:[%s8665_s7 + $0x78] sm:$0xff] }
 0x850   :  { %v1473_v24 = vadd.f32 %v1472_v1, %v1471_v16  ;;  %v1602_v16 = vld [vmem:[%s8665_s7 + $0x40] sm:$0xff]  ;;  %v1603_v1 = vld [vmem:[%s8665_s7 + $0x48] sm:$0xff]  ;;  %v8114_v28 = vpack.c.bf16 %v1609_v3, %v1608_v50 }
 0x851   :  { %8749 = vst [vmem:[#allocation21_spill] sm:$0xff] %v8075_v31 }
 0x852   :  { %v8014_v58 = vsel %vm1479_vm2, %v1473_v24, %v7580_v0  ;;  %v8037_v0 = vpop.f32.mrb[16].mxu1  ;;  %v8085_v24 = vpack.c.bf16 %v1603_v1, %v1602_v16  ;;  %8753 = vst [vmem:[#allocation25_spill] sm:$0xff] %v8114_v28  ;;  %v1577_v16 = vld [vmem:[%s8666_s6] sm:$0x7]  ;;  %v8754_v1 = vsub.s32 0, %v7180_v27 }
 0x853   :  { %1828 = vmatmul.mubr.f32.vlgmr.msra.gmra.mrb[16].mxu0 %v8014_v58  ;;  %4845 = vmatmul.mubr.f32.vlgmr.msra.gmra.mrb[18].mxu1 %v8014_v58  ;;  %v4811_v13 = vpop.f32.mrb[17].mxu1  ;;  %v8128_v50 = vrot.slane %v1577_v16, %v8756_v57 }
 0x854   :  { %4879 = vmatprep.mubr.msk.f32.mxu0 %vm6845_vm0, %v8746_v46  ;;  %5994 = vmatpush1.bf16.msra.mxu1 %v7561_v43  ;;  %8750 = vst [vmem:[#allocation22_spill] sm:$0xff] %v8085_v24  ;;  %v1604_v13 = vld [vmem:[%s8665_s7 + $0x50] sm:$0xff] }
 0x855   :  { %5996 = vmatprep.subr.bf16.mxu1 %v7568_v9  ;;  %2081 = vmatprep.mubr.f32.mxu1 %v8746_v46  ;;  %v8095_v48 = vpack.c.bf16 %v1605_v30, %v1604_v13  ;;  %v8124_v13 = vrot.slane %v1577_v16, %v8754_v1 }
 0x856   :  { %5969 = vmatpush3.bf16.msra.mxu0 %v8045_v5 }
 0x857   :  { %5970 = vmatprep.subr.bf16.mxu0 %v8747_v14  ;;  %8751 = vst [vmem:[#allocation23_spill] sm:$0xff] %v8095_v48  ;;  %8755 = vst [vmem:[#allocation26_spill] sm:$0xff] %v8124_v13 }
 0x858   :  { %5998 = vmatpush1.bf16.msra.mxu1 %v7592_v8 }
 0x859   :  { %6000 = vmatprep.subr.bf16.mxu1 %v7601_v18 }
 0x85a   :  { %5972 = vmatpush3.bf16.msra.mxu0 %v8055_v35 }
 0x85b   :  { %5973 = vmatprep.subr.bf16.mxu0 %v8747_v14 }
 0x85c   :  { %6002 = vmatpush1.bf16.msra.mxu1 %v7623_v17 }
 0x85d   :  { %6004 = vmatprep.subr.bf16.mxu1 %v7629_v23 }
 0x85e   :  { %5975 = vmatpush3.bf16.msra.mxu0 %v8065_v4 }
 0x85f   :  { %5976 = vmatprep.subr.bf16.mxu0 %v8747_v14 }
 0x860   :  { %6006 = vmatpush1.bf16.msra.mxu1 %v7644_v38 }
 0x861   :  { %6008 = vmatprep.subr.bf16.mxu1 %v7659_v55 }
 0x862   :  { %5978 = vmatpush3.bf16.msra.mxu0 %v8075_v31 }
 0x863   :  { %5979 = vmatprep.subr.bf16.mxu0 %v8747_v14 }
 0x864   :  { %6010 = vmatpush1.bf16.msra.mxu1 %v7671_v7 }
 0x865   :  { %6012 = vmatprep.subr.bf16.mxu1 %v7687_v29 }
 0x866   :  { %5981 = vmatpush3.bf16.msra.mxu0 %v8085_v24 }
 0x867   :  { %5982 = vmatprep.subr.bf16.mxu0 %v8747_v14 }
 0x868   :  { %6014 = vmatpush1.bf16.msra.mxu1 %v7699_v41  ;;  %v8757_v41 = vsub.s32 2, %v7180_v27  ;;  %v8163_v27 = vld [vmem:[%s8667_s8] ss:$0 sm:$0xff] }
 0x869   :  { %6016 = vmatprep.subr.bf16.mxu1 %v7715_v49 }
 0x86a   :  { %5984 = vmatpush3.bf16.msra.mxu0 %v8095_v48  ;;  %v8134_v48 = vrot.slane %v1577_v16, %v8757_v41 }
 0x86b   :  { %5985 = vmatprep.subr.bf16.mxu0 %v8747_v14 }
 0x86c   :  { %6018 = vmatpush1.bf16.msra.mxu1 %v7727_v52 }
 0x86d   :  { %6020 = vmatprep.subr.bf16.mxu1 %v7743_v2 }
 0x86e   :  { %5987 = vmatpush3.bf16.msra.mxu0 %v8104_v42 }
 0x86f   :  { %5988 = vmatprep.subr.bf16.mxu0 %v8747_v14 }
 0x870   :  { %6022 = vmatpush1.bf16.msra.mxu1 %v7755_v21 }
 0x871   :  { %6048 = vmatprep.subr.bf16.mxu1 %v7774_v34 }
 0x872   :  { %5990 = vmatpush3.bf16.msra.mxu0 %v8114_v28 }
 0x873   :  { %6023 = vmatprep.subr.bf16.mxu0 %v8747_v14 }
 0x926   :  { %v1829_v30 = vpop.f32.mrb[16].mxu0  ;;  %v1900_v32 = vpop.f32.mrb[18].mxu1 }
 0x927   :  { %v1830_v3 = vadd.f32 %v1829_v30, %v8124_v13  ;;  %v1831_v34 = vpop.f32.mrb[17].mxu0  ;;  %v4846_v21 = vpop.f32.mrb[19].mxu1  ;;  %v1901_v29 = vadd.f32 %v1900_v32, %v8134_v48 }
 0x928   :  { %v1832_v2 = vadd.f32 %v1831_v34, %v8128_v50 }
 0x929   :  { %v4023_v28 = vmul.f32 -1.442695, %v1830_v3 }
 0x92a   :  { %v4024_v52 = vmul.f32 -1.442695, %v1832_v2 }
 0x92b   :  { %6782 = vpow2.f32 %v4023_v28 }
 0x92c   :  { %6784 = vpow2.f32 %v4024_v52 }
 0x935   :  { %v6783_v42 = vpop.eup %6782 }
 0x936   :  { %v1908_v49 = vadd.f32 1.0, %v6783_v42  ;;  %v6785_v1 = vpop.eup %6784 }
 0x937   :  { %v1915_v57 = vadd.f32 1.0, %v6785_v1 }
 0x938   :  { %6786 = vrcp.f32 %v1908_v49 }
 0x939   :  { %6788 = vrcp.f32 %v1915_v57 }
 0x942   :  { %v6787_v30 = vpop.eup %6786 }
 0x943   :  { %v1918_v13 = vmul.f32 %v6787_v30, %v1901_v29  ;;  %v6789_v34 = vpop.eup %6788 }
 0x944   :  { %v1921_v2 = vsub.f32 1.0, %v6789_v34  ;;  %v1923_v49 = vmul.f32 %v6789_v34, %v8014_v58 }
 0x945   :  { %v1919_v21 = vadd.f32 %v1918_v13, %v8037_v0 }
 0x947   :  { %6790 = vtanh.f32 %v1919_v21 }
 0x951   :  { %v6791_v52 = vpop.eup %6790 }
 0x952   :  { %v1922_v28 = vmul.f32 %v6791_v52, %v1921_v2 }
 0x954   :  { %v8139_v42 = vadd.f32 %v1923_v49, %v1922_v28  ;;  %v8758_v49 = vmov 1.0  }
 0x956   :  { %4880 = vmatmul.mubr.f32.vlgmr.msra.gmra.mrb[18].mxu0 %v8139_v42 }
 0x957   :  { %6025 = vmatpush3.bf16.msra.mxu0 %v7563_v54  ;;  %4914 = vmatprep.mubr.msk.f32.mxu0 %vm6845_vm0, %v8746_v46 }
 0x958   :  { %6026 = vmatprep.subr.bf16.mxu0 %v8747_v14 }
 0x95b   :  { %6028 = vmatpush3.bf16.msra.mxu0 %v7594_v12 }
 0x95c   :  { %6029 = vmatprep.subr.bf16.mxu0 %v8747_v14 }
 0x95f   :  { %6031 = vmatpush3.bf16.msra.mxu0 %v7625_v22 }
 0x960   :  { %6032 = vmatprep.subr.bf16.mxu0 %v8747_v14 }
 0x963   :  { %6034 = vmatpush3.bf16.msra.mxu0 %v7649_v44 }
 0x964   :  { %6035 = vmatprep.subr.bf16.mxu0 %v8747_v14 }
 0x967   :  { %6037 = vmatpush3.bf16.msra.mxu0 %v7677_v15 }
 0x968   :  { %6038 = vmatprep.subr.bf16.mxu0 %v8747_v14 }
 0x96b   :  { %6040 = vmatpush3.bf16.msra.mxu0 %v7705_v45 }
 0x96c   :  { %6041 = vmatprep.subr.bf16.mxu0 %v8747_v14 }
 0x96f   :  { %6043 = vmatpush3.bf16.msra.mxu0 %v7733_v60 }
 0x970   :  { %6044 = vmatprep.subr.bf16.mxu0 %v8747_v14 }
 0x973   :  { %6046 = vmatpush3.bf16.msra.mxu0 %v7764_v11 }
 0x974   :  { %6079 = vmatprep.subr.bf16.mxu0 %v8747_v14 }
 0xa29   :  { %v1991_v29 = vpop.f32.mrb[18].mxu0 }
 0xa2a   :  { %v1992_v41 = vadd.f32 %v8163_v27, %v1991_v29  ;;  %v4881_v58 = vpop.f32.mrb[19].mxu0  ;;  %v8759_v29 = vld [vmem:[#allocation15_spill] sm:$0xff] }
 0xa2b   :  { %v8761_v58 = vld [vmem:[#allocation17_spill] sm:$0xff] }
 0xa2c   :  { %1995 = vst [vmem:[%s8668_s9] sm:$0xff] %v1992_v41  ;;  %1996 = vmax.xlane.f32.xlu0 %v1992_v41 }
 0xab9   :  { %v1997_v0 = vpop.xlane.xlu0 %1996 }
 0xaba   :  { %vm1998_vm3 = vcmp.ge.f32.partialorder %v1992_v41, %v1997_v0  ;;  %v8760_v41 = vld [vmem:[#allocation16_spill] sm:$0xff]  ;;  %v8762_v0 = vld [vmem:[#allocation18_spill] sm:$0xff] }
 0xabb   :  { %v1999_v16 = vsel %vm1998_vm3, %v7761_v10, 128 }
 0xabc   :  { %v2001_v13 = vshra.s32 %v1999_v16, 16  ;;  %v2000_v3 = vand.u32 65535, %v1999_v16  ;;  %v8763_v16 = vld [vmem:[#allocation19_spill] sm:$0xff] }
 0xabe   :  { %v2003_v32 = vcvt.s32.f32 %v2001_v13  ;;  %v2002_v57 = vcvt.s32.f32 %v2000_v3  ;;  %v8764_v13 = vld [vmem:[#allocation2_spill] sm:$0xff]  ;;  %v8766_v3 = vld [vmem:[#allocation23_spill] sm:$0xff] }
 0xac0   :  { %2004 = vmin.xlane.f32.xlu1 %v2003_v32 }
 0xb4d   :  { %v2005_v1 = vpop.xlane.xlu1 %2004 }
 0xb4e   :  { %vm2006_vm4 = vcmp.eq.f32.partialorder %v2003_v32, %v2005_v1  ;;  %v2011_v21 = vcvt.f32.s32 %v2005_v1  ;;  %v8765_v32 = vld [vmem:[#allocation8_spill] sm:$0xff]  ;;  %v8767_v1 = vld [vmem:[#allocation9_spill] sm:$0xff] }
 0xb4f   :  { %v2007_v30 = vsel %vm2006_vm4, %v2002_v57, inf  ;;  %v8768_v57 = vld [vmem:[#allocation10_spill] sm:$0xff] }
 0xb50   :  { %2008 = vmin.xlane.f32.xlu0 %v2007_v30  ;;  %v2012_v2 = vshll.u32 %v2011_v21, 16  ;;  %v8769_v30 = vld [vmem:[#allocation24_spill] sm:$0xff]  ;;  %v8770_v21 = vld [vmem:[#allocation11_spill] sm:$0xff] }
 0xbdd   :  { %v2009_v34 = vpop.xlane.xlu0 %2008 }
 0xbde   :  { %v2010_v52 = vcvt.f32.s32 %v2009_v34  ;;  %v8771_v34 = vld [vmem:[#allocation12_spill] sm:$0xff] }
 0xbe0   :  { %v2013_v28 = vadd.s32 %v2012_v2, %v2010_v52  ;;  %v8772_v2 = vld [vmem:[#allocation25_spill] sm:$0xff] }
 0xbe1   :  { %v8773_v52 = vld [vmem:[#allocation13_spill] sm:$0xff] }
 0xbe2   :  { %vm2014_vm5 = vcmp.eq.s32.totalorder %v7761_v10, %v2013_v28  ;;  %v8774_v28 = vld [vmem:[#allocation14_spill] sm:$0xff] }
 0xbe3   :  { %4026 = vmatmul.mubr.msk.f32.vlgmr.msra.gmra.mrb[20].mxu1 %vm2014_vm5, %v8758_v49  ;;  %4915 = vmatmul.mubr.msk.f32.vlgmr.msra.gmra.mrb[20].mxu0 %vm2014_vm5, %v8758_v49 }
 0xbe4   :  { %6050 = vmatpush1.bf16.msra.mxu1 %v7786_v53  ;;  %6081 = vmatpush3.bf16.msra.mxu0 %v7793_v63 }
 0xbe5   :  { %6052 = vmatprep.subr.bf16.mxu1 %v7805_v25  ;;  %6082 = vmatprep.subr.bf16.mxu0 %v8747_v14 }
 0xbe6   :  { %2222 = vmatprep.mubr.f32.mxu1 %v8746_v46  ;;  %4949 = vmatprep.mubr.msk.f32.mxu0 %vm6845_vm0, %v8746_v46 }
 0xbe8   :  { %6054 = vmatpush1.bf16.msra.mxu1 %v7817_v36  ;;  %6084 = vmatpush3.bf16.msra.mxu0 %v7824_v47 }
 0xbe9   :  { %6056 = vmatprep.subr.bf16.mxu1 %v7836_v51  ;;  %6085 = vmatprep.subr.bf16.mxu0 %v8747_v14 }
 0xbec   :  { %6058 = vmatpush1.bf16.msra.mxu1 %v7848_v6  ;;  %6087 = vmatpush3.bf16.msra.mxu0 %v7854_v19 }
 0xbed   :  { %6060 = vmatprep.subr.bf16.mxu1 %v7864_v33  ;;  %6088 = vmatprep.subr.bf16.mxu0 %v8747_v14 }
 0xbf0   :  { %6062 = vmatpush1.bf16.msra.mxu1 %v7876_v59  ;;  %6090 = vmatpush3.bf16.msra.mxu0 %v7882_v20 }
 0xbf1   :  { %6064 = vmatprep.subr.bf16.mxu1 %v7892_v40  ;;  %6091 = vmatprep.subr.bf16.mxu0 %v8747_v14 }
 0xbf4   :  { %6066 = vmatpush1.bf16.msra.mxu1 %v7904_v56  ;;  %6093 = vmatpush3.bf16.msra.mxu0 %v7910_v62 }
 0xbf5   :  { %6068 = vmatprep.subr.bf16.mxu1 %v7921_v26  ;;  %6094 = vmatprep.subr.bf16.mxu0 %v8747_v14 }
 0xbf8   :  { %6070 = vmatpush1.bf16.msra.mxu1 %v7934_v37  ;;  %6096 = vmatpush3.bf16.msra.mxu0 %v7936_v39 }
 0xbf9   :  { %6072 = vmatprep.subr.bf16.mxu1 %v7949_v61  ;;  %6097 = vmatprep.subr.bf16.mxu0 %v8747_v14 }
 0xbfc   :  { %6074 = vmatpush1.bf16.msra.mxu1 %v8759_v29  ;;  %6099 = vmatpush3.bf16.msra.mxu0 %v8760_v41 }
 0xbfd   :  { %6076 = vmatprep.subr.bf16.mxu1 %v8761_v58  ;;  %6100 = vmatprep.subr.bf16.mxu0 %v8747_v14 }
 0xc00   :  { %6078 = vmatpush1.bf16.msra.mxu1 %v8762_v0  ;;  %6102 = vmatpush3.bf16.msra.mxu0 %v8763_v16 }
 0xc01   :  { %6103 = vmatprep.subr.bf16.mxu1 %v8747_v14  ;;  %6128 = vmatprep.subr.bf16.mxu0 %v8764_v13 }
 0xc03   :  { %2223 = vmatmul.mubr.f32.vlgmr.msra.gmra.mrb[20].mxu1 %v8139_v42  ;;  %4950 = vmatmul.mubr.f32.vlgmr.msra.gmra.mrb[22].mxu0 %v8139_v42 }
 0xc04   :  { %6105 = vmatpush3.bf16.msra.mxu1 %v8045_v5  ;;  %4984 = vmatprep.mubr.msk.f32.mxu1 %vm6845_vm0, %v8746_v46 }
 0xc05   :  { %6106 = vmatprep.subr.bf16.mxu1 %v8747_v14  ;;  %6130 = vmatpush1.bf16.msra.mxu0 %v7561_v43 }
 0xc06   :  { %6132 = vmatprep.subr.bf16.mxu0 %v7568_v9  ;;  %2477 = vmatprep.mubr.f32.mxu0 %v8746_v46 }
 0xc08   :  { %6108 = vmatpush3.bf16.msra.mxu1 %v8055_v35 }
 0xc09   :  { %6109 = vmatprep.subr.bf16.mxu1 %v8747_v14  ;;  %6134 = vmatpush1.bf16.msra.mxu0 %v7592_v8 }
 0xc0a   :  { %6136 = vmatprep.subr.bf16.mxu0 %v7601_v18 }
 0xc0c   :  { %6111 = vmatpush3.bf16.msra.mxu1 %v8065_v4 }
 0xc0d   :  { %6112 = vmatprep.subr.bf16.mxu1 %v8747_v14  ;;  %6138 = vmatpush1.bf16.msra.mxu0 %v7623_v17 }
 0xc0e   :  { %6140 = vmatprep.subr.bf16.mxu0 %v7629_v23 }
 0xc10   :  { %6114 = vmatpush3.bf16.msra.mxu1 %v8075_v31 }
 0xc11   :  { %6115 = vmatprep.subr.bf16.mxu1 %v8747_v14  ;;  %6142 = vmatpush1.bf16.msra.mxu0 %v7644_v38 }
 0xc12   :  { %6144 = vmatprep.subr.bf16.mxu0 %v7659_v55 }
 0xc14   :  { %6117 = vmatpush3.bf16.msra.mxu1 %v8085_v24 }
 0xc15   :  { %6118 = vmatprep.subr.bf16.mxu1 %v8747_v14  ;;  %6146 = vmatpush1.bf16.msra.mxu0 %v7671_v7  ;;  %v8775_v7 = vld [vmem:[#allocation26_spill] sm:$0xff] }
 0xc16   :  { %6148 = vmatprep.subr.bf16.mxu0 %v8765_v32 }
 0xc18   :  { %6120 = vmatpush3.bf16.msra.mxu1 %v8766_v3 }
 0xc19   :  { %6121 = vmatprep.subr.bf16.mxu1 %v8747_v14  ;;  %6150 = vmatpush1.bf16.msra.mxu0 %v8767_v1 }
 0xc1a   :  { %6152 = vmatprep.subr.bf16.mxu0 %v8768_v57 }
 0xc1c   :  { %6123 = vmatpush3.bf16.msra.mxu1 %v8769_v30 }
 0xc1d   :  { %6124 = vmatprep.subr.bf16.mxu1 %v8747_v14  ;;  %6154 = vmatpush1.bf16.msra.mxu0 %v8770_v21 }
 0xc1e   :  { %6156 = vmatprep.subr.bf16.mxu0 %v8771_v34 }
 0xc20   :  { %6126 = vmatpush3.bf16.msra.mxu1 %v8772_v2 }
 0xc21   :  { %6159 = vmatprep.subr.bf16.mxu1 %v8747_v14  ;;  %6158 = vmatpush1.bf16.msra.mxu0 %v8773_v52 }
 0xc22   :  { %6184 = vmatprep.subr.bf16.mxu0 %v8774_v28 }
 0xcb6   :  { %v2154_v3 = vpop.f32.mrb[20].mxu0 }
 0xcb7   :  { %v4916_v1 = vpop.f32.mrb[21].mxu0 }
 0xcd6   :  { %v2224_v32 = vpop.f32.mrb[20].mxu1  ;;  %v2295_v57 = vpop.f32.mrb[22].mxu0 }
 0xcd7   :  { %v2225_v30 = vadd.f32 %v2224_v32, %v8775_v7  ;;  %v2226_v24 = vpop.f32.mrb[21].mxu1  ;;  %v4951_v55 = vpop.f32.mrb[23].mxu0  ;;  %v2296_v28 = vadd.f32 %v2295_v57, %v8134_v48 }
 0xcd8   :  { %v2227_v21 = vadd.f32 %v2226_v24, %v8128_v50 }
 0xcd9   :  { %v4028_v38 = vmul.f32 -1.442695, %v2225_v30 }
 0xcda   :  { %v4029_v34 = vmul.f32 -1.442695, %v2227_v21 }
 0xcdb   :  { %6792 = vpow2.f32 %v4028_v38 }
 0xcdc   :  { %6794 = vpow2.f32 %v4029_v34 }
 0xce5   :  { %v6793_v2 = vpop.eup %6792 }
 0xce6   :  { %v2303_v31 = vadd.f32 1.0, %v6793_v2  ;;  %v6795_v52 = vpop.eup %6794 }
 0xce7   :  { %v2310_v23 = vadd.f32 1.0, %v6795_v52 }
 0xce8   :  { %6796 = vrcp.f32 %v2303_v31 }
 0xce9   :  { %6798 = vrcp.f32 %v2310_v23 }
 0xcf2   :  { %v6797_v1 = vpop.eup %6796 }
 0xcf3   :  { %v2313_v17 = vmul.f32 %v6797_v1, %v2296_v28  ;;  %v6799_v32 = vpop.eup %6798 }
 0xcf4   :  { %v2316_v55 = vsub.f32 1.0, %v6799_v32  ;;  %v2318_v38 = vmul.f32 %v6799_v32, %v8139_v42 }
 0xcf5   :  { %v2314_v4 = vadd.f32 %v2313_v17, %v2154_v3 }
 0xcf7   :  { %6800 = vtanh.f32 %v2314_v4 }
 0xd01   :  { %v6801_v30 = vpop.eup %6800 }
 0xd02   :  { %v2317_v7 = vmul.f32 %v6801_v30, %v2316_v55  ;;  %v8776_v30 = vld [vmem:[#allocation20_spill] sm:$0xff] }
 0xd04   :  { %v8249_v24 = vadd.f32 %v2318_v38, %v2317_v7  ;;  %v8777_v38 = vld [vmem:[#allocation3_spill] sm:$0xff] }
 0xd06   :  { %4985 = vmatmul.mubr.f32.vlgmr.msra.gmra.mrb[22].mxu1 %v8249_v24 }
 0xd07   :  { %6161 = vmatpush3.bf16.msra.mxu1 %v7563_v54  ;;  %5019 = vmatprep.mubr.msk.f32.mxu1 %vm6845_vm0, %v8746_v46 }
 0xd08   :  { %6162 = vmatprep.subr.bf16.mxu1 %v8747_v14 }
 0xd0b   :  { %6164 = vmatpush3.bf16.msra.mxu1 %v7594_v12 }
 0xd0c   :  { %6165 = vmatprep.subr.bf16.mxu1 %v8747_v14 }
 0xd0f   :  { %6167 = vmatpush3.bf16.msra.mxu1 %v7625_v22 }
 0xd10   :  { %6168 = vmatprep.subr.bf16.mxu1 %v8747_v14 }
 0xd13   :  { %6170 = vmatpush3.bf16.msra.mxu1 %v7649_v44 }
 0xd14   :  { %6171 = vmatprep.subr.bf16.mxu1 %v8747_v14 }
 0xd17   :  { %6173 = vmatpush3.bf16.msra.mxu1 %v7677_v15 }
 0xd18   :  { %6174 = vmatprep.subr.bf16.mxu1 %v8747_v14 }
 0xd1b   :  { %6176 = vmatpush3.bf16.msra.mxu1 %v7705_v45 }
 0xd1c   :  { %6177 = vmatprep.subr.bf16.mxu1 %v8747_v14 }
 0xd1f   :  { %6179 = vmatpush3.bf16.msra.mxu1 %v7733_v60 }
 0xd20   :  { %6180 = vmatprep.subr.bf16.mxu1 %v8747_v14 }
 0xd23   :  { %6182 = vmatpush3.bf16.msra.mxu1 %v7764_v11 }
 0xd24   :  { %6215 = vmatprep.subr.bf16.mxu1 %v8747_v14 }
 0xdd9   :  { %v2386_v17 = vpop.f32.mrb[22].mxu1 }
 0xdda   :  { %v2387_v23 = vadd.f32 %v8163_v27, %v2386_v17  ;;  %v4986_v7 = vpop.f32.mrb[23].mxu1  ;;  %v8778_v17 = vld [vmem:[#allocation4_spill] sm:$0xff] }
 0xddb   :  { %v8780_v7 = vld [vmem:[#allocation5_spill] sm:$0xff] }
 0xddc   :  { %4030 = vst [vmem:[%s8668_s9 + $0x8] sm:$0xff] %v2387_v23  ;;  %2392 = vmax.xlane.f32.xlu0 %v2387_v23 }
 0xe69   :  { %v2393_v4 = vpop.xlane.xlu0 %2392 }
 0xe6a   :  { %vm2394_vm6 = vcmp.ge.f32.partialorder %v2387_v23, %v2393_v4  ;;  %v8779_v23 = vld [vmem:[#allocation21_spill] sm:$0xff]  ;;  %v8781_v4 = vld [vmem:[#allocation6_spill] sm:$0xff] }
 0xe6b   :  { %v2395_v31 = vsel %vm2394_vm6, %v7761_v10, 128 }
 0xe6c   :  { %v2397_v42 = vshra.s32 %v2395_v31, 16  ;;  %v2396_v57 = vand.u32 65535, %v2395_v31  ;;  %v8782_v31 = vld [vmem:[#allocation22_spill] sm:$0xff] }
 0xe6e   :  { %v2399_v3 = vcvt.s32.f32 %v2397_v42  ;;  %v2398_v34 = vcvt.s32.f32 %v2396_v57  ;;  %v8783_v42 = vld [vmem:[#allocation7_spill] sm:$0xff] }
 0xe6f   :  { %v8785_v57 = vld [vmem:[#allocation23_spill] sm:$0xff] }
 0xe70   :  { %2400 = vmin.xlane.f32.xlu1 %v2399_v3 }
 0xefd   :  { %v2401_v21 = vpop.xlane.xlu1 %2400 }
 0xefe   :  { %vm2402_vm7 = vcmp.eq.f32.partialorder %v2399_v3, %v2401_v21  ;;  %v2407_v52 = vcvt.f32.s32 %v2401_v21  ;;  %v8784_v3 = vld [vmem:[#allocation8_spill] sm:$0xff]  ;;  %v8786_v21 = vld [vmem:[#allocation9_spill] sm:$0xff] }
 0xeff   :  { %v2403_v2 = vsel %vm2402_vm7, %v2398_v34, inf  ;;  %v8787_v34 = vld [vmem:[#allocation10_spill] sm:$0xff] }
 0xf00   :  { %2404 = vmin.xlane.f32.xlu0 %v2403_v2  ;;  %v2408_v1 = vshll.u32 %v2407_v52, 16  ;;  %v8788_v2 = vld [vmem:[#allocation24_spill] sm:$0xff]  ;;  %v8789_v52 = vld [vmem:[#allocation11_spill] sm:$0xff] }
 0xf8d   :  { %v2405_v28 = vpop.xlane.xlu0 %2404 }
 0xf8e   :  { %v2406_v32 = vcvt.f32.s32 %v2405_v28  ;;  %v8790_v28 = vld [vmem:[#allocation12_spill] sm:$0xff] }
 0xf90   :  { %v2409_v55 = vadd.s32 %v2408_v1, %v2406_v32  ;;  %v8791_v1 = vld [vmem:[#allocation25_spill] sm:$0xff] }
 0xf91   :  { %v8792_v32 = vld [vmem:[#allocation13_spill] sm:$0xff] }
 0xf92   :  { %vm2410_vm8 = vcmp.eq.s32.totalorder %v7761_v10, %v2409_v55  ;;  %v8793_v55 = vld [vmem:[#allocation14_spill] sm:$0xff] }
 0xf93   :  { %4032 = vmatmul.mubr.msk.f32.vlgmr.msra.gmra.mrb[24].mxu0 %vm2410_vm8, %v8758_v49  ;;  %5020 = vmatmul.mubr.msk.f32.vlgmr.msra.gmra.mrb[24].mxu1 %vm2410_vm8, %v8758_v49 }
 0xf94   :  { %6186 = vmatpush1.bf16.msra.mxu0 %v7786_v53  ;;  %6217 = vmatpush3.bf16.msra.mxu1 %v7793_v63 }
 0xf95   :  { %6188 = vmatprep.subr.bf16.mxu0 %v7805_v25  ;;  %6218 = vmatprep.subr.bf16.mxu1 %v8747_v14 }
 0xf96   :  { %2618 = vmatprep.mubr.f32.mxu0 %v8746_v46  ;;  %5054 = vmatprep.mubr.msk.f32.mxu1 %vm6845_vm0, %v8746_v46 }
 0xf98   :  { %6190 = vmatpush1.bf16.msra.mxu0 %v7817_v36  ;;  %6220 = vmatpush3.bf16.msra.mxu1 %v7824_v47 }
 0xf99   :  { %6192 = vmatprep.subr.bf16.mxu0 %v7836_v51  ;;  %6221 = vmatprep.subr.bf16.mxu1 %v8747_v14 }
 0xf9c   :  { %6194 = vmatpush1.bf16.msra.mxu0 %v7848_v6  ;;  %6223 = vmatpush3.bf16.msra.mxu1 %v7854_v19 }
 0xf9d   :  { %6196 = vmatprep.subr.bf16.mxu0 %v7864_v33  ;;  %6224 = vmatprep.subr.bf16.mxu1 %v8747_v14 }
 0xfa0   :  { %6198 = vmatpush1.bf16.msra.mxu0 %v7876_v59  ;;  %6226 = vmatpush3.bf16.msra.mxu1 %v7882_v20 }
 0xfa1   :  { %6200 = vmatprep.subr.bf16.mxu0 %v7892_v40  ;;  %6227 = vmatprep.subr.bf16.mxu1 %v8747_v14 }
 0xfa4   :  { %6202 = vmatpush1.bf16.msra.mxu0 %v7904_v56  ;;  %6229 = vmatpush3.bf16.msra.mxu1 %v7910_v62 }
 0xfa5   :  { %6204 = vmatprep.subr.bf16.mxu0 %v7921_v26  ;;  %6230 = vmatprep.subr.bf16.mxu1 %v8747_v14 }
 0xfa8   :  { %6206 = vmatpush1.bf16.msra.mxu0 %v7934_v37  ;;  %6232 = vmatpush3.bf16.msra.mxu1 %v7936_v39 }
 0xfa9   :  { %6208 = vmatprep.subr.bf16.mxu0 %v7949_v61  ;;  %6233 = vmatprep.subr.bf16.mxu1 %v8747_v14 }
 0xfac   :  { %6210 = vmatpush1.bf16.msra.mxu0 %v8759_v29  ;;  %6235 = vmatpush3.bf16.msra.mxu1 %v8760_v41 }
 0xfad   :  { %6212 = vmatprep.subr.bf16.mxu0 %v8761_v58  ;;  %6236 = vmatprep.subr.bf16.mxu1 %v8747_v14 }
 0xfb0   :  { %6214 = vmatpush1.bf16.msra.mxu0 %v8762_v0  ;;  %6238 = vmatpush3.bf16.msra.mxu1 %v8763_v16 }
 0xfb1   :  { %6239 = vmatprep.subr.bf16.mxu0 %v8747_v14  ;;  %6264 = vmatprep.subr.bf16.mxu1 %v8764_v13 }
 0xfb3   :  { %2619 = vmatmul.mubr.f32.vlgmr.msra.gmra.mrb[24].mxu0 %v8249_v24  ;;  %5055 = vmatmul.mubr.f32.vlgmr.msra.gmra.mrb[26].mxu1 %v8249_v24 }
 0xfb4   :  { %6241 = vmatpush3.bf16.msra.mxu0 %v8045_v5  ;;  %5089 = vmatprep.mubr.msk.f32.mxu0 %vm6845_vm0, %v8746_v46 }
 0xfb5   :  { %6242 = vmatprep.subr.bf16.mxu0 %v8747_v14  ;;  %6266 = vmatpush1.bf16.msra.mxu1 %v7561_v43 }
 0xfb6   :  { %6268 = vmatprep.subr.bf16.mxu1 %v7568_v9  ;;  %2873 = vmatprep.mubr.f32.mxu1 %v8746_v46 }
 0xfb8   :  { %6244 = vmatpush3.bf16.msra.mxu0 %v8055_v35 }
 0xfb9   :  { %6245 = vmatprep.subr.bf16.mxu0 %v8747_v14  ;;  %6270 = vmatpush1.bf16.msra.mxu1 %v7592_v8 }
 0xfba   :  { %6272 = vmatprep.subr.bf16.mxu1 %v7601_v18 }
 0xfbc   :  { %6247 = vmatpush3.bf16.msra.mxu0 %v8776_v30 }
 0xfbd   :  { %6248 = vmatprep.subr.bf16.mxu0 %v8747_v14  ;;  %6274 = vmatpush1.bf16.msra.mxu1 %v8777_v38 }
 0xfbe   :  { %6276 = vmatprep.subr.bf16.mxu1 %v8778_v17 }
 0xfc0   :  { %6250 = vmatpush3.bf16.msra.mxu0 %v8779_v23 }
 0xfc1   :  { %6251 = vmatprep.subr.bf16.mxu0 %v8747_v14  ;;  %6278 = vmatpush1.bf16.msra.mxu1 %v8780_v7 }
 0xfc2   :  { %6280 = vmatprep.subr.bf16.mxu1 %v8781_v4 }
 0xfc4   :  { %6253 = vmatpush3.bf16.msra.mxu0 %v8782_v31 }
 0xfc5   :  { %6254 = vmatprep.subr.bf16.mxu0 %v8747_v14  ;;  %6282 = vmatpush1.bf16.msra.mxu1 %v8783_v42  ;;  %v8794_v42 = vld [vmem:[#allocation26_spill] sm:$0xff] }
 0xfc6   :  { %6284 = vmatprep.subr.bf16.mxu1 %v8784_v3 }
 0xfc8   :  { %6256 = vmatpush3.bf16.msra.mxu0 %v8785_v57 }
 0xfc9   :  { %6257 = vmatprep.subr.bf16.mxu0 %v8747_v14  ;;  %6286 = vmatpush1.bf16.msra.mxu1 %v8786_v21 }
 0xfca   :  { %6288 = vmatprep.subr.bf16.mxu1 %v8787_v34 }
 0xfcc   :  { %6259 = vmatpush3.bf16.msra.mxu0 %v8788_v2 }
 0xfcd   :  { %6260 = vmatprep.subr.bf16.mxu0 %v8747_v14  ;;  %6290 = vmatpush1.bf16.msra.mxu1 %v8789_v52 }
 0xfce   :  { %6292 = vmatprep.subr.bf16.mxu1 %v8790_v28 }
 0xfd0   :  { %6262 = vmatpush3.bf16.msra.mxu0 %v8791_v1 }
 0xfd1   :  { %6295 = vmatprep.subr.bf16.mxu0 %v8747_v14  ;;  %6294 = vmatpush1.bf16.msra.mxu1 %v8792_v32 }
 0xfd2   :  { %6320 = vmatprep.subr.bf16.mxu1 %v8793_v55 }
0x1066   :  { %v2550_v57 = vpop.f32.mrb[24].mxu1 }
0x1067   :  { %v5021_v21 = vpop.f32.mrb[25].mxu1 }
0x1086   :  { %v2620_v3 = vpop.f32.mrb[24].mxu0  ;;  %v2691_v34 = vpop.f32.mrb[26].mxu1 }
0x1087   :  { %v2621_v2 = vadd.f32 %v2620_v3, %v8794_v42  ;;  %v2622_v31 = vpop.f32.mrb[25].mxu0  ;;  %v5056_v4 = vpop.f32.mrb[27].mxu1  ;;  %v2692_v55 = vadd.f32 %v2691_v34, %v8134_v48 }
0x1088   :  { %v2623_v52 = vadd.f32 %v2622_v31, %v8128_v50 }
0x1089   :  { %v4034_v7 = vmul.f32 -1.442695, %v2621_v2 }
0x108a   :  { %v4035_v28 = vmul.f32 -1.442695, %v2623_v52 }
0x108b   :  { %6802 = vpow2.f32 %v4034_v7 }
0x108c   :  { %6804 = vpow2.f32 %v4035_v28 }
0x1095   :  { %v6803_v1 = vpop.eup %6802 }
0x1096   :  { %v2699_v23 = vadd.f32 1.0, %v6803_v1  ;;  %v6805_v32 = vpop.eup %6804 }
0x1097   :  { %v2706_v17 = vadd.f32 1.0, %v6805_v32 }
0x1098   :  { %6806 = vrcp.f32 %v2699_v23 }
0x1099   :  { %6808 = vrcp.f32 %v2706_v17 }
0x10a2   :  { %v6807_v21 = vpop.eup %6806 }
0x10a3   :  { %v2709_v38 = vmul.f32 %v6807_v21, %v2692_v55  ;;  %v6809_v3 = vpop.eup %6808 }
0x10a4   :  { %v2712_v4 = vsub.f32 1.0, %v6809_v3  ;;  %v2714_v7 = vmul.f32 %v6809_v3, %v8249_v24 }
0x10a5   :  { %v2710_v30 = vadd.f32 %v2709_v38, %v2550_v57 }
0x10a7   :  { %6810 = vtanh.f32 %v2710_v30 }
0x10b1   :  { %v6811_v2 = vpop.eup %6810 }
0x10b2   :  { %v2713_v42 = vmul.f32 %v6811_v2, %v2712_v4  ;;  %v8795_v2 = vld [vmem:[#allocation20_spill] sm:$0xff] }
0x10b4   :  { %v8354_v31 = vadd.f32 %v2714_v7, %v2713_v42  ;;  %v8796_v7 = vld [vmem:[#allocation3_spill] sm:$0xff] }
0x10b6   :  { %5090 = vmatmul.mubr.f32.vlgmr.msra.gmra.mrb[26].mxu0 %v8354_v31 }
0x10b7   :  { %6297 = vmatpush3.bf16.msra.mxu0 %v7563_v54  ;;  %5124 = vmatprep.mubr.msk.f32.mxu0 %vm6845_vm0, %v8746_v46 }
0x10b8   :  { %6298 = vmatprep.subr.bf16.mxu0 %v8747_v14 }
0x10bb   :  { %6300 = vmatpush3.bf16.msra.mxu0 %v7594_v12 }
0x10bc   :  { %6301 = vmatprep.subr.bf16.mxu0 %v8747_v14 }
0x10bf   :  { %6303 = vmatpush3.bf16.msra.mxu0 %v7625_v22 }
0x10c0   :  { %6304 = vmatprep.subr.bf16.mxu0 %v8747_v14 }
0x10c3   :  { %6306 = vmatpush3.bf16.msra.mxu0 %v7649_v44 }
0x10c4   :  { %6307 = vmatprep.subr.bf16.mxu0 %v8747_v14 }
0x10c7   :  { %6309 = vmatpush3.bf16.msra.mxu0 %v7677_v15 }
0x10c8   :  { %6310 = vmatprep.subr.bf16.mxu0 %v8747_v14 }
0x10cb   :  { %6312 = vmatpush3.bf16.msra.mxu0 %v7705_v45 }
0x10cc   :  { %6313 = vmatprep.subr.bf16.mxu0 %v8747_v14 }
0x10cf   :  { %6315 = vmatpush3.bf16.msra.mxu0 %v7733_v60 }
0x10d0   :  { %6316 = vmatprep.subr.bf16.mxu0 %v8747_v14 }
0x10d3   :  { %6318 = vmatpush3.bf16.msra.mxu0 %v7764_v11 }
0x10d4   :  { %6351 = vmatprep.subr.bf16.mxu0 %v8747_v14 }
0x1189   :  { %v2782_v24 = vpop.f32.mrb[26].mxu0 }
0x118a   :  { %v2783_v30 = vadd.f32 %v8163_v27, %v2782_v24  ;;  %v5091_v38 = vpop.f32.mrb[27].mxu0  ;;  %v8797_v24 = vld [vmem:[#allocation4_spill] sm:$0xff] }
0x118b   :  { %v8799_v38 = vld [vmem:[#allocation5_spill] sm:$0xff] }
0x118c   :  { %4036 = vst [vmem:[%s8668_s9 + $0x10] sm:$0xff] %v2783_v30  ;;  %2788 = vmax.xlane.f32.xlu1 %v2783_v30 }
0x1219   :  { %v2789_v17 = vpop.xlane.xlu1 %2788 }
0x121a   :  { %vm2790_vm9 = vcmp.ge.f32.partialorder %v2783_v30, %v2789_v17  ;;  %v8798_v30 = vld [vmem:[#allocation21_spill] sm:$0xff]  ;;  %v8800_v17 = vld [vmem:[#allocation6_spill] sm:$0xff] }
0x121b   :  { %v2791_v23 = vsel %vm2790_vm9, %v7761_v10, 128 }
0x121c   :  { %v2793_v42 = vshra.s32 %v2791_v23, 16  ;;  %v2792_v34 = vand.u32 65535, %v2791_v23  ;;  %v8801_v23 = vld [vmem:[#allocation22_spill] sm:$0xff] }
0x121e   :  { %v2795_v57 = vcvt.s32.f32 %v2793_v42  ;;  %v2794_v28 = vcvt.s32.f32 %v2792_v34  ;;  %v8802_v42 = vld [vmem:[#allocation7_spill] sm:$0xff] }
0x121f   :  { %v8804_v34 = vld [vmem:[#allocation23_spill] sm:$0xff] }
0x1220   :  { %2796 = vmin.xlane.f32.xlu0 %v2795_v57 }
0x12ad   :  { %v2797_v52 = vpop.xlane.xlu0 %2796 }
0x12ae   :  { %vm2798_vm10 = vcmp.eq.f32.partialorder %v2795_v57, %v2797_v52  ;;  %v2803_v32 = vcvt.f32.s32 %v2797_v52  ;;  %v8803_v57 = vld [vmem:[#allocation8_spill] sm:$0xff]  ;;  %v8805_v52 = vld [vmem:[#allocation9_spill] sm:$0xff] }
0x12af   :  { %v2799_v1 = vsel %vm2798_vm10, %v2794_v28, inf  ;;  %v8806_v28 = vld [vmem:[#allocation10_spill] sm:$0xff] }
0x12b0   :  { %2800 = vmin.xlane.f32.xlu1 %v2799_v1  ;;  %v2804_v21 = vshll.u32 %v2803_v32, 16  ;;  %v8807_v1 = vld [vmem:[#allocation24_spill] sm:$0xff]  ;;  %v8808_v32 = vld [vmem:[#allocation11_spill] sm:$0xff] }
0x133d   :  { %v2801_v55 = vpop.xlane.xlu1 %2800 }
0x133e   :  { %v2802_v3 = vcvt.f32.s32 %v2801_v55  ;;  %v8809_v55 = vld [vmem:[#allocation12_spill] sm:$0xff] }
0x1340   :  { %v2805_v4 = vadd.s32 %v2804_v21, %v2802_v3  ;;  %v8810_v21 = vld [vmem:[#allocation25_spill] sm:$0xff] }
0x1341   :  { %v8811_v3 = vld [vmem:[#allocation13_spill] sm:$0xff] }
0x1342   :  { %vm2806_vm11 = vcmp.eq.s32.totalorder %v7761_v10, %v2805_v4  ;;  %v8812_v4 = vld [vmem:[#allocation14_spill] sm:$0xff] }
0x1343   :  { %4038 = vmatmul.mubr.msk.f32.vlgmr.msra.gmra.mrb[28].mxu1 %vm2806_vm11, %v8758_v49  ;;  %5125 = vmatmul.mubr.msk.f32.vlgmr.msra.gmra.mrb[28].mxu0 %vm2806_vm11, %v8758_v49 }
0x1344   :  { %6322 = vmatpush1.bf16.msra.mxu1 %v7786_v53  ;;  %6353 = vmatpush3.bf16.msra.mxu0 %v7793_v63 }
0x1345   :  { %6324 = vmatprep.subr.bf16.mxu1 %v7805_v25  ;;  %6354 = vmatprep.subr.bf16.mxu0 %v8747_v14 }
0x1346   :  { %3014 = vmatprep.mubr.f32.mxu1 %v8746_v46  ;;  %5159 = vmatprep.mubr.msk.f32.mxu0 %vm6845_vm0, %v8746_v46 }
0x1348   :  { %6326 = vmatpush1.bf16.msra.mxu1 %v7817_v36  ;;  %6356 = vmatpush3.bf16.msra.mxu0 %v7824_v47 }
0x1349   :  { %6328 = vmatprep.subr.bf16.mxu1 %v7836_v51  ;;  %6357 = vmatprep.subr.bf16.mxu0 %v8747_v14 }
0x134c   :  { %6330 = vmatpush1.bf16.msra.mxu1 %v7848_v6  ;;  %6359 = vmatpush3.bf16.msra.mxu0 %v7854_v19 }
0x134d   :  { %6332 = vmatprep.subr.bf16.mxu1 %v7864_v33  ;;  %6360 = vmatprep.subr.bf16.mxu0 %v8747_v14 }
0x1350   :  { %6334 = vmatpush1.bf16.msra.mxu1 %v7876_v59  ;;  %6362 = vmatpush3.bf16.msra.mxu0 %v7882_v20 }
0x1351   :  { %6336 = vmatprep.subr.bf16.mxu1 %v7892_v40  ;;  %6363 = vmatprep.subr.bf16.mxu0 %v8747_v14 }
0x1354   :  { %6338 = vmatpush1.bf16.msra.mxu1 %v7904_v56  ;;  %6365 = vmatpush3.bf16.msra.mxu0 %v7910_v62 }
0x1355   :  { %6340 = vmatprep.subr.bf16.mxu1 %v7921_v26  ;;  %6366 = vmatprep.subr.bf16.mxu0 %v8747_v14 }
0x1358   :  { %6342 = vmatpush1.bf16.msra.mxu1 %v7934_v37  ;;  %6368 = vmatpush3.bf16.msra.mxu0 %v7936_v39 }
0x1359   :  { %6344 = vmatprep.subr.bf16.mxu1 %v7949_v61  ;;  %6369 = vmatprep.subr.bf16.mxu0 %v8747_v14 }
0x135c   :  { %6346 = vmatpush1.bf16.msra.mxu1 %v8759_v29  ;;  %6371 = vmatpush3.bf16.msra.mxu0 %v8760_v41 }
0x135d   :  { %6348 = vmatprep.subr.bf16.mxu1 %v8761_v58  ;;  %6372 = vmatprep.subr.bf16.mxu0 %v8747_v14 }
0x1360   :  { %6350 = vmatpush1.bf16.msra.mxu1 %v8762_v0  ;;  %6374 = vmatpush3.bf16.msra.mxu0 %v8763_v16 }
0x1361   :  { %6375 = vmatprep.subr.bf16.mxu1 %v8747_v14  ;;  %6400 = vmatprep.subr.bf16.mxu0 %v8764_v13 }
0x1363   :  { %3015 = vmatmul.mubr.f32.vlgmr.msra.gmra.mrb[28].mxu1 %v8354_v31  ;;  %5160 = vmatmul.mubr.f32.vlgmr.msra.gmra.mrb[30].mxu0 %v8354_v31 }
0x1364   :  { %6377 = vmatpush3.bf16.msra.mxu1 %v8045_v5  ;;  %5194 = vmatprep.mubr.msk.f32.mxu1 %vm6845_vm0, %v8746_v46 }
0x1365   :  { %6378 = vmatprep.subr.bf16.mxu1 %v8747_v14  ;;  %6402 = vmatpush1.bf16.msra.mxu0 %v7561_v43 }
0x1366   :  { %6404 = vmatprep.subr.bf16.mxu0 %v7568_v9  ;;  %3269 = vmatprep.mubr.f32.mxu0 %v8746_v46 }
0x1368   :  { %6380 = vmatpush3.bf16.msra.mxu1 %v8055_v35 }
0x1369   :  { %6381 = vmatprep.subr.bf16.mxu1 %v8747_v14  ;;  %6406 = vmatpush1.bf16.msra.mxu0 %v7592_v8 }
0x136a   :  { %6408 = vmatprep.subr.bf16.mxu0 %v7601_v18 }
0x136c   :  { %6383 = vmatpush3.bf16.msra.mxu1 %v8795_v2 }
0x136d   :  { %6384 = vmatprep.subr.bf16.mxu1 %v8747_v14  ;;  %6410 = vmatpush1.bf16.msra.mxu0 %v8796_v7 }
0x136e   :  { %6412 = vmatprep.subr.bf16.mxu0 %v8797_v24 }
0x1370   :  { %6386 = vmatpush3.bf16.msra.mxu1 %v8798_v30 }
0x1371   :  { %6387 = vmatprep.subr.bf16.mxu1 %v8747_v14  ;;  %6414 = vmatpush1.bf16.msra.mxu0 %v8799_v38 }
0x1372   :  { %6416 = vmatprep.subr.bf16.mxu0 %v8800_v17 }
0x1374   :  { %6389 = vmatpush3.bf16.msra.mxu1 %v8801_v23 }
0x1375   :  { %6390 = vmatprep.subr.bf16.mxu1 %v8747_v14  ;;  %6418 = vmatpush1.bf16.msra.mxu0 %v8802_v42  ;;  %v8813_v42 = vld [vmem:[#allocation26_spill] sm:$0xff] }
0x1376   :  { %6420 = vmatprep.subr.bf16.mxu0 %v8803_v57 }
0x1378   :  { %6392 = vmatpush3.bf16.msra.mxu1 %v8804_v34 }
0x1379   :  { %6393 = vmatprep.subr.bf16.mxu1 %v8747_v14  ;;  %6422 = vmatpush1.bf16.msra.mxu0 %v8805_v52 }
0x137a   :  { %6424 = vmatprep.subr.bf16.mxu0 %v8806_v28 }
0x137c   :  { %6395 = vmatpush3.bf16.msra.mxu1 %v8807_v1 }
0x137d   :  { %6396 = vmatprep.subr.bf16.mxu1 %v8747_v14  ;;  %6426 = vmatpush1.bf16.msra.mxu0 %v8808_v32 }
0x137e   :  { %6428 = vmatprep.subr.bf16.mxu0 %v8809_v55 }
0x1380   :  { %6398 = vmatpush3.bf16.msra.mxu1 %v8810_v21 }
0x1381   :  { %6431 = vmatprep.subr.bf16.mxu1 %v8747_v14  ;;  %6430 = vmatpush1.bf16.msra.mxu0 %v8811_v3 }
0x1382   :  { %6456 = vmatprep.subr.bf16.mxu0 %v8812_v4 }
0x1416   :  { %v2946_v34 = vpop.f32.mrb[28].mxu0 }
0x1417   :  { %v5126_v52 = vpop.f32.mrb[29].mxu0 }
0x1436   :  { %v3016_v57 = vpop.f32.mrb[28].mxu1  ;;  %v3087_v28 = vpop.f32.mrb[30].mxu0 }
0x1437   :  { %v3017_v1 = vadd.f32 %v3016_v57, %v8813_v42  ;;  %v3018_v23 = vpop.f32.mrb[29].mxu1  ;;  %v5161_v17 = vpop.f32.mrb[31].mxu0  ;;  %v3088_v4 = vadd.f32 %v3087_v28, %v8134_v48 }
0x1438   :  { %v3019_v32 = vadd.f32 %v3018_v23, %v8128_v50 }
0x1439   :  { %v4040_v38 = vmul.f32 -1.442695, %v3017_v1 }
0x143a   :  { %v4041_v55 = vmul.f32 -1.442695, %v3019_v32 }
0x143b   :  { %6812 = vpow2.f32 %v4040_v38 }
0x143c   :  { %6814 = vpow2.f32 %v4041_v55 }
0x1445   :  { %v6813_v21 = vpop.eup %6812 }
0x1446   :  { %v3095_v30 = vadd.f32 1.0, %v6813_v21  ;;  %v6815_v3 = vpop.eup %6814 }
0x1447   :  { %v3102_v24 = vadd.f32 1.0, %v6815_v3 }
0x1448   :  { %6816 = vrcp.f32 %v3095_v30 }
0x1449   :  { %6818 = vrcp.f32 %v3102_v24 }
0x1452   :  { %v6817_v52 = vpop.eup %6816 }
0x1453   :  { %v3105_v7 = vmul.f32 %v6817_v52, %v3088_v4  ;;  %v6819_v57 = vpop.eup %6818 }
0x1454   :  { %v3108_v17 = vsub.f32 1.0, %v6819_v57  ;;  %v3110_v38 = vmul.f32 %v6819_v57, %v8354_v31 }
0x1455   :  { %v3106_v2 = vadd.f32 %v3105_v7, %v2946_v34 }
0x1457   :  { %6820 = vtanh.f32 %v3106_v2 }
0x1461   :  { %v6821_v1 = vpop.eup %6820 }
0x1462   :  { %v3109_v42 = vmul.f32 %v6821_v1, %v3108_v17  ;;  %v8815_v17 = vld [vmem:[#allocation3_spill] sm:$0xff]  ;;  %v8816_v1 = vld [vmem:[#allocation4_spill] sm:$0xff] }
0x1464   :  { %v8459_v23 = vadd.f32 %v3110_v38, %v3109_v42  ;;  %v8819_v38 = vld [vmem:[#allocation6_spill] sm:$0xff] }
0x1466   :  { %5195 = vmatmul.mubr.f32.vlgmr.msra.gmra.mrb[30].mxu1 %v8459_v23 }
0x1467   :  { %6433 = vmatpush3.bf16.msra.mxu1 %v7563_v54  ;;  %5229 = vmatprep.mubr.msk.f32.mxu1 %vm6845_vm0, %v8746_v46 }
0x1468   :  { %6434 = vmatprep.subr.bf16.mxu1 %v8747_v14 }
0x146b   :  { %6436 = vmatpush3.bf16.msra.mxu1 %v7594_v12 }
0x146c   :  { %6437 = vmatprep.subr.bf16.mxu1 %v8747_v14 }
0x146f   :  { %6439 = vmatpush3.bf16.msra.mxu1 %v7625_v22 }
0x1470   :  { %6440 = vmatprep.subr.bf16.mxu1 %v8747_v14 }
0x1473   :  { %6442 = vmatpush3.bf16.msra.mxu1 %v7649_v44 }
0x1474   :  { %6443 = vmatprep.subr.bf16.mxu1 %v8747_v14 }
0x1477   :  { %6445 = vmatpush3.bf16.msra.mxu1 %v7677_v15 }
0x1478   :  { %6446 = vmatprep.subr.bf16.mxu1 %v8747_v14 }
0x147b   :  { %6448 = vmatpush3.bf16.msra.mxu1 %v7705_v45 }
0x147c   :  { %6449 = vmatprep.subr.bf16.mxu1 %v8747_v14 }
0x147f   :  { %6451 = vmatpush3.bf16.msra.mxu1 %v7733_v60 }
0x1480   :  { %6452 = vmatprep.subr.bf16.mxu1 %v8747_v14 }
0x1483   :  { %6454 = vmatpush3.bf16.msra.mxu1 %v7764_v11 }
0x1484   :  { %6487 = vmatprep.subr.bf16.mxu1 %v8747_v14 }
0x1539   :  { %v3178_v31 = vpop.f32.mrb[30].mxu1 }
0x153a   :  { %v3179_v2 = vadd.f32 %v8163_v27, %v3178_v31  ;;  %v5196_v7 = vpop.f32.mrb[31].mxu1  ;;  %v8820_v31 = vld [vmem:[#allocation22_spill] sm:$0xff] }
0x153b   :  { %v8824_v7 = vld [vmem:[#allocation9_spill] sm:$0xff] }
0x153c   :  { %4042 = vst [vmem:[%s8668_s9 + $0x18] sm:$0xff] %v3179_v2  ;;  %3184 = vmax.xlane.f32.xlu0 %v3179_v2 }
0x15c9   :  { %v3185_v24 = vpop.xlane.xlu0 %3184 }
0x15ca   :  { %vm3186_vm12 = vcmp.ge.f32.partialorder %v3179_v2, %v3185_v24  ;;  %v8823_v2 = vld [vmem:[#allocation23_spill] sm:$0xff]  ;;  %v8825_v24 = vld [vmem:[#allocation10_spill] sm:$0xff] }
0x15cb   :  { %v3187_v30 = vsel %vm3186_vm12, %v7761_v10, 128 }
0x15cc   :  { %v3189_v42 = vshra.s32 %v3187_v30, 16  ;;  %v3188_v28 = vand.u32 65535, %v3187_v30  ;;  %v8826_v30 = vld [vmem:[#allocation24_spill] sm:$0xff] }
0x15ce   :  { %v3191_v34 = vcvt.s32.f32 %v3189_v42  ;;  %v3190_v55 = vcvt.s32.f32 %v3188_v28  ;;  %v8827_v42 = vld [vmem:[#allocation11_spill] sm:$0xff]  ;;  %v8829_v28 = vld [vmem:[#allocation25_spill] sm:$0xff] }
0x15d0   :  { %3192 = vmin.xlane.f32.xlu1 %v3191_v34 }
0x165d   :  { %v3193_v32 = vpop.xlane.xlu1 %3192 }
0x165e   :  { %vm3194_vm13 = vcmp.eq.f32.partialorder %v3191_v34, %v3193_v32  ;;  %v3199_v27 = vcvt.f32.s32 %v3193_v32  ;;  %v8828_v34 = vld [vmem:[#allocation12_spill] sm:$0xff]  ;;  %v8830_v32 = vld [vmem:[#allocation13_spill] sm:$0xff] }
0x165f   :  { %v3195_v21 = vsel %vm3194_vm13, %v3190_v55, inf  ;;  %v8831_v55 = vld [vmem:[#allocation14_spill] sm:$0xff] }
0x1660   :  { %3196 = vmin.xlane.f32.xlu0 %v3195_v21  ;;  %v3200_v4 = vshll.u32 %v3199_v27, 16 }
0x16ed   :  { %v3197_v3 = vpop.xlane.xlu0 %3196 }
0x16ee   :  { %v3198_v52 = vcvt.f32.s32 %v3197_v3 }
0x16f0   :  { %v3201_v57 = vadd.s32 %v3200_v4, %v3198_v52  ;;  %v8832_v52 = vld [vmem:[#allocation26_spill] sm:$0xff] }
0x16f2   :  { %vm3202_vm14 = vcmp.eq.s32.totalorder %v7761_v10, %v3201_v57 }
0x16f3   :  { %4044 = vmatmul.mubr.msk.f32.vlgmr.msra.gmra.mrb[32].mxu0 %vm3202_vm14, %v8758_v49  ;;  %5230 = vmatmul.mubr.msk.f32.vlgmr.msra.gmra.mrb[32].mxu1 %vm3202_vm14, %v8758_v49 }
0x16f4   :  { %6458 = vmatpush1.bf16.msra.mxu0 %v7786_v53  ;;  %6489 = vmatpush3.bf16.msra.mxu1 %v7793_v63 }
0x16f5   :  { %6460 = vmatprep.subr.bf16.mxu0 %v7805_v25  ;;  %6490 = vmatprep.subr.bf16.mxu1 %v8747_v14 }
0x16f6   :  { %3410 = vmatprep.mubr.f32.mxu0 %v8746_v46  ;;  %5264 = vmatprep.mubr.msk.f32.mxu1 %vm6845_vm0, %v8746_v46 }
0x16f8   :  { %6462 = vmatpush1.bf16.msra.mxu0 %v7817_v36  ;;  %6492 = vmatpush3.bf16.msra.mxu1 %v7824_v47 }
0x16f9   :  { %6464 = vmatprep.subr.bf16.mxu0 %v7836_v51  ;;  %6493 = vmatprep.subr.bf16.mxu1 %v8747_v14 }
0x16fc   :  { %6466 = vmatpush1.bf16.msra.mxu0 %v7848_v6  ;;  %6495 = vmatpush3.bf16.msra.mxu1 %v7854_v19 }
0x16fd   :  { %6468 = vmatprep.subr.bf16.mxu0 %v7864_v33  ;;  %6496 = vmatprep.subr.bf16.mxu1 %v8747_v14 }
0x1700   :  { %6470 = vmatpush1.bf16.msra.mxu0 %v7876_v59  ;;  %6498 = vmatpush3.bf16.msra.mxu1 %v7882_v20 }
0x1701   :  { %6472 = vmatprep.subr.bf16.mxu0 %v7892_v40  ;;  %6499 = vmatprep.subr.bf16.mxu1 %v8747_v14 }
0x1704   :  { %6474 = vmatpush1.bf16.msra.mxu0 %v7904_v56  ;;  %6501 = vmatpush3.bf16.msra.mxu1 %v7910_v62 }
0x1705   :  { %6476 = vmatprep.subr.bf16.mxu0 %v7921_v26  ;;  %6502 = vmatprep.subr.bf16.mxu1 %v8747_v14 }
0x1708   :  { %6478 = vmatpush1.bf16.msra.mxu0 %v7934_v37  ;;  %6504 = vmatpush3.bf16.msra.mxu1 %v7936_v39 }
0x1709   :  { %6480 = vmatprep.subr.bf16.mxu0 %v7949_v61  ;;  %6505 = vmatprep.subr.bf16.mxu1 %v8747_v14 }
0x170c   :  { %6482 = vmatpush1.bf16.msra.mxu0 %v8759_v29  ;;  %6507 = vmatpush3.bf16.msra.mxu1 %v8760_v41 }
0x170d   :  { %6484 = vmatprep.subr.bf16.mxu0 %v8761_v58  ;;  %6508 = vmatprep.subr.bf16.mxu1 %v8747_v14 }
0x1710   :  { %6486 = vmatpush1.bf16.msra.mxu0 %v8762_v0  ;;  %6510 = vmatpush3.bf16.msra.mxu1 %v8763_v16 }
0x1711   :  { %6511 = vmatprep.subr.bf16.mxu0 %v8747_v14  ;;  %6536 = vmatprep.subr.bf16.mxu1 %v8764_v13  ;;  %v8814_v13 = vld [vmem:[#allocation20_spill] sm:$0xff] }
0x1713   :  { %3411 = vmatmul.mubr.f32.vlgmr.msra.gmra.mrb[32].mxu0 %v8459_v23  ;;  %5265 = vmatmul.mubr.f32.vlgmr.msra.gmra.mrb[34].mxu1 %v8459_v23 }
0x1714   :  { %6513 = vmatpush3.bf16.msra.mxu0 %v8045_v5  ;;  %5299 = vmatprep.mubr.msk.f32.mxu0 %vm6845_vm0, %v8746_v46 }
0x1715   :  { %6514 = vmatprep.subr.bf16.mxu0 %v8747_v14  ;;  %6538 = vmatpush1.bf16.msra.mxu1 %v7561_v43  ;;  %v8817_v43 = vld [vmem:[#allocation21_spill] sm:$0xff] }
0x1716   :  { %6540 = vmatprep.subr.bf16.mxu1 %v7568_v9  ;;  %3665 = vmatprep.mubr.f32.mxu1 %v8746_v46  ;;  %v8818_v9 = vld [vmem:[#allocation5_spill] sm:$0xff] }
0x1718   :  { %6516 = vmatpush3.bf16.msra.mxu0 %v8055_v35 }
0x1719   :  { %6517 = vmatprep.subr.bf16.mxu0 %v8747_v14  ;;  %6542 = vmatpush1.bf16.msra.mxu1 %v7592_v8  ;;  %v8821_v8 = vld [vmem:[#allocation7_spill] sm:$0xff] }
0x171a   :  { %6544 = vmatprep.subr.bf16.mxu1 %v7601_v18  ;;  %v8822_v18 = vld [vmem:[#allocation8_spill] sm:$0xff] }
0x171c   :  { %6519 = vmatpush3.bf16.msra.mxu0 %v8814_v13 }
0x171d   :  { %6520 = vmatprep.subr.bf16.mxu0 %v8747_v14  ;;  %6546 = vmatpush1.bf16.msra.mxu1 %v8815_v17 }
0x171e   :  { %6548 = vmatprep.subr.bf16.mxu1 %v8816_v1 }
0x1720   :  { %6522 = vmatpush3.bf16.msra.mxu0 %v8817_v43 }
0x1721   :  { %6523 = vmatprep.subr.bf16.mxu0 %v8747_v14  ;;  %6550 = vmatpush1.bf16.msra.mxu1 %v8818_v9 }
0x1722   :  { %6552 = vmatprep.subr.bf16.mxu1 %v8819_v38 }
0x1724   :  { %6525 = vmatpush3.bf16.msra.mxu0 %v8820_v31 }
0x1725   :  { %6526 = vmatprep.subr.bf16.mxu0 %v8747_v14  ;;  %6554 = vmatpush1.bf16.msra.mxu1 %v8821_v8 }
0x1726   :  { %6556 = vmatprep.subr.bf16.mxu1 %v8822_v18 }
0x1728   :  { %6528 = vmatpush3.bf16.msra.mxu0 %v8823_v2 }
0x1729   :  { %6529 = vmatprep.subr.bf16.mxu0 %v8747_v14  ;;  %6558 = vmatpush1.bf16.msra.mxu1 %v8824_v7 }
0x172a   :  { %6560 = vmatprep.subr.bf16.mxu1 %v8825_v24 }
0x172c   :  { %6531 = vmatpush3.bf16.msra.mxu0 %v8826_v30 }
0x172d   :  { %6532 = vmatprep.subr.bf16.mxu0 %v8747_v14  ;;  %6562 = vmatpush1.bf16.msra.mxu1 %v8827_v42 }
0x172e   :  { %6564 = vmatprep.subr.bf16.mxu1 %v8828_v34 }
0x1730   :  { %6534 = vmatpush3.bf16.msra.mxu0 %v8829_v28 }
0x1731   :  { %6567 = vmatprep.subr.bf16.mxu0 %v8747_v14  ;;  %6566 = vmatpush1.bf16.msra.mxu1 %v8830_v32 }
0x1732   :  { %6592 = vmatprep.subr.bf16.mxu1 %v8831_v55 }
0x17c6   :  { %v3342_v21 = vpop.f32.mrb[32].mxu1 }
0x17c7   :  { %v5231_v27 = vpop.f32.mrb[33].mxu1 }
0x17e6   :  { %v3412_v3 = vpop.f32.mrb[32].mxu0  ;;  %v3483_v4 = vpop.f32.mrb[34].mxu1 }
0x17e7   :  { %v3413_v57 = vadd.f32 %v3412_v3, %v8832_v52  ;;  %v3414_v17 = vpop.f32.mrb[33].mxu0  ;;  %v5266_v1 = vpop.f32.mrb[35].mxu1  ;;  %v3484_v34 = vadd.f32 %v3483_v4, %v8134_v48 }
0x17e8   :  { %v3415_v38 = vadd.f32 %v3414_v17, %v8128_v50 }
0x17e9   :  { %v4046_v9 = vmul.f32 -1.442695, %v3413_v57 }
0x17ea   :  { %v4047_v8 = vmul.f32 -1.442695, %v3415_v38 }
0x17eb   :  { %6822 = vpow2.f32 %v4046_v9 }
0x17ec   :  { %6824 = vpow2.f32 %v4047_v8 }
0x17f5   :  { %v6823_v18 = vpop.eup %6822 }
0x17f6   :  { %v3491_v7 = vadd.f32 1.0, %v6823_v18  ;;  %v6825_v24 = vpop.eup %6824 }
0x17f7   :  { %v3498_v42 = vadd.f32 1.0, %v6825_v24 }
0x17f8   :  { %6826 = vrcp.f32 %v3491_v7 }
0x17f9   :  { %6828 = vrcp.f32 %v3498_v42 }
0x1802   :  { %v6827_v32 = vpop.eup %6826 }
0x1803   :  { %v3501_v55 = vmul.f32 %v6827_v32, %v3484_v34  ;;  %v6829_v3 = vpop.eup %6828 }
0x1804   :  { %v3504_v1 = vsub.f32 1.0, %v6829_v3  ;;  %v3506_v17 = vmul.f32 %v6829_v3, %v8459_v23 }
0x1805   :  { %v3502_v27 = vadd.f32 %v3501_v55, %v3342_v21 }
0x1807   :  { %6830 = vtanh.f32 %v3502_v27 }
0x1811   :  { %v6831_v57 = vpop.eup %6830 }
0x1812   :  { %v3505_v52 = vmul.f32 %v6831_v57, %v3504_v1 }
0x1814   :  { %v8564_v9 = vadd.f32 %v3506_v17, %v3505_v52 }
0x1816   :  { %5300 = vmatmul.mubr.f32.vlgmr.msra.gmra.mrb[34].mxu0 %v8564_v9 }
0x1817   :  { %6569 = vmatpush3.bf16.msra.mxu0 %v7563_v54  ;;  %5334 = vmatprep.mubr.msk.f32.mxu0 %vm6845_vm0, %v8746_v46 }
0x1818   :  { %6570 = vmatprep.subr.bf16.mxu0 %v8747_v14 }
0x181b   :  { %6572 = vmatpush3.bf16.msra.mxu0 %v7594_v12  ;;  %v8588_v12 = vld [vmem:[%s8667_s8] ss:$0 sm:$0xff] }
0x181c   :  { %6573 = vmatprep.subr.bf16.mxu0 %v8747_v14 }
0x181f   :  { %6575 = vmatpush3.bf16.msra.mxu0 %v7625_v22 }
0x1820   :  { %6576 = vmatprep.subr.bf16.mxu0 %v8747_v14 }
0x1823   :  { %6578 = vmatpush3.bf16.msra.mxu0 %v7649_v44 }
0x1824   :  { %6579 = vmatprep.subr.bf16.mxu0 %v8747_v14 }
0x1827   :  { %6581 = vmatpush3.bf16.msra.mxu0 %v7677_v15 }
0x1828   :  { %6582 = vmatprep.subr.bf16.mxu0 %v8747_v14 }
0x182b   :  { %6584 = vmatpush3.bf16.msra.mxu0 %v7705_v45 }
0x182c   :  { %6585 = vmatprep.subr.bf16.mxu0 %v8747_v14 }
0x182f   :  { %6587 = vmatpush3.bf16.msra.mxu0 %v7733_v60 }
0x1830   :  { %6588 = vmatprep.subr.bf16.mxu0 %v8747_v14 }
0x1833   :  { %6590 = vmatpush3.bf16.msra.mxu0 %v7764_v11 }
0x1834   :  { %6623 = vmatprep.subr.bf16.mxu0 %v8747_v14 }
0x18e9   :  { %v3574_v54 = vpop.f32.mrb[34].mxu0 }
0x18ea   :  { %v3575_v22 = vadd.f32 %v8588_v12, %v3574_v54  ;;  %v5301_v44 = vpop.f32.mrb[35].mxu0 }
0x18ec   :  { %4048 = vst [vmem:[%s8668_s9 + $0x20] sm:$0xff] %v3575_v22  ;;  %3580 = vmax.xlane.f32.xlu1 %v3575_v22 }
0x1979   :  { %v3581_v15 = vpop.xlane.xlu1 %3580 }
0x197a   :  { %vm3582_vm15 = vcmp.ge.f32.partialorder %v3575_v22, %v3581_v15 }
0x197b   :  { %v3583_v45 = vsel %vm3582_vm15, %v7761_v10, 128 }
0x197c   :  { %v3585_v60 = vshra.s32 %v3583_v45, 16  ;;  %v3584_v23 = vand.u32 65535, %v3583_v45 }
0x197e   :  { %v3587_v11 = vcvt.s32.f32 %v3585_v60  ;;  %v3586_v4 = vcvt.s32.f32 %v3584_v23 }
0x1980   :  { %3588 = vmin.xlane.f32.xlu0 %v3587_v11 }
0x1a0d   :  { %v3589_v21 = vpop.xlane.xlu0 %3588 }
0x1a0e   :  { %vm3590_vm1 = vcmp.eq.f32.partialorder %v3587_v11, %v3589_v21  ;;  %v3595_v38 = vcvt.f32.s32 %v3589_v21 }
0x1a0f   :  { %v3591_v52 = vsel %vm3590_vm1, %v3586_v4, inf }
0x1a10   :  { %3592 = vmin.xlane.f32.xlu1 %v3591_v52  ;;  %v3596_v18 = vshll.u32 %v3595_v38, 16 }
0x1a9d   :  { %v3593_v8 = vpop.xlane.xlu1 %3592 }
0x1a9e   :  { %v3594_v7 = vcvt.f32.s32 %v3593_v8 }
0x1aa0   :  { %v3597_v24 = vadd.s32 %v3596_v18, %v3594_v7 }
0x1aa2   :  { %vm3598_vm2 = vcmp.eq.s32.totalorder %v7761_v10, %v3597_v24 }
0x1aa3   :  { %4050 = vmatmul.mubr.msk.f32.vlgmr.msra.gmra.mrb[36].mxu1 %vm3598_vm2, %v8758_v49  ;;  %5335 = vmatmul.mubr.msk.f32.vlgmr.msra.gmra.mrb[36].mxu0 %vm3598_vm2, %v8758_v49 }
0x1aa4   :  { %6594 = vmatpush1.bf16.msra.mxu1 %v7786_v53  ;;  %6625 = vmatpush3.bf16.msra.mxu0 %v7793_v63 }
0x1aa5   :  { %6596 = vmatprep.subr.bf16.mxu1 %v7805_v25  ;;  %6626 = vmatprep.subr.bf16.mxu0 %v8747_v14 }
0x1aa6   :  { %3806 = vmatprep.mubr.f32.mxu1 %v8746_v46  ;;  %5369 = vmatprep.mubr.msk.f32.mxu0 %vm6845_vm0, %v8746_v46 }
0x1aa8   :  { %6598 = vmatpush1.bf16.msra.mxu1 %v7817_v36  ;;  %6628 = vmatpush3.bf16.msra.mxu0 %v7824_v47  ;;  %v8833_v36 = vld [vmem:[#allocation26_spill] sm:$0xff] }
0x1aa9   :  { %6600 = vmatprep.subr.bf16.mxu1 %v7836_v51  ;;  %6629 = vmatprep.subr.bf16.mxu0 %v8747_v14 }
0x1aac   :  { %6602 = vmatpush1.bf16.msra.mxu1 %v7848_v6  ;;  %6631 = vmatpush3.bf16.msra.mxu0 %v7854_v19 }
0x1aad   :  { %6604 = vmatprep.subr.bf16.mxu1 %v7864_v33  ;;  %6632 = vmatprep.subr.bf16.mxu0 %v8747_v14 }
0x1ab0   :  { %6606 = vmatpush1.bf16.msra.mxu1 %v7876_v59  ;;  %6634 = vmatpush3.bf16.msra.mxu0 %v7882_v20 }
0x1ab1   :  { %6608 = vmatprep.subr.bf16.mxu1 %v7892_v40  ;;  %6635 = vmatprep.subr.bf16.mxu0 %v8747_v14 }
0x1ab4   :  { %6610 = vmatpush1.bf16.msra.mxu1 %v7904_v56  ;;  %6637 = vmatpush3.bf16.msra.mxu0 %v7910_v62 }
0x1ab5   :  { %6612 = vmatprep.subr.bf16.mxu1 %v7921_v26  ;;  %6638 = vmatprep.subr.bf16.mxu0 %v8747_v14 }
0x1ab8   :  { %6614 = vmatpush1.bf16.msra.mxu1 %v7934_v37  ;;  %6640 = vmatpush3.bf16.msra.mxu0 %v7936_v39 }
0x1ab9   :  { %6616 = vmatprep.subr.bf16.mxu1 %v7949_v61  ;;  %6641 = vmatprep.subr.bf16.mxu0 %v8747_v14 }
0x1abc   :  { %6618 = vmatpush1.bf16.msra.mxu1 %v8759_v29  ;;  %6643 = vmatpush3.bf16.msra.mxu0 %v8760_v41 }
0x1abd   :  { %6620 = vmatprep.subr.bf16.mxu1 %v8761_v58  ;;  %6644 = vmatprep.subr.bf16.mxu0 %v8747_v14 }
0x1ac0   :  { %6622 = vmatpush1.bf16.msra.mxu1 %v8762_v0  ;;  %6646 = vmatpush3.bf16.msra.mxu0 %v8763_v16 }
0x1ac1   :  { %6647 = vmatprep.subr.bf16.mxu1 %v8747_v14 }
0x1ac3   :  { %3807 = vmatmul.mubr.f32.vlgmr.msra.gmra.mrb[36].mxu1 %v8564_v9  ;;  %5370 = vmatmul.mubr.f32.vlgmr.msra.gmra.mrb[38].mxu0 %v8564_v9 }
0x1ac4   :  { %6649 = vmatpush3.bf16.msra.mxu1 %v8045_v5  ;;  %5404 = vmatprep.mubr.msk.f32.mxu1 %vm6845_vm0, %v8746_v46 }
0x1ac5   :  { %6650 = vmatprep.subr.bf16.mxu1 %v8747_v14 }
0x1ac8   :  { %6652 = vmatpush3.bf16.msra.mxu1 %v8055_v35 }
0x1ac9   :  { %6653 = vmatprep.subr.bf16.mxu1 %v8747_v14 }
0x1acc   :  { %6655 = vmatpush3.bf16.msra.mxu1 %v8814_v13 }
0x1acd   :  { %6656 = vmatprep.subr.bf16.mxu1 %v8747_v14 }
0x1ad0   :  { %6658 = vmatpush3.bf16.msra.mxu1 %v8817_v43 }
0x1ad1   :  { %6659 = vmatprep.subr.bf16.mxu1 %v8747_v14 }
0x1ad4   :  { %6661 = vmatpush3.bf16.msra.mxu1 %v8820_v31 }
0x1ad5   :  { %6662 = vmatprep.subr.bf16.mxu1 %v8747_v14 }
0x1ad8   :  { %6664 = vmatpush3.bf16.msra.mxu1 %v8823_v2 }
0x1ad9   :  { %6665 = vmatprep.subr.bf16.mxu1 %v8747_v14 }
0x1adc   :  { %6667 = vmatpush3.bf16.msra.mxu1 %v8826_v30 }
0x1add   :  { %6668 = vmatprep.subr.bf16.mxu1 %v8747_v14 }
0x1ae0   :  { %6670 = vmatpush3.bf16.msra.mxu1 %v8829_v28 }
0x1b76   :  { %v3738_v10 = vpop.f32.mrb[36].mxu0 }
0x1b77   :  { %v5336_v53 = vpop.f32.mrb[37].mxu0 }
0x1b96   :  { %v3808_v63 = vpop.f32.mrb[36].mxu1  ;;  %v3879_v25 = vpop.f32.mrb[38].mxu0 }
0x1b97   :  { %v3809_v47 = vadd.f32 %v3808_v63, %v8833_v36  ;;  %v3810_v51 = vpop.f32.mrb[37].mxu1  ;;  %v5371_v6 = vpop.f32.mrb[39].mxu0  ;;  %v3880_v26 = vadd.f32 %v3879_v25, %v8134_v48 }
0x1b98   :  { %v3811_v33 = vadd.f32 %v3810_v51, %v8128_v50 }
0x1b99   :  { %v4052_v19 = vmul.f32 -1.442695, %v3809_v47 }
0x1b9a   :  { %v4053_v59 = vmul.f32 -1.442695, %v3811_v33 }
0x1b9b   :  { %6832 = vpow2.f32 %v4052_v19 }
0x1b9c   :  { %6834 = vpow2.f32 %v4053_v59 }
0x1ba5   :  { %v6833_v20 = vpop.eup %6832 }
0x1ba6   :  { %v3887_v40 = vadd.f32 1.0, %v6833_v20  ;;  %v6835_v56 = vpop.eup %6834 }
0x1ba7   :  { %v3894_v62 = vadd.f32 1.0, %v6835_v56 }
0x1ba8   :  { %6836 = vrcp.f32 %v3887_v40 }
0x1ba9   :  { %6838 = vrcp.f32 %v3894_v62 }
0x1bb2   :  { %v6837_v37 = vpop.eup %6836 }
0x1bb3   :  { %v3897_v39 = vmul.f32 %v6837_v37, %v3880_v26  ;;  %v6839_v46 = vpop.eup %6838 }
0x1bb4   :  { %v3900_v5 = vsub.f32 1.0, %v6839_v46  ;;  %v3902_v50 = vmul.f32 %v6839_v46, %v8564_v9 }
0x1bb5   :  { %v3898_v61 = vadd.f32 %v3897_v39, %v3738_v10 }
0x1bb7   :  { %6840 = vtanh.f32 %v3898_v61 }
0x1bc1   :  { %v6841_v14 = vpop.eup %6840 }
0x1bc2   :  { %v3901_v35 = vmul.f32 %v6841_v14, %v3900_v5 }
0x1bc4   :  { %v3903_v49 = vadd.f32 %v3902_v50, %v3901_v35 }
0x1bc6   :  { %5405 = vmatmul.mubr.f32.vlgmr.msra.gmra.mrb[38].mxu1 %v3903_v49 }
0x1c99   :  { %v3970_v29 = vpop.f32.mrb[38].mxu1 }
0x1c9a   :  { %v3971_v41 = vadd.f32 %v8588_v12, %v3970_v29  ;;  %v5406_v58 = vpop.f32.mrb[39].mxu1 }
0x1c9c   :  { %4054 = vst [vmem:[%s8668_s9 + $0x28] sm:$0xff] %v3971_v41 }

</bundles_post_ra>
